<compile_context>
chip_gen: v7x
topology: tpu7x:2x2x1
jax: 0.10.0
libtpu: 0.0.40
codegen_flags: <defaults>
</compile_context>

<pallas_src>
import numpy as np
import jax
import jax.numpy as jnp
from jax.experimental import pallas as pl
from jax.experimental.pallas import tpu as pltpu


# --------------------------------------------------------------------------
# helpers
# --------------------------------------------------------------------------
def _round_up(x, m):
    return ((x + m - 1) // m) * m


def _log_sigmoid(x):
    # numerically stable log(sigmoid(x)) = min(x, 0) - log(1 + exp(-|x|))
    return jnp.minimum(x, 0.0) - jnp.log(1.0 + jnp.exp(-jnp.abs(x)))


def _elu_plus_one(x):
    # nn.ELU(alpha=1)(x) + 1; exp argument clamped so the untaken branch
    # cannot overflow.
    return jnp.where(x > 0, x + 1.0, jnp.exp(jnp.minimum(x, 0.0)))


# --------------------------------------------------------------------------
# Kernels
# --------------------------------------------------------------------------
def _dice_loss_kernel(u_int_ref, u_pop_ref, ip_int_ref, ip_pop_ref,
                      in_int_ref, in_pop_ref,
                      pow_p_ref, pow_n_ref, mask_ref, valid_ref,
                      out_ref, acc_ref):
    step = pl.program_id(0)

    @pl.when(step == 0)
    def _init():
        acc_ref[0] = 0.0
        acc_ref[1] = 0.0
        acc_ref[2] = 0.0
        acc_ref[3] = 0.0

    u_int = u_int_ref[...]                      # [Gb, 128, E]
    u_pop = u_pop_ref[...]

    # per-pair dot products, lane-dense [Gb, 128]
    p_int = jnp.sum(u_int * ip_int_ref[...], axis=-1)
    n_int = jnp.sum(u_int * in_int_ref[...], axis=-1)
    p_pop = jnp.sum(u_pop * ip_pop_ref[...], axis=-1)
    n_pop = jnp.sum(u_pop * in_pop_ref[...], axis=-1)

    m = mask_ref[...]                           # [Gb, 128] in {0, 1}
    valid = valid_ref[...]                      # [Gb, 128] in {0, 1}

    # mask_bpr_loss(p_int, n_int, mask)        (sum part)
    s_int = jnp.sum(m * _log_sigmoid(p_int - n_int))
    # mask_bpr_loss(n_pop, p_pop, mask)        (sum part)
    s_pop_mask = jnp.sum(m * _log_sigmoid(n_pop - p_pop))
    # pop_bpr_loss(p_pop, n_pop, pop_p, pop_n, gamma, ~mask); pow() hoisted
    diff = (_elu_plus_one(p_pop) * pow_p_ref[...]
            - _elu_plus_one(n_pop) * pow_n_ref[...])
    s_pop_inv = jnp.sum((valid - m) * _log_sigmoid(diff))
    # bpr_loss(p_total, n_total)
    s_tot = jnp.sum(valid * _log_sigmoid((p_int + p_pop) - (n_int + n_pop)))

    acc_ref[0] += s_int
    acc_ref[1] += s_pop_mask
    acc_ref[2] += s_pop_inv
    acc_ref[3] += s_tot

    @pl.when(step == pl.num_programs(0) - 1)
    def _emit():
        out_ref[0] = acc_ref[0]
        out_ref[1] = acc_ref[1]
        out_ref[2] = acc_ref[2]
        out_ref[3] = acc_ref[3]


def _sse_kernel(a_ref, b_ref, out_ref, acc_ref):
    step = pl.program_id(0)

    @pl.when(step == 0)
    def _init():
        acc_ref[0] = 0.0

    d = a_ref[...] - b_ref[...]
    acc_ref[0] += jnp.sum(d * d)

    @pl.when(step == pl.num_programs(0) - 1)
    def _emit():
        out_ref[0] = acc_ref[0]


# --------------------------------------------------------------------------
# Pallas wrappers
# --------------------------------------------------------------------------
def dice_loss_sums(u_int, u_pop, ip_int, ip_pop, in_int, in_pop,
                   pow_p, pow_n, mask_f, valid_f, *, tile_rows):
    N_pad, E = u_int.shape
    assert N_pad % 128 == 0 and N_pad % tile_rows == 0
    g_total = N_pad // 128
    gb = tile_rows // 128
    # (8,128) rule on the column blocks: sublane count must be a multiple of 8
    # unless the block covers the whole axis.
    assert gb == g_total or gb % 8 == 0
    grid = (g_total // gb,)

    def r3(x):
        return x.reshape(g_total, 128, E)

    def r2(x):
        return x.reshape(g_total, 128)

    emb_spec = pl.BlockSpec((gb, 128, E), lambda i: (i, 0, 0))
    col_spec = pl.BlockSpec((gb, 128), lambda i: (i, 0))

    return pl.pallas_call(
        _dice_loss_kernel,
        out_shape=jax.ShapeDtypeStruct((4,), jnp.float32),
        grid=grid,
        in_specs=[emb_spec] * 6 + [col_spec] * 4,
        out_specs=pl.BlockSpec(memory_space=pltpu.SMEM),
        scratch_shapes=[pltpu.SMEM((4,), jnp.float32)],
        compiler_params=pltpu.CompilerParams(
            dimension_semantics=("arbitrary",),
            vmem_limit_bytes=48 * 1024 * 1024),
    )(r3(u_int), r3(u_pop), r3(ip_int), r3(ip_pop), r3(in_int), r3(in_pop),
      r2(pow_p), r2(pow_n), r2(mask_f), r2(valid_f))


def sum_squared_error(a, b, *, tile_elems=128 * 128):
    # Lane-dense SSE: flatten, pad to a fixed element bucket (zero padding
    # contributes nothing to the sum), reshape to [rows, 128].
    n = a.size
    n_pad = max(_round_up(n, tile_elems), tile_elems)
    af = jnp.pad(a.reshape(-1), (0, n_pad - n)).reshape(n_pad // 128, 128)
    bf = jnp.pad(b.reshape(-1), (0, n_pad - n)).reshape(n_pad // 128, 128)
    rows = n_pad // 128
    tr = tile_elems // 128
    spec = pl.BlockSpec((tr, 128), lambda i: (i, 0))
    out = pl.pallas_call(
        _sse_kernel,
        out_shape=jax.ShapeDtypeStruct((1,), jnp.float32),
        grid=(rows // tr,),
        in_specs=[spec, spec],
        out_specs=pl.BlockSpec(memory_space=pltpu.SMEM),
        scratch_shapes=[pltpu.SMEM((1,), jnp.float32)],
        compiler_params=pltpu.CompilerParams(
            dimension_semantics=("arbitrary",)),
    )(af, bf)
    return out[0]


# --------------------------------------------------------------------------
# DICE forward (glue: gathers, unique, final scalar combination)
# --------------------------------------------------------------------------
def dice_forward(params, user, item_p, item_n, mask,
                 int_weight, pop_weight, dis_pen, gamma, *, max_tile_rows=2048):
    B, S = user.shape
    N = B * S

    # Adaptive padding: single tile (padded to a 128 multiple) when small,
    # otherwise stream in max_tile_rows tiles (multiple of 1024 so the
    # column blocks keep an 8-aligned sublane count).
    assert max_tile_rows % 1024 == 0
    if N <= max_tile_rows:
        N_pad = max(_round_up(N, 128), 128)
        tile_rows = N_pad
    else:
        N_pad = _round_up(N, max_tile_rows)
        tile_rows = max_tile_rows
    pad = N_pad - N

    def pad_idx(x):
        return jnp.pad(x.reshape(-1).astype(jnp.int32), (0, pad))

    u = pad_idx(user)
    ip = pad_idx(item_p)
    inn = pad_idx(item_n)
    mask_f = jnp.pad(mask.reshape(-1).astype(jnp.float32), (0, pad))
    valid_f = jnp.pad(jnp.ones((N,), jnp.float32), (0, pad))

    # Embedding gathers (XLA row gathers), kept f32 to match the reference.
    # TODO(synk): fusing these gathers into the kernel (scalar-prefetch +
    # manual DMA row gather) would halve HBM traffic on the dominant data.
    u_int = params["users_int"][u]
    u_pop = params["users_pop"][u]
    ip_int = params["items_int"][ip]
    ip_pop = params["items_pop"][ip]
    in_int = params["items_int"][inn]
    in_pop = params["items_pop"][inn]

    # Hoist pow() onto the small item table: kernel only multiplies.
    pow_tbl = params["blen_pop"] ** gamma
    pow_p = pow_tbl[ip]
    pow_n = pow_tbl[inn]

    sums = dice_loss_sums(u_int, u_pop, ip_int, ip_pop, in_int, in_pop,
                          pow_p, pow_n, mask_f, valid_f, tile_rows=tile_rows)

    loss_int = -sums[0] / N
    loss_pop = -(sums[1] + sums[2]) / N
    loss_total = -sums[3] / N

    # TODO(synk): torch.unique has data-dependent output size -> host np.unique
    # (forces a host sync; rows are padded to a fixed element bucket before the
    # Pallas MSE kernel to limit recompiles).
    item_all = np.unique(np.concatenate(
        [np.asarray(item_p).reshape(-1), np.asarray(item_n).reshape(-1)]))
    user_all = np.unique(np.asarray(user).reshape(-1))

    item_int_u = params["items_int"][item_all]
    item_pop_u = params["items_pop"][item_all]
    user_int_u = params["users_int"][user_all]
    user_pop_u = params["users_pop"][user_all]

    discrepancy = (
        sum_squared_error(item_int_u, item_pop_u) / item_int_u.size
        + sum_squared_error(user_int_u, user_pop_u) / user_int_u.size)

    loss = (int_weight * loss_int + pop_weight * loss_pop + loss_total
            - dis_pen * discrepancy)
    return loss


# --------------------------------------------------------------------------
# Pure-JAX reference (mirrors the PyTorch module) for a sanity check
# --------------------------------------------------------------------------
def _reference_loss(params, user, item_p, item_n, mask,
                    int_weight, pop_weight, dis_pen, gamma):
    u = user.reshape(-1)
    ip = item_p.reshape(-1)
    inn = item_n.reshape(-1)
    m = mask.reshape(-1).astype(jnp.float32)

    u_int = params["users_int"][u]
    u_pop = params["users_pop"][u]
    p_int = jnp.sum(u_int * params["items_int"][ip], axis=1)
    n_int = jnp.sum(u_int * params["items_int"][inn], axis=1)
    p_pop = jnp.sum(u_pop * params["items_pop"][ip], axis=1)
    n_pop = jnp.sum(u_pop * params["items_pop"][inn], axis=1)
    pop_p = params["blen_pop"][ip]
    pop_n = params["blen_pop"][inn]

    def ls(x):
        return jnp.log(jax.nn.sigmoid(x))

    def elu1(x):
        return jnp.where(x > 0, x + 1.0, jnp.exp(x))

    loss_int = -jnp.mean(m * ls(p_int - n_int))
    diff = elu1(p_pop) * pop_p ** gamma - elu1(n_pop) * pop_n ** gamma
    loss_pop = (-jnp.mean(m * ls(n_pop - p_pop))
                - jnp.mean((1.0 - m) * ls(diff)))
    loss_total = -jnp.mean(ls(p_int + p_pop - n_int - n_pop))

    item_all = np.unique(np.concatenate([np.asarray(ip), np.asarray(inn)]))
    user_all = np.unique(np.asarray(u))
    disc = (jnp.mean((params["items_int"][item_all]
                      - params["items_pop"][item_all]) ** 2)
            + jnp.mean((params["users_int"][user_all]
                        - params["users_pop"][user_all]) ** 2))
    return (int_weight * loss_int + pop_weight * loss_pop + loss_total
            - dis_pen * disc)


# --------------------------------------------------------------------------
# Main
# --------------------------------------------------------------------------
if __name__ == "__main__":
    num_users, num_items, emb = 10, 20, 32
    B, S = 2, 8
    int_weight, pop_weight, dis_pen, gamma = 0.1, 0.1, 0.01, 0.02

    key = jax.random.PRNGKey(0)
    k = jax.random.split(key, 8)
    params = {
        "users_int": 0.1 * jax.random.normal(k[0], (num_users, emb), jnp.float32),
        "users_pop": 0.1 * jax.random.normal(k[1], (num_users, emb), jnp.float32),
        "items_int": 0.1 * jax.random.normal(k[2], (num_items, emb), jnp.float32),
        "items_pop": 0.1 * jax.random.normal(k[3], (num_items, emb), jnp.float32),
        "blen_pop": jax.random.uniform(k[4], (num_items,), jnp.float32,
                                       minval=0.1, maxval=1.0),
    }
    user = jax.random.randint(k[5], (B, S), 0, num_users, dtype=jnp.int32)
    item_p = jax.random.randint(k[6], (B, S), 0, num_items, dtype=jnp.int32)
    item_n = jax.random.randint(k[7], (B, S), 0, num_items, dtype=jnp.int32)
    mask = jax.random.uniform(jax.random.PRNGKey(42), (B, S)) > 0.5

    loss = dice_forward(params, user, item_p, item_n, mask,
                        int_weight, pop_weight, dis_pen, gamma)
    loss = jax.block_until_ready(loss)
    assert jnp.isfinite(loss), "loss is not finite"

    ref = _reference_loss(params, user, item_p, item_n, mask,
                          int_weight, pop_weight, dis_pen, gamma)
    assert abs(float(loss) - float(ref)) < 1e-4, (float(loss), float(ref))
    print("KERNEL_OK")
</pallas_src>

<mosaic_0001>
module attributes {stable_mosaic.version = 11 : i64} {
  func.func @_dice_loss_kernel(%arg0: i32, %arg1: memref<1x128x32xf32, #tpu.memory_space<vmem>>, %arg2: memref<1x128x32xf32, #tpu.memory_space<vmem>>, %arg3: memref<1x128x32xf32, #tpu.memory_space<vmem>>, %arg4: memref<1x128x32xf32, #tpu.memory_space<vmem>>, %arg5: memref<1x128x32xf32, #tpu.memory_space<vmem>>, %arg6: memref<1x128x32xf32, #tpu.memory_space<vmem>>, %arg7: memref<1x128xf32, #tpu.memory_space<vmem>>, %arg8: memref<1x128xf32, #tpu.memory_space<vmem>>, %arg9: memref<1x128xf32, #tpu.memory_space<vmem>>, %arg10: memref<1x128xf32, #tpu.memory_space<vmem>>, %arg11: memref<4xf32, #tpu.memory_space<smem>>, %arg12: memref<4xf32, #tpu.memory_space<smem>>) attributes {dimension_semantics = [#tpu.dimension_semantics<arbitrary>], iteration_bounds = array<i64: 1>, scalar_prefetch = 0 : i64, scratch_operands = 1 : i64, tpu.core_type = #tpu.core_type<tc>, window_params = [{transform_indices = @transform_0, window_bounds = array<i64: 1, 128, 32>}, {transform_indices = @transform_1, window_bounds = array<i64: 1, 128, 32>}, {transform_indices = @transform_2, window_bounds = array<i64: 1, 128, 32>}, {transform_indices = @transform_3, window_bounds = array<i64: 1, 128, 32>}, {transform_indices = @transform_4, window_bounds = array<i64: 1, 128, 32>}, {transform_indices = @transform_5, window_bounds = array<i64: 1, 128, 32>}, {transform_indices = @transform_6, window_bounds = array<i64: 1, 128>}, {transform_indices = @transform_7, window_bounds = array<i64: 1, 128>}, {transform_indices = @transform_8, window_bounds = array<i64: 1, 128>}, {transform_indices = @transform_9, window_bounds = array<i64: 1, 128>}, {transform_indices = @transform_10, window_bounds = array<i64: 4>}]} {
    %c0_i32 = arith.constant 0 : i32
    %0 = arith.cmpi eq, %arg0, %c0_i32 : i32
    %1 = arith.extui %0 : i1 to i32
    %c0_i32_0 = arith.constant 0 : i32
    %2 = arith.cmpi ne, %1, %c0_i32_0 : i32
    scf.if %2 {
      %cst_58 = arith.constant 0.000000e+00 : f32
      %c0_59 = arith.constant 0 : index
      %121 = memref.load %arg12[%c0_59] : memref<4xf32, #tpu.memory_space<smem>>
      memref.store %cst_58, %arg12[%c0_59] : memref<4xf32, #tpu.memory_space<smem>>
      %cst_60 = arith.constant 0.000000e+00 : f32
      %c1_61 = arith.constant 1 : index
      %122 = memref.load %arg12[%c1_61] : memref<4xf32, #tpu.memory_space<smem>>
      memref.store %cst_60, %arg12[%c1_61] : memref<4xf32, #tpu.memory_space<smem>>
      %cst_62 = arith.constant 0.000000e+00 : f32
      %c2_63 = arith.constant 2 : index
      %123 = memref.load %arg12[%c2_63] : memref<4xf32, #tpu.memory_space<smem>>
      memref.store %cst_62, %arg12[%c2_63] : memref<4xf32, #tpu.memory_space<smem>>
      %cst_64 = arith.constant 0.000000e+00 : f32
      %c3_65 = arith.constant 3 : index
      %124 = memref.load %arg12[%c3_65] : memref<4xf32, #tpu.memory_space<smem>>
      memref.store %cst_64, %arg12[%c3_65] : memref<4xf32, #tpu.memory_space<smem>>
    } else {
    }
    %c0 = arith.constant 0 : index
    %c0_1 = arith.constant 0 : index
    %c0_2 = arith.constant 0 : index
    %3 = vector.load %arg1[%c0, %c0_1, %c0_2] : memref<1x128x32xf32, #tpu.memory_space<vmem>>, vector<1x128x32xf32>
    %c0_3 = arith.constant 0 : index
    %c0_4 = arith.constant 0 : index
    %c0_5 = arith.constant 0 : index
    %4 = vector.load %arg2[%c0_3, %c0_4, %c0_5] : memref<1x128x32xf32, #tpu.memory_space<vmem>>, vector<1x128x32xf32>
    %c0_6 = arith.constant 0 : index
    %c0_7 = arith.constant 0 : index
    %c0_8 = arith.constant 0 : index
    %5 = vector.load %arg3[%c0_6, %c0_7, %c0_8] : memref<1x128x32xf32, #tpu.memory_space<vmem>>, vector<1x128x32xf32>
    %6 = arith.mulf %3, %5 : vector<1x128x32xf32>
    %cst = arith.constant dense<0.000000e+00> : vector<1x128xf32>
    %7 = vector.multi_reduction <add>, %6, %cst [2] : vector<1x128x32xf32> to vector<1x128xf32>
    %c0_9 = arith.constant 0 : index
    %c0_10 = arith.constant 0 : index
    %c0_11 = arith.constant 0 : index
    %8 = vector.load %arg5[%c0_9, %c0_10, %c0_11] : memref<1x128x32xf32, #tpu.memory_space<vmem>>, vector<1x128x32xf32>
    %9 = arith.mulf %3, %8 : vector<1x128x32xf32>
    %cst_12 = arith.constant dense<0.000000e+00> : vector<1x128xf32>
    %10 = vector.multi_reduction <add>, %9, %cst_12 [2] : vector<1x128x32xf32> to vector<1x128xf32>
    %c0_13 = arith.constant 0 : index
    %c0_14 = arith.constant 0 : index
    %c0_15 = arith.constant 0 : index
    %11 = vector.load %arg4[%c0_13, %c0_14, %c0_15] : memref<1x128x32xf32, #tpu.memory_space<vmem>>, vector<1x128x32xf32>
    %12 = arith.mulf %4, %11 : vector<1x128x32xf32>
    %cst_16 = arith.constant dense<0.000000e+00> : vector<1x128xf32>
    %13 = vector.multi_reduction <add>, %12, %cst_16 [2] : vector<1x128x32xf32> to vector<1x128xf32>
    %c0_17 = arith.constant 0 : index
    %c0_18 = arith.constant 0 : index
    %c0_19 = arith.constant 0 : index
    %14 = vector.load %arg6[%c0_17, %c0_18, %c0_19] : memref<1x128x32xf32, #tpu.memory_space<vmem>>, vector<1x128x32xf32>
    %15 = arith.mulf %4, %14 : vector<1x128x32xf32>
    %cst_20 = arith.constant dense<0.000000e+00> : vector<1x128xf32>
    %16 = vector.multi_reduction <add>, %15, %cst_20 [2] : vector<1x128x32xf32> to vector<1x128xf32>
    %c0_21 = arith.constant 0 : index
    %c0_22 = arith.constant 0 : index
    %17 = vector.load %arg9[%c0_21, %c0_22] : memref<1x128xf32, #tpu.memory_space<vmem>>, vector<1x128xf32>
    %c0_23 = arith.constant 0 : index
    %c0_24 = arith.constant 0 : index
    %18 = vector.load %arg10[%c0_23, %c0_24] : memref<1x128xf32, #tpu.memory_space<vmem>>, vector<1x128xf32>
    %19 = arith.subf %7, %10 : vector<1x128xf32>
    %cst_25 = arith.constant 0.000000e+00 : f32
    %20 = vector.broadcast %cst_25 : f32 to vector<1x128xf32>
    %21 = arith.minimumf %19, %20 : vector<1x128xf32>
    %22 = math.absf %19 : vector<1x128xf32>
    %cst_26 = arith.constant 0.000000e+00 : f32
    %23 = vector.broadcast %cst_26 : f32 to vector<1x128xf32>
    %24 = arith.subf %23, %22 : vector<1x128xf32>
    %25 = math.exp %24 : vector<1x128xf32>
    %cst_27 = arith.constant 1.000000e+00 : f32
    %26 = vector.broadcast %cst_27 : f32 to vector<1x128xf32>
    %27 = arith.addf %26, %25 : vector<1x128xf32>
    %28 = math.log %27 : vector<1x128xf32>
    %29 = arith.subf %21, %28 : vector<1x128xf32>
    %30 = arith.mulf %17, %29 : vector<1x128xf32>
    %31 = vector.shape_cast %30 : vector<1x128xf32> to vector<1x1x128xf32>
    %cst_28 = arith.constant dense<0.000000e+00> : vector<1xf32>
    %32 = vector.multi_reduction <add>, %31, %cst_28 [1, 2] : vector<1x1x128xf32> to vector<1xf32>
    %33 = vector.shape_cast %32 : vector<1xf32> to vector<1x1x1xf32>
    %34 = vector.extract %33[0, 0, 0] : f32 from vector<1x1x1xf32>
    %35 = arith.subf %16, %13 : vector<1x128xf32>
    %cst_29 = arith.constant 0.000000e+00 : f32
    %36 = vector.broadcast %cst_29 : f32 to vector<1x128xf32>
    %37 = arith.minimumf %35, %36 : vector<1x128xf32>
    %38 = math.absf %35 : vector<1x128xf32>
    %cst_30 = arith.constant 0.000000e+00 : f32
    %39 = vector.broadcast %cst_30 : f32 to vector<1x128xf32>
    %40 = arith.subf %39, %38 : vector<1x128xf32>
    %41 = math.exp %40 : vector<1x128xf32>
    %cst_31 = arith.constant 1.000000e+00 : f32
    %42 = vector.broadcast %cst_31 : f32 to vector<1x128xf32>
    %43 = arith.addf %42, %41 : vector<1x128xf32>
    %44 = math.log %43 : vector<1x128xf32>
    %45 = arith.subf %37, %44 : vector<1x128xf32>
    %46 = arith.mulf %17, %45 : vector<1x128xf32>
    %47 = vector.shape_cast %46 : vector<1x128xf32> to vector<1x1x128xf32>
    %cst_32 = arith.constant dense<0.000000e+00> : vector<1xf32>
    %48 = vector.multi_reduction <add>, %47, %cst_32 [1, 2] : vector<1x1x128xf32> to vector<1xf32>
    %49 = vector.shape_cast %48 : vector<1xf32> to vector<1x1x1xf32>
    %50 = vector.extract %49[0, 0, 0] : f32 from vector<1x1x1xf32>
    %cst_33 = arith.constant 0.000000e+00 : f32
    %51 = vector.broadcast %cst_33 : f32 to vector<1x128xf32>
    %52 = arith.cmpf ogt, %13, %51 : vector<1x128xf32>
    %cst_34 = arith.constant 1.000000e+00 : f32
    %53 = vector.broadcast %cst_34 : f32 to vector<1x128xf32>
    %54 = arith.addf %13, %53 : vector<1x128xf32>
    %cst_35 = arith.constant 0.000000e+00 : f32
    %55 = vector.broadcast %cst_35 : f32 to vector<1x128xf32>
    %56 = arith.minimumf %13, %55 : vector<1x128xf32>
    %57 = math.exp %56 : vector<1x128xf32>
    %58 = arith.select %52, %54, %57 : vector<1x128xi1>, vector<1x128xf32>
    %c0_36 = arith.constant 0 : index
    %c0_37 = arith.constant 0 : index
    %59 = vector.load %arg7[%c0_36, %c0_37] : memref<1x128xf32, #tpu.memory_space<vmem>>, vector<1x128xf32>
    %60 = arith.mulf %58, %59 : vector<1x128xf32>
    %cst_38 = arith.constant 0.000000e+00 : f32
    %61 = vector.broadcast %cst_38 : f32 to vector<1x128xf32>
    %62 = arith.cmpf ogt, %16, %61 : vector<1x128xf32>
    %cst_39 = arith.constant 1.000000e+00 : f32
    %63 = vector.broadcast %cst_39 : f32 to vector<1x128xf32>
    %64 = arith.addf %16, %63 : vector<1x128xf32>
    %cst_40 = arith.constant 0.000000e+00 : f32
    %65 = vector.broadcast %cst_40 : f32 to vector<1x128xf32>
    %66 = arith.minimumf %16, %65 : vector<1x128xf32>
    %67 = math.exp %66 : vector<1x128xf32>
    %68 = arith.select %62, %64, %67 : vector<1x128xi1>, vector<1x128xf32>
    %c0_41 = arith.constant 0 : index
    %c0_42 = arith.constant 0 : index
    %69 = vector.load %arg8[%c0_41, %c0_42] : memref<1x128xf32, #tpu.memory_space<vmem>>, vector<1x128xf32>
    %70 = arith.mulf %68, %69 : vector<1x128xf32>
    %71 = arith.subf %60, %70 : vector<1x128xf32>
    %72 = arith.subf %18, %17 : vector<1x128xf32>
    %cst_43 = arith.constant 0.000000e+00 : f32
    %73 = vector.broadcast %cst_43 : f32 to vector<1x128xf32>
    %74 = arith.minimumf %71, %73 : vector<1x128xf32>
    %75 = math.absf %71 : vector<1x128xf32>
    %cst_44 = arith.constant 0.000000e+00 : f32
    %76 = vector.broadcast %cst_44 : f32 to vector<1x128xf32>
    %77 = arith.subf %76, %75 : vector<1x128xf32>
    %78 = math.exp %77 : vector<1x128xf32>
    %cst_45 = arith.constant 1.000000e+00 : f32
    %79 = vector.broadcast %cst_45 : f32 to vector<1x128xf32>
    %80 = arith.addf %79, %78 : vector<1x128xf32>
    %81 = math.log %80 : vector<1x128xf32>
    %82 = arith.subf %74, %81 : vector<1x128xf32>
    %83 = arith.mulf %72, %82 : vector<1x128xf32>
    %84 = vector.shape_cast %83 : vector<1x128xf32> to vector<1x1x128xf32>
    %cst_46 = arith.constant dense<0.000000e+00> : vector<1xf32>
    %85 = vector.multi_reduction <add>, %84, %cst_46 [1, 2] : vector<1x1x128xf32> to vector<1xf32>
    %86 = vector.shape_cast %85 : vector<1xf32> to vector<1x1x1xf32>
    %87 = vector.extract %86[0, 0, 0] : f32 from vector<1x1x1xf32>
    %88 = arith.addf %7, %13 : vector<1x128xf32>
    %89 = arith.addf %10, %16 : vector<1x128xf32>
    %90 = arith.subf %88, %89 : vector<1x128xf32>
    %cst_47 = arith.constant 0.000000e+00 : f32
    %91 = vector.broadcast %cst_47 : f32 to vector<1x128xf32>
    %92 = arith.minimumf %90, %91 : vector<1x128xf32>
    %93 = math.absf %90 : vector<1x128xf32>
    %cst_48 = arith.constant 0.000000e+00 : f32
    %94 = vector.broadcast %cst_48 : f32 to vector<1x128xf32>
    %95 = arith.subf %94, %93 : vector<1x128xf32>
    %96 = math.exp %95 : vector<1x128xf32>
    %cst_49 = arith.constant 1.000000e+00 : f32
    %97 = vector.broadcast %cst_49 : f32 to vector<1x128xf32>
    %98 = arith.addf %97, %96 : vector<1x128xf32>
    %99 = math.log %98 : vector<1x128xf32>
    %100 = arith.subf %92, %99 : vector<1x128xf32>
    %101 = arith.mulf %18, %100 : vector<1x128xf32>
    %102 = vector.shape_cast %101 : vector<1x128xf32> to vector<1x1x128xf32>
    %cst_50 = arith.constant dense<0.000000e+00> : vector<1xf32>
    %103 = vector.multi_reduction <add>, %102, %cst_50 [1, 2] : vector<1x1x128xf32> to vector<1xf32>
    %104 = vector.shape_cast %103 : vector<1xf32> to vector<1x1x1xf32>
    %105 = vector.extract %104[0, 0, 0] : f32 from vector<1x1x1xf32>
    %c0_51 = arith.constant 0 : index
    %106 = memref.load %arg12[%c0_51] : memref<4xf32, #tpu.memory_space<smem>>
    %107 = arith.addf %106, %34 : f32
    %c0_52 = arith.constant 0 : index
    %108 = memref.load %arg12[%c0_52] : memref<4xf32, #tpu.memory_space<smem>>
    memref.store %107, %arg12[%c0_52] : memref<4xf32, #tpu.memory_space<smem>>
    %c1 = arith.constant 1 : index
    %109 = memref.load %arg12[%c1] : memref<4xf32, #tpu.memory_space<smem>>
    %110 = arith.addf %109, %50 : f32
    %c1_53 = arith.constant 1 : index
    %111 = memref.load %arg12[%c1_53] : memref<4xf32, #tpu.memory_space<smem>>
    memref.store %110, %arg12[%c1_53] : memref<4xf32, #tpu.memory_space<smem>>
    %c2 = arith.constant 2 : index
    %112 = memref.load %arg12[%c2] : memref<4xf32, #tpu.memory_space<smem>>
    %113 = arith.addf %112, %87 : f32
    %c2_54 = arith.constant 2 : index
    %114 = memref.load %arg12[%c2_54] : memref<4xf32, #tpu.memory_space<smem>>
    memref.store %113, %arg12[%c2_54] : memref<4xf32, #tpu.memory_space<smem>>
    %c3 = arith.constant 3 : index
    %115 = memref.load %arg12[%c3] : memref<4xf32, #tpu.memory_space<smem>>
    %116 = arith.addf %115, %105 : f32
    %c3_55 = arith.constant 3 : index
    %117 = memref.load %arg12[%c3_55] : memref<4xf32, #tpu.memory_space<smem>>
    memref.store %116, %arg12[%c3_55] : memref<4xf32, #tpu.memory_space<smem>>
    %c0_i32_56 = arith.constant 0 : i32
    %118 = arith.cmpi eq, %arg0, %c0_i32_56 : i32
    %119 = arith.extui %118 : i1 to i32
    %c0_i32_57 = arith.constant 0 : i32
    %120 = arith.cmpi ne, %119, %c0_i32_57 : i32
    scf.if %120 {
      %c0_58 = arith.constant 0 : index
      %121 = memref.load %arg12[%c0_58] : memref<4xf32, #tpu.memory_space<smem>>
      %c0_59 = arith.constant 0 : index
      %122 = memref.load %arg11[%c0_59] : memref<4xf32, #tpu.memory_space<smem>>
      memref.store %121, %arg11[%c0_59] : memref<4xf32, #tpu.memory_space<smem>>
      %c1_60 = arith.constant 1 : index
      %123 = memref.load %arg12[%c1_60] : memref<4xf32, #tpu.memory_space<smem>>
      %c1_61 = arith.constant 1 : index
      %124 = memref.load %arg11[%c1_61] : memref<4xf32, #tpu.memory_space<smem>>
      memref.store %123, %arg11[%c1_61] : memref<4xf32, #tpu.memory_space<smem>>
      %c2_62 = arith.constant 2 : index
      %125 = memref.load %arg12[%c2_62] : memref<4xf32, #tpu.memory_space<smem>>
      %c2_63 = arith.constant 2 : index
      %126 = memref.load %arg11[%c2_63] : memref<4xf32, #tpu.memory_space<smem>>
      memref.store %125, %arg11[%c2_63] : memref<4xf32, #tpu.memory_space<smem>>
      %c3_64 = arith.constant 3 : index
      %127 = memref.load %arg12[%c3_64] : memref<4xf32, #tpu.memory_space<smem>>
      %c3_65 = arith.constant 3 : index
      %128 = memref.load %arg11[%c3_65] : memref<4xf32, #tpu.memory_space<smem>>
      memref.store %127, %arg11[%c3_65] : memref<4xf32, #tpu.memory_space<smem>>
    } else {
    }
    return
  }
  func.func @transform_0(%arg0: i32) -> (i32, i32, i32) {
    %c0_i32 = arith.constant 0 : i32
    %c0_i32_0 = arith.constant 0 : i32
    %c0_i32_1 = arith.constant 0 : i32
    return %arg0, %c0_i32, %c0_i32_0 : i32, i32, i32
  }
  func.func @transform_1(%arg0: i32) -> (i32, i32, i32) {
    %c0_i32 = arith.constant 0 : i32
    %c0_i32_0 = arith.constant 0 : i32
    %c0_i32_1 = arith.constant 0 : i32
    return %arg0, %c0_i32, %c0_i32_0 : i32, i32, i32
  }
  func.func @transform_2(%arg0: i32) -> (i32, i32, i32) {
    %c0_i32 = arith.constant 0 : i32
    %c0_i32_0 = arith.constant 0 : i32
    %c0_i32_1 = arith.constant 0 : i32
    return %arg0, %c0_i32, %c0_i32_0 : i32, i32, i32
  }
  func.func @transform_3(%arg0: i32) -> (i32, i32, i32) {
    %c0_i32 = arith.constant 0 : i32
    %c0_i32_0 = arith.constant 0 : i32
    %c0_i32_1 = arith.constant 0 : i32
    return %arg0, %c0_i32, %c0_i32_0 : i32, i32, i32
  }
  func.func @transform_4(%arg0: i32) -> (i32, i32, i32) {
    %c0_i32 = arith.constant 0 : i32
    %c0_i32_0 = arith.constant 0 : i32
    %c0_i32_1 = arith.constant 0 : i32
    return %arg0, %c0_i32, %c0_i32_0 : i32, i32, i32
  }
  func.func @transform_5(%arg0: i32) -> (i32, i32, i32) {
    %c0_i32 = arith.constant 0 : i32
    %c0_i32_0 = arith.constant 0 : i32
    %c0_i32_1 = arith.constant 0 : i32
    return %arg0, %c0_i32, %c0_i32_0 : i32, i32, i32
  }
  func.func @transform_6(%arg0: i32) -> (i32, i32) {
    %c0_i32 = arith.constant 0 : i32
    %c0_i32_0 = arith.constant 0 : i32
    return %arg0, %c0_i32 : i32, i32
  }
  func.func @transform_7(%arg0: i32) -> (i32, i32) {
    %c0_i32 = arith.constant 0 : i32
    %c0_i32_0 = arith.constant 0 : i32
    return %arg0, %c0_i32 : i32, i32
  }
  func.func @transform_8(%arg0: i32) -> (i32, i32) {
    %c0_i32 = arith.constant 0 : i32
    %c0_i32_0 = arith.constant 0 : i32
    return %arg0, %c0_i32 : i32, i32
  }
  func.func @transform_9(%arg0: i32) -> (i32, i32) {
    %c0_i32 = arith.constant 0 : i32
    %c0_i32_0 = arith.constant 0 : i32
    return %arg0, %c0_i32 : i32, i32
  }
  func.func @transform_10(%arg0: i32) -> i32 {
    %c0_i32 = arith.constant 0 : i32
    %c0_i32_0 = arith.constant 0 : i32
    return %c0_i32 : i32
  }
}

</mosaic_0001>

<bundles_post_ra>
// kernel: tpu_custom_call.1
= control target key start
LH: loop header
LB: loop body
LE: loop exit
PB: predicated region body
PF: predicated region fallthrough
CT: control target
= control target key end

     0   :  { %vm112_vm0 = vcmask 261120   ;;  %s11961_s0 = inlined_call_operand.vmem [shape: f32[1,128,32], index: 0, kind: input, shape index: {}]   ;;  %s11962_s1 = inlined_call_operand.vmem [shape: f32[1,128,32], index: 1, kind: input, shape index: {}]   ;;  %s11963_s2 = inlined_call_operand.vmem [shape: f32[1,128,32], index: 2, kind: input, shape index: {}]   ;;  %s11964_s3 = inlined_call_operand.vmem [shape: f32[1,128,32], index: 3, kind: input, shape index: {}]   ;;  %s11965_s4 = inlined_call_operand.vmem [shape: f32[1,128,32], index: 4, kind: input, shape index: {}]   ;;  %s11966_s5 = inlined_call_operand.vmem [shape: f32[1,128,32], index: 5, kind: input, shape index: {}]   ;;  %s11967_s6 = inlined_call_operand.vmem [shape: f32[1,128], index: 6, kind: input, shape index: {}]   ;;  %s11968_s7 = inlined_call_operand.vmem [shape: f32[1,128], index: 7, kind: input, shape index: {}]   ;;  %s11969_s8 = inlined_call_operand.vmem [shape: f32[1,128], index: 8, kind: input, shape index: {}]   ;;  %s11970_s9 = inlined_call_operand.vmem [shape: f32[1,128], index: 9, kind: input, shape index: {}]   ;;  %s11971_s10 = inlined_call_operand.hbm [shape: f32[4], index: 10, kind: output, shape index: {}]  }
   0x1   :  { %v8126_v0 = vld [vmem:[%s11961_s0 + $0x10] sm:$0xff]  ;;  %v8134_v2 = vld [vmem:[%s11961_s0] sm:$0xff]  ;;  %v8143_v5 = vld [vmem:[%s11961_s0 + $0x18] sm:$0xff] }
   0x2   :  { %v82_v1 = vld [vmem:[%s11963_s2 + $0x10] sm:$0xff]  ;;  %v80_v4 = vld [vmem:[%s11963_s2] sm:$0xff]  ;;  %v83_v6 = vld [vmem:[%s11963_s2 + $0x18] sm:$0xff] }
   0x3   :  { %v98_v3 = vmul.f32 %v82_v1, %v8126_v0  ;;  %v96_v7 = vmul.f32 %v80_v4, %v8134_v2  ;;  %v99_v8 = vmul.f32 %v83_v6, %v8143_v5  ;;  %v8153_v9 = vld [vmem:[%s11961_s0 + $0x8] sm:$0xff]  ;;  %v8171_v15 = vld [vmem:[%s11961_s0 + $0x20] sm:$0xff]  ;;  %v8184_v22 = vld [vmem:[%s11961_s0 + $0x38] sm:$0xff] }
   0x4   :  { %v81_v10 = vld [vmem:[%s11963_s2 + $0x8] sm:$0xff]  ;;  %v84_v16 = vld [vmem:[%s11963_s2 + $0x20] sm:$0xff]  ;;  %v87_v23 = vld [vmem:[%s11963_s2 + $0x38] sm:$0xff] }
   0x5   :  { %v8161_v11 = vld [vmem:[%s11961_s0 + $0x28] sm:$0xff]  ;;  %v119_v12 = vsel %vm112_vm0, %v98_v3, 0.0  ;;  %v97_v13 = vmul.f32 %v81_v10, %v8153_v9  ;;  %v113_v17 = vsel %vm112_vm0, %v96_v7, 0.0  ;;  %v122_v18 = vsel %vm112_vm0, %v99_v8, 0.0  ;;  %v8192_v24 = vld [vmem:[%s11961_s0 + $0x30] sm:$0xff]  ;;  %v8212_v32 = vld [vmem:[%s11961_s0 + $0x40] sm:$0xff] }
   0x6   :  { %v85_v14 = vld [vmem:[%s11963_s2 + $0x28] sm:$0xff]  ;;  %120 = vadd.xlane.f32.xlu1 %v119_v12  ;;  %114 = vadd.xlane.f32.xlu0 %v113_v17  ;;  %v100_v21 = vmul.f32 %v84_v16, %v8171_v15  ;;  %v86_v25 = vld [vmem:[%s11963_s2 + $0x30] sm:$0xff]  ;;  %v103_v27 = vmul.f32 %v87_v23, %v8184_v22  ;;  %v88_v33 = vld [vmem:[%s11963_s2 + $0x40] sm:$0xff] }
   0x7   :  { %v101_v19 = vmul.f32 %v85_v14, %v8161_v11  ;;  %v116_v20 = vsel %vm112_vm0, %v97_v13, 0.0  ;;  %v102_v29 = vmul.f32 %v86_v25, %v8192_v24  ;;  %v8204_v30 = vld [vmem:[%s11961_s0 + $0x48] sm:$0xff]  ;;  %v104_v37 = vmul.f32 %v88_v33, %v8212_v32  ;;  %v8224_v38 = vld [vmem:[%s11961_s0 + $0x58] sm:$0xff]  ;;  %v8232_v40 = vld [vmem:[%s11961_s0 + $0x50] sm:$0xff] }
   0x8   :  { %v125_v28 = vsel %vm112_vm0, %v100_v21, 0.0  ;;  %v89_v31 = vld [vmem:[%s11963_s2 + $0x48] sm:$0xff]  ;;  %v134_v34 = vsel %vm112_vm0, %v103_v27, 0.0  ;;  %v91_v39 = vld [vmem:[%s11963_s2 + $0x58] sm:$0xff]  ;;  %v90_v41 = vld [vmem:[%s11963_s2 + $0x50] sm:$0xff] }
   0x9   :  { %v128_v26 = vsel %vm112_vm0, %v101_v19, 0.0  ;;  %v105_v35 = vmul.f32 %v89_v31, %v8204_v30  ;;  %v131_v36 = vsel %vm112_vm0, %v102_v29, 0.0  ;;  %v107_v43 = vmul.f32 %v91_v39, %v8224_v38  ;;  %v8244_v46 = vld [vmem:[%s11961_s0 + $0x68] sm:$0xff]  ;;  %v8252_v48 = vld [vmem:[%s11961_s0 + $0x60] sm:$0xff]  ;;  %v8264_v54 = vld [vmem:[%s11961_s0 + $0x78] sm:$0xff] }
   0xa   :  { %123 = vadd.xlane.f32.xlu1 %v122_v18  ;;  %117 = vadd.xlane.f32.xlu0 %v116_v20  ;;  %v137_v44 = vsel %vm112_vm0, %v104_v37, 0.0  ;;  %v106_v45 = vmul.f32 %v90_v41, %v8232_v40  ;;  %v93_v47 = vld [vmem:[%s11963_s2 + $0x68] sm:$0xff]  ;;  %v92_v49 = vld [vmem:[%s11963_s2 + $0x60] sm:$0xff]  ;;  %v95_v55 = vld [vmem:[%s11963_s2 + $0x78] sm:$0xff] }
   0xb   :  { %v140_v42 = vsel %vm112_vm0, %v105_v35, 0.0  ;;  %v146_v50 = vsel %vm112_vm0, %v107_v43, 0.0  ;;  %v109_v51 = vmul.f32 %v93_v47, %v8244_v46  ;;  %v108_v53 = vmul.f32 %v92_v49, %v8252_v48  ;;  %v8272_v56 = vld [vmem:[%s11961_s0 + $0x70] sm:$0xff]  ;;  %v162_v62 = vld [vmem:[%s11965_s4 + $0x8] sm:$0xff]  ;;  %v161_v63 = vld [vmem:[%s11965_s4] sm:$0xff] }
   0xc   :  { %v143_v52 = vsel %vm112_vm0, %v106_v45, 0.0  ;;  %v94_v57 = vld [vmem:[%s11963_s2 + $0x70] sm:$0xff]  ;;  %v111_v59 = vmul.f32 %v95_v55, %v8264_v54  ;;  %v178_v3 = vmul.f32 %v162_v62, %v8153_v9  ;;  %v177_v6 = vmul.f32 %v161_v63, %v8134_v2  ;;  %v164_v7 = vld [vmem:[%s11965_s4 + $0x18] sm:$0xff] }
   0xd   :  { %v152_v58 = vsel %vm112_vm0, %v109_v51, 0.0  ;;  %v149_v60 = vsel %vm112_vm0, %v108_v53, 0.0  ;;  %v110_v61 = vmul.f32 %v94_v57, %v8272_v56  ;;  %v163_v8 = vld [vmem:[%s11965_s4 + $0x10] sm:$0xff] }
   0xe   :  { %129 = vadd.xlane.f32.xlu1 %v128_v26  ;;  %126 = vadd.xlane.f32.xlu0 %v125_v28  ;;  %v158_v1 = vsel %vm112_vm0, %v111_v59, 0.0 }
   0xf   :  { %v155_v4 = vsel %vm112_vm0, %v110_v61, 0.0 }
  0x12   :  { %135 = vadd.xlane.f32.xlu1 %v134_v34  ;;  %132 = vadd.xlane.f32.xlu0 %v131_v36 }
  0x16   :  { %141 = vadd.xlane.f32.xlu1 %v140_v42  ;;  %138 = vadd.xlane.f32.xlu0 %v137_v44 }
  0x1a   :  { %147 = vadd.xlane.f32.xlu1 %v146_v50  ;;  %144 = vadd.xlane.f32.xlu0 %v143_v52 }
  0x1e   :  { %153 = vadd.xlane.f32.xlu1 %v152_v58  ;;  %150 = vadd.xlane.f32.xlu0 %v149_v60 }
  0x22   :  { %159 = vadd.xlane.f32.xlu1 %v158_v1 }
  0x23   :  { %15 = vsyncpa [#allocation4], 0  ;;  %156 = vadd.xlane.f32.xlu0 %v155_v4  ;;  %v196_v10 = vsel %vm112_vm0, %v178_v3, 0.0  ;;  %v180_v12 = vmul.f32 %v164_v7, %v8143_v5  ;;  %v193_v9 = vsel %vm112_vm0, %v177_v6, 0.0  ;;  %v179_v13 = vmul.f32 %v163_v8, %v8126_v0  ;;  %v166_v2 = vld [vmem:[%s11965_s4 + $0x28] sm:$0xff]  ;;  %v165_v14 = vld [vmem:[%s11965_s4 + $0x20] sm:$0xff] }
  0x24   :  { %v182_v17 = vmul.f32 %v166_v2, %v8161_v11  ;;  %v181_v18 = vmul.f32 %v165_v14, %v8171_v15  ;;  %v168_v0 = vld [vmem:[%s11965_s4 + $0x38] sm:$0xff]  ;;  %v167_v19 = vld [vmem:[%s11965_s4 + $0x30] sm:$0xff]  ;;  %v170_v15 = vld [vmem:[%s11965_s4 + $0x48] sm:$0xff]  ;;  %vm1934_vm1 = vcmask 130112   ;;  %vm1941_vm2 = vcmask 195712   ;;  %s8053_s15 = scalar_lea.hbm %s11971_s10, 16 }
  0x25   :  { %v202_v16 = vsel %vm112_vm0, %v180_v12, 0.0  ;;  %v199_v5 = vsel %vm112_vm0, %v179_v13, 0.0  ;;  %v184_v21 = vmul.f32 %v168_v0, %v8184_v22  ;;  %v183_v23 = vmul.f32 %v167_v19, %v8192_v24  ;;  %v169_v25 = vld [vmem:[%s11965_s4 + $0x40] sm:$0xff]  ;;  %v172_v24 = vld [vmem:[%s11965_s4 + $0x58] sm:$0xff]  ;;  %v171_v29 = vld [vmem:[%s11965_s4 + $0x50] sm:$0xff]  ;;  %p8054_p0 = scmp.ne.s32.totalorder %s11971_s10, %s8053_s15  ;;  %p8057_p1 = scmp.lt.u32.totalorder %s8053_s15, %s11971_s10 }
  0x26   :  { %197 = vadd.xlane.f32.xlu1 %v196_v10  ;;  %v208_v20 = vsel %vm112_vm0, %v182_v17, 0.0  ;;  %v205_v11 = vsel %vm112_vm0, %v181_v18, 0.0  ;;  %v186_v27 = vmul.f32 %v170_v15, %v8204_v30  ;;  %v185_v28 = vmul.f32 %v169_v25, %v8212_v32  ;;  %v174_v32 = vld [vmem:[%s11965_s4 + $0x68] sm:$0xff]  ;;  %v173_v35 = vld [vmem:[%s11965_s4 + $0x60] sm:$0xff]  ;;  %v175_v41 = vld [vmem:[%s11965_s4 + $0x70] sm:$0xff] }
  0x27   :  { %194 = vadd.xlane.f32.xlu0 %v193_v9  ;;  %v214_v26 = vsel %vm112_vm0, %v184_v21, 0.0  ;;  %v211_v22 = vsel %vm112_vm0, %v183_v23, 0.0  ;;  %v188_v33 = vmul.f32 %v172_v24, %v8224_v38  ;;  %v187_v34 = vmul.f32 %v171_v29, %v8232_v40  ;;  %v176_v40 = vld [vmem:[%s11965_s4 + $0x78] sm:$0xff]  ;;  %v242_v47 = vld [vmem:[%s11964_s3 + $0x8] sm:$0xff]  ;;  %v241_v49 = vld [vmem:[%s11964_s3] sm:$0xff]  ;;  %p8059_p2 = pnand %p8057_p1, %p8054_p0 }
  0x28   :  { %v220_v31 = vsel %vm112_vm0, %v186_v27, 0.0  ;;  %v217_v30 = vsel %vm112_vm0, %v185_v28, 0.0  ;;  %v190_v37 = vmul.f32 %v174_v32, %v8244_v46  ;;  %v189_v39 = vmul.f32 %v173_v35, %v8252_v48  ;;  %v8364_v46 = vld [vmem:[%s11962_s1 + $0x8] sm:$0xff]  ;;  %v8372_v48 = vld [vmem:[%s11962_s1] sm:$0xff]  ;;  %v244_v55 = vld [vmem:[%s11964_s3 + $0x18] sm:$0xff] }
  0x29   :  { %v226_v36 = vsel %vm112_vm0, %v188_v33, 0.0  ;;  %v223_v38 = vsel %vm112_vm0, %v187_v34, 0.0  ;;  %v192_v43 = vmul.f32 %v176_v40, %v8264_v54  ;;  %v191_v45 = vmul.f32 %v175_v41, %v8272_v56  ;;  %v8384_v54 = vld [vmem:[%s11962_s1 + $0x18] sm:$0xff]  ;;  %v8392_v56 = vld [vmem:[%s11962_s1 + $0x10] sm:$0xff]  ;;  %v8404_v62 = vld [vmem:[%s11962_s1 + $0x28] sm:$0xff] }
  0x2a   :  { %203 = vadd.xlane.f32.xlu1 %v202_v16  ;;  %v232_v42 = vsel %vm112_vm0, %v190_v37, 0.0  ;;  %v229_v44 = vsel %vm112_vm0, %v189_v39, 0.0  ;;  %v258_v51 = vmul.f32 %v242_v47, %v8364_v46  ;;  %v257_v53 = vmul.f32 %v241_v49, %v8372_v48  ;;  %v243_v57 = vld [vmem:[%s11964_s3 + $0x10] sm:$0xff]  ;;  %v246_v63 = vld [vmem:[%s11964_s3 + $0x28] sm:$0xff]  ;;  %v8412_v1 = vld [vmem:[%s11962_s1 + $0x20] sm:$0xff] }
  0x2b   :  { %200 = vadd.xlane.f32.xlu0 %v199_v5  ;;  %v238_v50 = vsel %vm112_vm0, %v192_v43, 0.0  ;;  %v235_v52 = vsel %vm112_vm0, %v191_v45, 0.0  ;;  %v260_v59 = vmul.f32 %v244_v55, %v8384_v54  ;;  %v259_v61 = vmul.f32 %v243_v57, %v8392_v56  ;;  %v245_v3 = vld [vmem:[%s11964_s3 + $0x20] sm:$0xff]  ;;  %v8424_v10 = vld [vmem:[%s11962_s1 + $0x38] sm:$0xff]  ;;  %v8432_v9 = vld [vmem:[%s11962_s1 + $0x30] sm:$0xff] }
  0x2c   :  { %v276_v58 = vsel %vm112_vm0, %v258_v51, 0.0  ;;  %v273_v60 = vsel %vm112_vm0, %v257_v53, 0.0  ;;  %v262_v6 = vmul.f32 %v246_v63, %v8404_v62  ;;  %v261_v8 = vmul.f32 %v245_v3, %v8412_v1  ;;  %v248_v12 = vld [vmem:[%s11964_s3 + $0x38] sm:$0xff]  ;;  %v247_v13 = vld [vmem:[%s11964_s3 + $0x30] sm:$0xff]  ;;  %v8444_v5 = vld [vmem:[%s11962_s1 + $0x48] sm:$0xff] }
  0x2d   :  { %v282_v4 = vsel %vm112_vm0, %v260_v59, 0.0  ;;  %v279_v7 = vsel %vm112_vm0, %v259_v61, 0.0  ;;  %v264_v14 = vmul.f32 %v248_v12, %v8424_v10  ;;  %v263_v17 = vmul.f32 %v247_v13, %v8432_v9  ;;  %v250_v18 = vld [vmem:[%s11964_s3 + $0x48] sm:$0xff]  ;;  %v8452_v0 = vld [vmem:[%s11962_s1 + $0x40] sm:$0xff]  ;;  %v8464_v15 = vld [vmem:[%s11962_s1 + $0x58] sm:$0xff] }
  0x2e   :  { %209 = vadd.xlane.f32.xlu1 %v208_v20  ;;  %v288_v2 = vsel %vm112_vm0, %v262_v6, 0.0  ;;  %v285_v16 = vsel %vm112_vm0, %v261_v8, 0.0  ;;  %v249_v19 = vld [vmem:[%s11964_s3 + $0x40] sm:$0xff]  ;;  %v266_v21 = vmul.f32 %v250_v18, %v8444_v5  ;;  %v252_v25 = vld [vmem:[%s11964_s3 + $0x58] sm:$0xff]  ;;  %v251_v27 = vld [vmem:[%s11964_s3 + $0x50] sm:$0xff]  ;;  %v8065_v13 = vmov 0  }
  0x2f   :  { %206 = vadd.xlane.f32.xlu0 %v205_v11  ;;  %v294_v20 = vsel %vm112_vm0, %v264_v14, 0.0  ;;  %v291_v11 = vsel %vm112_vm0, %v263_v17, 0.0  ;;  %v265_v23 = vmul.f32 %v249_v19, %v8452_v0  ;;  %v268_v28 = vmul.f32 %v252_v25, %v8464_v15  ;;  %v254_v33 = vld [vmem:[%s11964_s3 + $0x68] sm:$0xff]  ;;  %v253_v34 = vld [vmem:[%s11964_s3 + $0x60] sm:$0xff]  ;;  %v256_v39 = vld [vmem:[%s11964_s3 + $0x78] sm:$0xff]  ;;  %7731 = vset.pattern.permute.xlu1 %v8065_v13 }
  0x30   :  { %v8512_v40 = vld [vmem:[%s11962_s1 + $0x70] sm:$0xff]  ;;  %v322_v47 = vld [vmem:[%s11966_s5 + $0x8] sm:$0xff]  ;;  %v321_v49 = vld [vmem:[%s11966_s5] sm:$0xff]  ;;  %7730 = vset.pattern.permute.xlu0 %v8065_v13  ;;  %vm1948_vm3 = vcmask 261312   ;;  %vm1955_vm4 = vcmask 326912   ;;  %vm1962_vm5 = vcmask 392512  }
  0x31   :  { %v297_v24 = vsel %vm112_vm0, %v265_v23, 0.0  ;;  %v306_v32 = vsel %vm112_vm0, %v268_v28, 0.0  ;;  %v255_v41 = vld [vmem:[%s11964_s3 + $0x70] sm:$0xff]  ;;  %v338_v51 = vmul.f32 %v322_v47, %v8364_v46  ;;  %v337_v53 = vmul.f32 %v321_v49, %v8372_v48  ;;  %v324_v55 = vld [vmem:[%s11966_s5 + $0x18] sm:$0xff]  ;;  %v326_v48 = vld [vmem:[%s11966_s5 + $0x28] sm:$0xff] }
  0x32   :  { %215 = vadd.xlane.f32.xlu1 %v214_v26  ;;  %v8472_v26 = vld [vmem:[%s11962_s1 + $0x50] sm:$0xff]  ;;  %v271_v45 = vmul.f32 %v255_v41, %v8512_v40  ;;  %v340_v59 = vmul.f32 %v324_v55, %v8384_v54  ;;  %v325_v61 = vld [vmem:[%s11966_s5 + $0x20] sm:$0xff]  ;;  %v342_v3 = vmul.f32 %v326_v48, %v8404_v62  ;;  %v332_v17 = vld [vmem:[%s11966_s5 + $0x58] sm:$0xff]  ;;  %vm12102_vm6 = vcmask 458112  }
  0x33   :  { %212 = vadd.xlane.f32.xlu0 %v211_v22  ;;  %v300_v22 = vsel %vm112_vm0, %v266_v21, 0.0  ;;  %v267_v29 = vmul.f32 %v251_v27, %v8472_v26  ;;  %v323_v57 = vld [vmem:[%s11966_s5 + $0x10] sm:$0xff]  ;;  %v353_v46 = vsel %vm112_vm0, %v337_v53, 0.0  ;;  %vm12101_vm8 = vcmask 523712  }
  0x34   :  { %v362_v63 = vsel %vm112_vm0, %v340_v59, 0.0  ;;  %v327_v6 = vld [vmem:[%s11966_s5 + $0x30] sm:$0xff]  ;;  %vm12100_vm9 = vcmask 589312   ;;  %vm12099_vm10 = vcmask 654912   ;;  %vm12098_vm11 = vcmask 720512  }
  0x35   :  { %v343_v12 = vmul.f32 %v327_v6, %v8432_v9  ;;  %v331_v18 = vld [vmem:[%s11966_s5 + $0x50] sm:$0xff]  ;;  %vm2004_vm12 = vcmask 786112  }
  0x36   :  { %221 = vadd.xlane.f32.xlu1 %v220_v31  ;;  %v8484_v31 = vld [vmem:[%s11962_s1 + $0x68] sm:$0xff]  ;;  %v347_v21 = vmul.f32 %v331_v18, %v8472_v26  ;;  %v336_v26 = vld [vmem:[%s11966_s5 + $0x78] sm:$0xff] }
  0x37   :  { %218 = vadd.xlane.f32.xlu0 %v217_v30  ;;  %v8492_v30 = vld [vmem:[%s11962_s1 + $0x60] sm:$0xff]  ;;  %v270_v35 = vmul.f32 %v254_v33, %v8484_v31 }
  0x38   :  { %v269_v37 = vmul.f32 %v253_v34, %v8492_v30 }
  0x3a   :  { %227 = vadd.xlane.f32.xlu1 %v226_v36  ;;  %v303_v36 = vsel %vm112_vm0, %v267_v29, 0.0 }
  0x3b   :  { %224 = vadd.xlane.f32.xlu0 %v223_v38  ;;  %v8504_v38 = vld [vmem:[%s11962_s1 + $0x78] sm:$0xff] }
  0x3c   :  { %v272_v43 = vmul.f32 %v256_v39, %v8504_v38 }
  0x3e   :  { %233 = vadd.xlane.f32.xlu1 %v232_v42  ;;  %v312_v42 = vsel %vm112_vm0, %v270_v35, 0.0  ;;  %v7679_v35 = vld [vmem:[%s11967_s6] ss:$0 sm:$0xff] }
  0x3f   :  { %230 = vadd.xlane.f32.xlu0 %v229_v44  ;;  %v309_v44 = vsel %vm112_vm0, %v269_v37, 0.0 }
  0x42   :  { %239 = vadd.xlane.f32.xlu1 %v238_v50  ;;  %v318_v50 = vsel %vm112_vm0, %v272_v43, 0.0 }
  0x43   :  { %236 = vadd.xlane.f32.xlu0 %v235_v52  ;;  %v315_v52 = vsel %vm112_vm0, %v271_v45, 0.0 }
  0x46   :  { %277 = vadd.xlane.f32.xlu1 %v276_v58  ;;  %v356_v58 = vsel %vm112_vm0, %v338_v51, 0.0 }
  0x47   :  { %274 = vadd.xlane.f32.xlu0 %v273_v60  ;;  %v339_v60 = vmul.f32 %v323_v57, %v8392_v56  ;;  %v328_v56 = vld [vmem:[%s11966_s5 + $0x38] sm:$0xff] }
  0x48   :  { %v344_v8 = vmul.f32 %v328_v56, %v8424_v10 }
  0x49   :  { %v359_v54 = vsel %vm112_vm0, %v339_v60, 0.0 }
  0x4a   :  { %283 = vadd.xlane.f32.xlu1 %v282_v4  ;;  %v341_v4 = vmul.f32 %v325_v61, %v8412_v1  ;;  %v330_v1 = vld [vmem:[%s11966_s5 + $0x48] sm:$0xff]  ;;  %v374_v14 = vsel %vm112_vm0, %v344_v8, 0.0 }
  0x4b   :  { %280 = vadd.xlane.f32.xlu0 %v279_v7  ;;  %v368_v7 = vsel %vm112_vm0, %v342_v3, 0.0  ;;  %v346_v10 = vmul.f32 %v330_v1, %v8444_v5 }
  0x4c   :  { %v365_v62 = vsel %vm112_vm0, %v341_v4, 0.0 }
  0x4d   :  { %v380_v19 = vsel %vm112_vm0, %v346_v10, 0.0 }
  0x4e   :  { %289 = vadd.xlane.f32.xlu1 %v288_v2  ;;  %v329_v2 = vld [vmem:[%s11966_s5 + $0x40] sm:$0xff] }
  0x4f   :  { %286 = vadd.xlane.f32.xlu0 %v285_v16  ;;  %v371_v16 = vsel %vm112_vm0, %v343_v12, 0.0  ;;  %v345_v9 = vmul.f32 %v329_v2, %v8452_v0  ;;  %v334_v0 = vld [vmem:[%s11966_s5 + $0x68] sm:$0xff] }
  0x50   :  { %v350_v25 = vmul.f32 %v334_v0, %v8484_v31 }
  0x51   :  { %v377_v5 = vsel %vm112_vm0, %v345_v9, 0.0 }
  0x52   :  { %295 = vadd.xlane.f32.xlu1 %v294_v20  ;;  %v348_v20 = vmul.f32 %v332_v17, %v8464_v15  ;;  %v383_v15 = vsel %vm112_vm0, %v347_v21, 0.0  ;;  %v392_v28 = vsel %vm112_vm0, %v350_v25, 0.0 }
  0x53   :  { %292 = vadd.xlane.f32.xlu0 %v291_v11  ;;  %v333_v11 = vld [vmem:[%s11966_s5 + $0x60] sm:$0xff] }
  0x54   :  { %v386_v23 = vsel %vm112_vm0, %v348_v20, 0.0  ;;  %v349_v27 = vmul.f32 %v333_v11, %v8492_v30 }
  0x56   :  { %301 = vadd.xlane.f32.xlu1 %v300_v22  ;;  %v335_v22 = vld [vmem:[%s11966_s5 + $0x70] sm:$0xff]  ;;  %v389_v29 = vsel %vm112_vm0, %v349_v27, 0.0 }
  0x57   :  { %298 = vadd.xlane.f32.xlu0 %v297_v24  ;;  %v352_v24 = vmul.f32 %v336_v26, %v8504_v38  ;;  %v351_v31 = vmul.f32 %v335_v22, %v8512_v40 }
  0x59   :  { %v398_v33 = vsel %vm112_vm0, %v352_v24, 0.0  ;;  %v395_v30 = vsel %vm112_vm0, %v351_v31, 0.0 }
  0x5a   :  { %307 = vadd.xlane.f32.xlu1 %v306_v32 }
  0x5b   :  { %304 = vadd.xlane.f32.xlu0 %v303_v36 }
  0x5e   :  { %313 = vadd.xlane.f32.xlu1 %v312_v42 }
  0x5f   :  { %310 = vadd.xlane.f32.xlu0 %v309_v44 }
  0x62   :  { %319 = vadd.xlane.f32.xlu1 %v318_v50 }
  0x63   :  { %316 = vadd.xlane.f32.xlu0 %v315_v52 }
  0x66   :  { %357 = vadd.xlane.f32.xlu1 %v356_v58 }
  0x67   :  { %354 = vadd.xlane.f32.xlu0 %v353_v46 }
  0x6a   :  { %363 = vadd.xlane.f32.xlu1 %v362_v63 }
  0x6b   :  { %360 = vadd.xlane.f32.xlu0 %v359_v54 }
  0x6e   :  { %369 = vadd.xlane.f32.xlu1 %v368_v7 }
  0x6f   :  { %366 = vadd.xlane.f32.xlu0 %v365_v62 }
  0x72   :  { %375 = vadd.xlane.f32.xlu1 %v374_v14 }
  0x73   :  { %372 = vadd.xlane.f32.xlu0 %v371_v16 }
  0x76   :  { %381 = vadd.xlane.f32.xlu1 %v380_v19 }
  0x77   :  { %378 = vadd.xlane.f32.xlu0 %v377_v5 }
  0x7a   :  { %387 = vadd.xlane.f32.xlu1 %v386_v23 }
  0x7b   :  { %384 = vadd.xlane.f32.xlu0 %v383_v15 }
  0x7e   :  { %393 = vadd.xlane.f32.xlu1 %v392_v28 }
  0x7f   :  { %390 = vadd.xlane.f32.xlu0 %v389_v29 }
  0x82   :  { %399 = vadd.xlane.f32.xlu1 %v398_v33 }
  0x83   :  { %396 = vadd.xlane.f32.xlu0 %v395_v30 }
  0x93   :  { %v8603_v34 = vpop.xlane.xlu1 %120  ;;  %v8605_v32 = vpop.xlane.xlu0 %114 }
  0x97   :  { %v8610_v36 = vpop.xlane.xlu1 %123  ;;  %v8612_v37 = vpop.xlane.xlu0 %117 }
  0x99   :  { %3789 = vbcast.lane.b32.xlu0 %v7679_v35, 256 }
  0x9b   :  { %v8614_v38 = vpop.xlane.xlu1 %129  ;;  %v8616_v39 = vpop.xlane.xlu0 %126 }
  0x9f   :  { %v8618_v40 = vpop.xlane.xlu1 %135  ;;  %v8620_v41 = vpop.xlane.xlu0 %132 }
  0xa3   :  { %v8622_v42 = vpop.xlane.xlu1 %141  ;;  %v8624_v43 = vpop.xlane.xlu0 %138 }
  0xa7   :  { %v8626_v44 = vpop.xlane.xlu1 %147  ;;  %v8628_v45 = vpop.xlane.xlu0 %144 }
  0xa8   :  { %12156 = vst [vmem:[#allocation6_spill] sm:$0xff] %v8626_v44  ;;  %12157 = vst [vmem:[#allocation7_spill] sm:$0xff] %v8628_v45 }
  0xab   :  { %v8630_v47 = vpop.xlane.xlu1 %153  ;;  %v8632_v49 = vpop.xlane.xlu0 %150 }
  0xac   :  { %12158 = vst [vmem:[#allocation8_spill] sm:$0xff] %v8630_v47  ;;  %12159 = vst [vmem:[#allocation9_spill] sm:$0xff] %v8632_v49 }
  0xaf   :  { %v8634_v50 = vpop.xlane.xlu1 %159 }
  0xb0   :  { %12160 = vst [vmem:[#allocation10_spill] sm:$0xff] %v8634_v50  ;;  %v8636_v51 = vpop.xlane.xlu0 %156 }
  0xb1   :  { %12161 = vst [vmem:[#allocation11_spill] sm:$0xff] %v8636_v51 }
  0xb3   :  { %v8638_v52 = vpop.xlane.xlu1 %197 }
  0xb4   :  { %v8642_v53 = vsub.f32 %v8612_v37, %v8638_v52  ;;  %v8644_v55 = vpop.xlane.xlu0 %194 }
  0xb5   :  { %12162 = vst [vmem:[#allocation12_spill] sm:$0xff] %v8644_v55  ;;  %v8648_v57 = vsub.f32 %v8605_v32, %v8644_v55 }
  0xb6   :  { %v436_v58 = vand.u32 2147483647, %v8642_v53 }
  0xb7   :  { %v435_v59 = vand.u32 2147483647, %v8648_v57  ;;  %v8652_v46 = vpop.xlane.xlu1 %203 }
  0xb8   :  { %12163 = vst [vmem:[#allocation13_spill] sm:$0xff] %v8652_v46  ;;  %v452_v60 = vsub.f32 0.0, %v436_v58  ;;  %v8656_v48 = vsub.f32 %v8610_v36, %v8652_v46  ;;  %v8658_v61 = vpop.xlane.xlu0 %200 }
  0xb9   :  { %12164 = vst [vmem:[#allocation14_spill] sm:$0xff] %v8658_v61  ;;  %v451_v63 = vsub.f32 0.0, %v435_v59  ;;  %v8662_v3 = vsub.f32 %v8603_v34, %v8658_v61 }
  0xba   :  { %v438_v54 = vand.u32 2147483647, %v8656_v48  ;;  %v469_v6 = vmul.f32 1.442695, %v452_v60 }
  0xbb   :  { %v437_v4 = vand.u32 2147483647, %v8662_v3  ;;  %v8666_v56 = vpop.xlane.xlu1 %209  ;;  %v467_v12 = vmul.f32 1.442695, %v451_v63 }
  0xbc   :  { %12165 = vst [vmem:[#allocation15_spill] sm:$0xff] %v8666_v56  ;;  %v454_v7 = vsub.f32 0.0, %v438_v54  ;;  %v8670_v8 = vsub.f32 %v8614_v38, %v8666_v56  ;;  %v8672_v62 = vpop.xlane.xlu0 %206  ;;  %7732 = vpow2.f32 %v469_v6 }
  0xbd   :  { %12166 = vst [vmem:[#allocation16_spill] sm:$0xff] %v8672_v62  ;;  %v453_v1 = vsub.f32 0.0, %v437_v4  ;;  %v8676_v13 = vsub.f32 %v8616_v39, %v8672_v62  ;;  %7734 = vpow2.f32 %v467_v12 }
  0xbe   :  { %v440_v2 = vand.u32 2147483647, %v8670_v8  ;;  %v473_v16 = vmul.f32 1.442695, %v454_v7  ;;  %v424_v62 = vmin.f32 %v8670_v8, 0.0 }
  0xbf   :  { %v439_v14 = vand.u32 2147483647, %v8676_v13  ;;  %v8680_v10 = vpop.xlane.xlu1 %215  ;;  %v471_v19 = vmul.f32 1.442695, %v453_v1 }
  0xc0   :  { %12167 = vst [vmem:[#allocation17_spill] sm:$0xff] %v8680_v10  ;;  %v456_v9 = vsub.f32 0.0, %v440_v2  ;;  %v8684_v17 = vsub.f32 %v8618_v40, %v8680_v10  ;;  %v8686_v18 = vpop.xlane.xlu0 %212  ;;  %7736 = vpow2.f32 %v473_v16 }
  0xc1   :  { %12168 = vst [vmem:[#allocation18_spill] sm:$0xff] %v8686_v18  ;;  %v455_v20 = vsub.f32 0.0, %v439_v14  ;;  %v8690_v5 = vsub.f32 %v8620_v41, %v8686_v18  ;;  %7738 = vpow2.f32 %v471_v19 }
  0xc2   :  { %v477_v0 = vmul.f32 1.442695, %v456_v9  ;;  %v442_v11 = vand.u32 2147483647, %v8684_v17 }
  0xc3   :  { %v8692_v21 = vpop.xlane.xlu1 %221  ;;  %v475_v15 = vmul.f32 1.442695, %v455_v20  ;;  %v441_v27 = vand.u32 2147483647, %v8690_v5  ;;  %v11972_v20 = vlaneseq }
  0xc4   :  { %12169 = vst [vmem:[#allocation19_spill] sm:$0xff] %v8692_v21  ;;  %v8697_v23 = vsub.f32 %v8622_v42, %v8692_v21  ;;  %v8699_v25 = vpop.xlane.xlu0 %218  ;;  %7740 = vpow2.f32 %v477_v0  ;;  %v458_v28 = vsub.f32 0.0, %v442_v11 }
  0xc5   :  { %12170 = vst [vmem:[#allocation20_spill] sm:$0xff] %v8699_v25  ;;  %v8704_v26 = vsub.f32 %v8624_v43, %v8699_v25  ;;  %7742 = vpow2.f32 %v475_v15  ;;  %v457_v35 = vsub.f32 0.0, %v441_v27 }
  0xc6   :  { %v444_v24 = vand.u32 2147483647, %v8697_v23  ;;  %v7733_v33 = vpop.eup %7732  ;;  %v481_v59 = vmul.f32 1.442695, %v458_v28 }
  0xc7   :  { %v8706_v22 = vpop.xlane.xlu1 %227  ;;  %v7735_v30 = vpop.eup %7734  ;;  %v443_v58 = vand.u32 2147483647, %v8704_v26  ;;  %v500_v54 = vadd.f32 1.0, %v7733_v33  ;;  %v479_v14 = vmul.f32 1.442695, %v457_v35 }
  0xc8   :  { %12171 = vst [vmem:[#allocation21_spill] sm:$0xff] %v8706_v22  ;;  %v8711_v29 = vsub.f32 %v8626_v44, %v8706_v22  ;;  %v8713_v31 = vpop.xlane.xlu0 %224  ;;  %v460_v60 = vsub.f32 0.0, %v444_v24  ;;  %v499_v12 = vadd.f32 1.0, %v7735_v30  ;;  %7744 = vpow2.f32 %v481_v59 }
  0xc9   :  { %12172 = vst [vmem:[#allocation22_spill] sm:$0xff] %v8713_v31  ;;  %v8719_v4 = vsub.f32 %v8628_v45, %v8713_v31  ;;  %v459_v16 = vsub.f32 0.0, %v443_v58  ;;  %7746 = vlog2.f32 %v500_v54  ;;  %v420_v31 = vmin.f32 %v8642_v53, 0.0 }
  0xca   :  { %v446_v63 = vand.u32 2147483647, %v8711_v29  ;;  %v7737_v7 = vpop.eup %7736  ;;  %v485_v9 = vmul.f32 1.442695, %v460_v60  ;;  %7748 = vlog2.f32 %v499_v12  ;;  %v8739_v60 = vshrl.u32 %v11972_v20, 7 }
  0xcb   :  { %v8721_v6 = vpop.xlane.xlu1 %233  ;;  %v7739_v2 = vpop.eup %7738  ;;  %v502_v0 = vadd.f32 1.0, %v7737_v7  ;;  %v445_v11 = vand.u32 2147483647, %v8719_v4  ;;  %7750 = vpow2.f32 %v479_v14  ;;  %v483_v24 = vmul.f32 1.442695, %v459_v16 }
  0xcc   :  { %12173 = vst [vmem:[#allocation23_spill] sm:$0xff] %v8721_v6  ;;  %v8723_v1 = vpop.xlane.xlu0 %230  ;;  %v462_v19 = vsub.f32 0.0, %v446_v63  ;;  %v501_v27 = vadd.f32 1.0, %v7739_v2  ;;  %v8728_v28 = vsub.f32 %v8630_v47, %v8721_v6  ;;  %7752 = vpow2.f32 %v485_v9  ;;  %12178 = vst [vmem:[#allocation28_spill] sm:$0xff] %v8739_v60 }
  0xcd   :  { %12174 = vst [vmem:[#allocation24_spill] sm:$0xff] %v8723_v1  ;;  %v8732_v33 = vsub.f32 %v8632_v49, %v8723_v1  ;;  %v8066_v63 = vmov 1966171168   ;;  %7754 = vlog2.f32 %v502_v0  ;;  %v461_v12 = vsub.f32 0.0, %v445_v11 }
  0xce   :  { %v7741_v15 = vpop.eup %7740  ;;  %v489_v58 = vmul.f32 1.442695, %v462_v19  ;;  %v1096_v54 = vunpack.c.l.s4 %v8066_v63  ;;  %7756 = vlog2.f32 %v501_v27  ;;  %v448_v2 = vand.u32 2147483647, %v8728_v28 }
  0xcf   :  { %12175 = vst [vmem:[#allocation25_spill] sm:$0xff] %v8732_v33  ;;  %v8734_v30 = vpop.xlane.xlu1 %239  ;;  %v7743_v35 = vpop.eup %7742  ;;  %v504_v7 = vadd.f32 1.0, %v7741_v15  ;;  %7758 = vpow2.f32 %v483_v24  ;;  %v447_v9 = vand.u32 2147483647, %v8732_v33  ;;  %v8752_v0 = vsub.s32 0, %v8739_v60 }
  0xd0   :  { %12176 = vst [vmem:[#allocation26_spill] sm:$0xff] %v8734_v30  ;;  %v8736_v59 = vpop.xlane.xlu0 %236  ;;  %v8744_v14 = vsub.f32 %v8634_v50, %v8734_v30  ;;  %v503_v16 = vadd.f32 1.0, %v7743_v35  ;;  %7760 = vpow2.f32 %v489_v58  ;;  %v8755_v11 = vsub.s32 1, %v8739_v60 }
  0xd1   :  { %12177 = vst [vmem:[#allocation27_spill] sm:$0xff] %v8736_v59  ;;  %v8749_v19 = vsub.f32 %v8636_v51, %v8736_v59  ;;  %12181 = vst [vmem:[#allocation31_spill] sm:$0xff] %v8752_v0  ;;  %v1097_v15 = vunpack.c.0.s8 %v1096_v54  ;;  %7762 = vlog2.f32 %v504_v7  ;;  %v487_v27 = vmul.f32 1.442695, %v461_v12 }
  0xd2   :  { %12179 = vst [vmem:[#allocation29_spill] sm:$0xff] %v8744_v14  ;;  %12182 = vst [vmem:[#allocation32_spill] sm:$0xff] %v8755_v11  ;;  %v8758_v63 = vsub.s32 2, %v8739_v60  ;;  %v8761_v24 = vsub.s32 3, %v8739_v60  ;;  %v7745_v35 = vpop.eup %7744  ;;  %v464_v20 = vsub.f32 0.0, %v448_v2  ;;  %v8765_v58 = vsub.s32 4, %v8739_v60 }
  0xd3   :  { %12180 = vst [vmem:[#allocation30_spill] sm:$0xff] %v8749_v19  ;;  %v450_v59 = vand.u32 2147483647, %v8744_v14  ;;  %v8768_v30 = vsub.s32 5, %v8739_v60  ;;  %v7747_v1 = vpop.eup %7746  ;;  %7764 = vlog2.f32 %v503_v16  ;;  %v463_v54 = vsub.f32 0.0, %v447_v9  ;;  %v8791_v8 = vpop.xlane.xlu1 %277 }
  0xd4   :  { %12183 = vst [vmem:[#allocation33_spill] sm:$0xff] %v8758_v63  ;;  %12184 = vst [vmem:[#allocation34_spill] sm:$0xff] %v8761_v24  ;;  %v449_v7 = vand.u32 2147483647, %v8749_v19  ;;  %v8772_v12 = vsub.s32 6, %v8739_v60  ;;  %v7749_v6 = vpop.eup %7748  ;;  %v419_v2 = vmin.f32 %v8648_v57, 0.0  ;;  %v8780_v25 = vsub.s32 %v1097_v15, %v8739_v60 }
  0xd5   :  { %12185 = vst [vmem:[#allocation35_spill] sm:$0xff] %v8765_v58  ;;  %12186 = vst [vmem:[#allocation36_spill] sm:$0xff] %v8768_v30  ;;  %v8777_v22 = vsub.s32 7, %v8739_v60  ;;  %v7751_v21 = vpop.eup %7750  ;;  %v422_v16 = vmin.f32 %v8656_v48, 0.0  ;;  %v421_v9 = vmin.f32 %v8662_v3, 0.0  ;;  %v506_v18 = vadd.f32 1.0, %v7745_v35  ;;  %v8796_v3 = vpop.xlane.xlu0 %274 }
  0xd6   :  { %12187 = vst [vmem:[#allocation37_spill] sm:$0xff] %v8772_v12  ;;  %7766 = vpow2.f32 %v487_v27  ;;  %v7753_v10 = vpop.eup %7752  ;;  %v493_v56 = vmul.f32 1.442695, %v464_v20  ;;  %v466_v57 = vsub.f32 0.0, %v450_v59  ;;  %v491_v60 = vmul.f32 1.442695, %v463_v54 }
  0xd7   :  { %12188 = vst [vmem:[#allocation38_spill] sm:$0xff] %v8777_v22  ;;  %v7755_v51 = vpop.eup %7754  ;;  %v465_v46 = vsub.f32 0.0, %v449_v7  ;;  %v505_v48 = vadd.f32 1.0, %v7751_v21  ;;  %12189 = vst [vmem:[#allocation39_spill] sm:$0xff] %v8791_v8  ;;  %7768 = vlog2.f32 %v506_v18  ;;  %v508_v20 = vadd.f32 1.0, %v7753_v10 }
  0xd8   :  { %v7757_v50 = vpop.eup %7756  ;;  %v518_v54 = vmul.f32 0.6931472, %v7747_v1  ;;  %7770 = vpow2.f32 %v493_v56  ;;  %v497_v7 = vmul.f32 1.442695, %v466_v57  ;;  %12190 = vst [vmem:[#allocation40_spill] sm:$0xff] %v8796_v3  ;;  %v3719_v47 = vmin.f32 %v8791_v8, 0.0 }
  0xd9   :  { %v7759_v53 = vpop.eup %7758  ;;  %v516_v49 = vmul.f32 0.6931472, %v7749_v6  ;;  %7772 = vpow2.f32 %v491_v60  ;;  %v495_v35 = vmul.f32 1.442695, %v465_v46  ;;  %v522_v18 = vmul.f32 0.6931472, %v7755_v51  ;;  %v8802_v60 = vpop.xlane.xlu1 %283 }
  0xda   :  { %v7761_v15 = vpop.eup %7760  ;;  %7774 = vlog2.f32 %v505_v48  ;;  %v507_v10 = vadd.f32 1.0, %v7759_v53  ;;  %v520_v45 = vmul.f32 0.6931472, %v7757_v50  ;;  %v3718_v1 = vmin.f32 %v8796_v3, 0.0  ;;  %12191 = vst [vmem:[#allocation41_spill] sm:$0xff] %v8802_v60 }
  0xdb   :  { %v7763_v27 = vpop.eup %7762  ;;  %7776 = vlog2.f32 %v508_v20  ;;  %v510_v56 = vadd.f32 1.0, %v7761_v15  ;;  %v548_v57 = vsub.f32 %v420_v31, %v518_v54  ;;  %v8804_v44 = vsub.f32 %v419_v2, %v516_v49 }
  0xdc   :  { %v526_v21 = vmul.f32 0.6931472, %v7763_v27  ;;  %7778 = vpow2.f32 %v497_v7  ;;  %v3736_v51 = vmul.f32 1.442695, %v3719_v47  ;;  %v3721_v53 = vmin.f32 %v8802_v60, 0.0 }
  0xdd   :  { %v7765_v61 = vpop.eup %7764  ;;  %7780 = vpow2.f32 %v495_v35  ;;  %v8807_v48 = vsub.f32 %v422_v16, %v522_v18  ;;  %v8811_v31 = vadd.f32 %v8791_v8, %v8612_v37  ;;  %v8813_v15 = vsub.f32 %v421_v9, %v520_v45 }
  0xde   :  { %v524_v50 = vmul.f32 0.6931472, %v7765_v61  ;;  %7782 = vlog2.f32 %v507_v10  ;;  %v3734_v27 = vmul.f32 1.442695, %v3718_v1  ;;  %v8817_v49 = vadd.f32 %v8796_v3, %v8605_v32  ;;  %v8825_v61 = vpop.xlane.xlu0 %280 }
  0xdf   :  { %7784 = vlog2.f32 %v510_v56  ;;  %v8819_v2 = vsub.f32 %v424_v62, %v526_v21  ;;  %v8823_v16 = vadd.f32 %v8802_v60, %v8610_v36  ;;  %12195 = vst [vmem:[#allocation45_spill] sm:$0xff] %v8825_v61  ;;  %v614_v37 = vrot.slane %v548_v57, %v8752_v0  ;;  %v8834_v21 = vpop.xlane.xlu1 %289 }
  0xe0   :  { %v7767_v46 = vpop.eup %7766  ;;  %12192 = vst [vmem:[#allocation42_spill] sm:$0xff] %v8817_v49  ;;  %7786 = vpow2.f32 %v3736_v51  ;;  %v3740_v45 = vmul.f32 1.442695, %v3721_v53  ;;  %v618_v9 = vrot.slane %v548_v57, %v8755_v11  ;;  %v622_v20 = vrot.slane %v548_v57, %v8758_v63  ;;  %12197 = vst [vmem:[#allocation46_spill] sm:$0xff] %v8834_v21 }
  0xe1   :  { %12193 = vst [vmem:[#allocation43_spill] sm:$0xff] %v8819_v2  ;;  %v509_v47 = vadd.f32 1.0, %v7767_v46  ;;  %12194 = vst [vmem:[#allocation44_spill] sm:$0xff] %v8823_v16  ;;  %v7769_v35 = vpop.eup %7768  ;;  %v12196_v62 = vmin.f32 %v8676_v13, 0.0  ;;  %v626_v36 = vrot.slane %v548_v57, %v8761_v24  ;;  %v630_v7 = vrot.slane %v548_v57, %v8765_v58 }
  0xe2   :  { %v7771_v32 = vpop.eup %7770  ;;  %v634_v18 = vrot.slane %v548_v57, %v8768_v30  ;;  %7788 = vpow2.f32 %v3734_v27  ;;  %v3720_v56 = vmin.f32 %v8825_v61, 0.0  ;;  %v638_v1 = vrot.slane %v548_v57, %v8772_v12 }
  0xe3   :  { %v8832_v54 = vsub.f32 %v12196_v62, %v524_v50  ;;  %v7773_v10 = vpop.eup %7772  ;;  %v642_v46 = vrot.slane %v548_v57, %v8777_v22  ;;  %v8844_v13 = vadd.f32 %v8825_v61, %v8603_v34  ;;  %v1140_v53 = vcombine.low %v614_v37, %v618_v9 }
  0xe4   :  { %v7775_v51 = vpop.eup %7774  ;;  %v1141_v50 = vcombine.low %v622_v20, %v626_v36  ;;  %v1142_v62 = vcombine.low %v630_v7, %v634_v18  ;;  %v530_v59 = vmul.f32 0.6931472, %v7769_v35  ;;  %7790 = vlog2.f32 %v509_v47  ;;  %v8860_v47 = vpop.xlane.xlu0 %286 }
  0xe5   :  { %12198 = vst [vmem:[#allocation47_spill] sm:$0xff] %v8844_v13  ;;  %v8846_v6 = vpop.eup %7776  ;;  %v1143_v16 = vcombine.low %v638_v1, %v642_v46  ;;  %v582_v27 = vrot.slane %v8804_v44, %v8752_v0  ;;  %v1150_v57 = vrot.slane %v1140_v53, %v8780_v25  ;;  %v586_v37 = vrot.slane %v8804_v44, %v8755_v11  ;;  %v8873_v46 = vpop.xlane.xlu1 %295 }
  0xe6   :  { %v8850_v60 = vpop.eup %7778  ;;  %v1157_v19 = vrot.slane %v1141_v50, %v8780_v25  ;;  %v1164_v34 = vrot.slane %v1142_v62, %v8780_v25  ;;  %v3723_v35 = vmin.f32 %v8834_v21, 0.0  ;;  %12199 = vst [vmem:[#allocation48_spill] sm:$0xff] %v8860_v47  ;;  %v590_v36 = vrot.slane %v8804_v44, %v8758_v63  ;;  %12201 = vst [vmem:[#allocation50_spill] sm:$0xff] %v8873_v46 }
  0xe7   :  { %v8857_v9 = vpop.eup %7780  ;;  %v1171_v20 = vrot.slane %v1143_v16, %v8780_v25  ;;  %v594_v7 = vrot.slane %v8804_v44, %v8761_v24  ;;  %v8871_v1 = vadd.f32 %v8834_v21, %v8614_v38  ;;  %v598_v50 = vrot.slane %v8804_v44, %v8765_v58 }
  0xe8   :  { %v8867_v18 = vpop.eup %7782  ;;  %v1172_v53 = vcombine.low %v1150_v57, %v1157_v19  ;;  %v602_v16 = vrot.slane %v8804_v44, %v8768_v30  ;;  %v512_v13 = vadd.f32 1.0, %v7771_v32  ;;  %v606_v14 = vrot.slane %v8804_v44, %v8772_v12 }
  0xe9   :  { %12200 = vst [vmem:[#allocation49_spill] sm:$0xff] %v8871_v1  ;;  %v8879_v62 = vpop.eup %7784  ;;  %v1173_v61 = vcombine.low %v1164_v34, %v1171_v20  ;;  %v610_v38 = vrot.slane %v8804_v44, %v8777_v22  ;;  %7792 = vpow2.f32 %v3740_v45  ;;  %v1091_v19 = vcombine.low %v582_v27, %v586_v37  ;;  %v8898_v37 = vpop.xlane.xlu0 %292 }
  0xea   :  { %v1180_v1 = vrot.slane %v1172_v53, %v8780_v25  ;;  %v1092_v57 = vcombine.low %v590_v36, %v594_v7  ;;  %v8886_v21 = vpop.eup %7786  ;;  %v3738_v33 = vmul.f32 1.442695, %v3720_v56  ;;  %v1093_v55 = vcombine.low %v598_v50, %v602_v16  ;;  %12205 = vst [vmem:[#allocation53_spill] sm:$0xff] %v8898_v37 }
  0xeb   :  { %12202 = vst [vmem:[#allocation51_spill] sm:$0xff] %v8886_v21  ;;  %v1187_v49 = vrot.slane %v1173_v61, %v8780_v25  ;;  %v1094_v2 = vcombine.low %v606_v14, %v610_v38  ;;  %v12203_v32 = vmin.f32 %v8684_v17, 0.0  ;;  %v3722_v20 = vmin.f32 %v8860_v47, 0.0 }
  0xec   :  { %v1101_v44 = vrot.slane %v1091_v19, %v8780_v25  ;;  %v1108_v45 = vrot.slane %v1092_v57, %v8780_v25  ;;  %v8896_v53 = vpop.eup %7788  ;;  %v511_v27 = vadd.f32 1.0, %v7773_v10  ;;  %v1115_v61 = vrot.slane %v1093_v55, %v8780_v25 }
  0xed   :  { %v8891_v34 = vsub.f32 %v12203_v32, %v530_v59  ;;  %12204 = vst [vmem:[#allocation52_spill] sm:$0xff] %v8896_v53  ;;  %v1188_v56 = vcombine.low %v1180_v1, %v1187_v49  ;;  %v1122_v14 = vrot.slane %v1094_v2, %v8780_v25  ;;  %v3744_v36 = vmul.f32 1.442695, %v3723_v35  ;;  %v8906_v59 = vpop.xlane.xlu1 %301 }
  0xee   :  { %v8904_v17 = vadd.f32 %v8860_v47, %v8616_v39  ;;  %12207 = vst [vmem:[#allocation55_spill] sm:$0xff] %v8906_v59  ;;  %v1123_v7 = vcombine.low %v1101_v44, %v1108_v45  ;;  %v646_v50 = vrot.slane %v8813_v15, %v8752_v0  ;;  %v8910_v16 = vpop.eup %7790  ;;  %v528_v10 = vmul.f32 0.6931472, %v7775_v51 }
  0xef   :  { %1879 = vperm.xlu1 %7731, %v1188_v56   ;;  %v1124_v49 = vcombine.low %v1115_v61, %v1122_v14  ;;  %v650_v55 = vrot.slane %v8813_v15, %v8755_v11  ;;  %v654_v2 = vrot.slane %v8813_v15, %v8758_v63  ;;  %7794 = vlog2.f32 %v512_v13 }
  0xf0   :  { %12206 = vst [vmem:[#allocation54_spill] sm:$0xff] %v8904_v17  ;;  %v1131_v39 = vrot.slane %v1123_v7, %v8780_v25  ;;  %v658_v35 = vrot.slane %v8813_v15, %v8761_v24  ;;  %v662_v1 = vrot.slane %v8813_v15, %v8765_v58  ;;  %v8921_v38 = vmul.f32 1.442695, %v3722_v20  ;;  %v8932_v20 = vpop.xlane.xlu0 %298 }
  0xf1   :  { %v1138_v51 = vrot.slane %v1124_v49, %v8780_v25  ;;  %v666_v19 = vrot.slane %v8813_v15, %v8768_v30  ;;  %v670_v57 = vrot.slane %v8813_v15, %v8772_v12  ;;  %v3725_v13 = vmin.f32 %v8873_v46, 0.0  ;;  %12208 = vst [vmem:[#allocation56_spill] sm:$0xff] %v8932_v20  ;;  %v8940_v21 = vpop.xlane.xlu1 %307 }
  0xf2   :  { %v674_v32 = vrot.slane %v8813_v15, %v8777_v22  ;;  %v1189_v44 = vcombine.low %v646_v50, %v650_v55  ;;  %v1190_v45 = vcombine.low %v654_v2, %v658_v35  ;;  %v534_v56 = vmul.f32 0.6931472, %v8846_v6  ;;  %12211 = vst [vmem:[#allocation59_spill] sm:$0xff] %v8940_v21 }
  0xf3   :  { %7796 = vlog2.f32 %v511_v27  ;;  %v1139_v61 = vcombine.low %v1131_v39, %v1138_v51  ;;  %v1191_v14 = vcombine.low %v662_v1, %v666_v19  ;;  %v8934_v7 = vpop.eup %7792  ;;  %v8938_v49 = vadd.f32 %v8873_v46, %v8618_v40 }
  0xf4   :  { %12209 = vst [vmem:[#allocation57_spill] sm:$0xff] %v8934_v7  ;;  %v1192_v53 = vcombine.low %v670_v57, %v674_v32  ;;  %v1199_v15 = vrot.slane %v1189_v44, %v8780_v25  ;;  %v1206_v50 = vrot.slane %v1190_v45, %v8780_v25  ;;  %v12212_v6 = vmin.f32 %v8690_v5, 0.0  ;;  %v8968_v44 = vpop.xlane.xlu0 %304 }
  0xf5   :  { %12210 = vst [vmem:[#allocation58_spill] sm:$0xff] %v8938_v49  ;;  %v3724_v55 = vmin.f32 %v8898_v37, 0.0  ;;  %1876 = vperm.xlu0 %7730, %v1139_v61   ;;  %v1213_v2 = vrot.slane %v1191_v14, %v8780_v25  ;;  %v678_v40 = vrot.slane %v8807_v48, %v8752_v0  ;;  %v514_v39 = vadd.f32 1.0, %v8850_v60  ;;  %12213 = vst [vmem:[#allocation60_spill] sm:$0xff] %v8968_v44 }
  0xf6   :  { %v8946_v27 = vsub.f32 %v12212_v6, %v528_v10  ;;  %v1220_v35 = vrot.slane %v1192_v53, %v8780_v25  ;;  %v1221_v1 = vcombine.low %v1199_v15, %v1206_v50  ;;  %v682_v51 = vrot.slane %v8807_v48, %v8755_v11 }
  0xf7   :  { %7798 = vpow2.f32 %v3738_v33  ;;  %v686_v5 = vrot.slane %v8807_v48, %v8758_v63  ;;  %v690_v10 = vrot.slane %v8807_v48, %v8761_v24  ;;  %v694_v19 = vrot.slane %v8807_v48, %v8765_v58 }
  0xf8   :  { %v1222_v57 = vcombine.low %v1213_v2, %v1220_v35  ;;  %v1229_v32 = vrot.slane %v1221_v1, %v8780_v25  ;;  %v698_v60 = vrot.slane %v8807_v48, %v8768_v30  ;;  %v702_v53 = vrot.slane %v8807_v48, %v8772_v12  ;;  %v8977_v1 = vpop.xlane.xlu1 %313 }
  0xf9   :  { %v513_v33 = vadd.f32 1.0, %v8857_v9  ;;  %v706_v45 = vrot.slane %v8807_v48, %v8777_v22  ;;  %v1238_v61 = vcombine.low %v678_v40, %v682_v51  ;;  %v1239_v14 = vcombine.low %v686_v5, %v690_v10  ;;  %v7795_v15 = vpop.eup %7794  ;;  %12215 = vst [vmem:[#allocation61_spill] sm:$0xff] %v8977_v1 }
  0xfa   :  { %v12214_v50 = vmin.f32 %v8697_v23, 0.0  ;;  %v3748_v2 = vmul.f32 1.442695, %v3725_v13  ;;  %v1236_v35 = vrot.slane %v1222_v57, %v8780_v25  ;;  %v1240_v7 = vcombine.low %v694_v19, %v698_v60  ;;  %v8993_v19 = vpop.xlane.xlu0 %310 }
  0xfb   :  { %7800 = vpow2.f32 %v3744_v36  ;;  %v1241_v9 = vcombine.low %v702_v53, %v706_v45  ;;  %v1248_v49 = vrot.slane %v1238_v61, %v8780_v25  ;;  %v1255_v46 = vrot.slane %v1239_v14, %v8780_v25  ;;  %12216 = vst [vmem:[#allocation62_spill] sm:$0xff] %v8993_v19 }
  0xfc   :  { %v8974_v6 = vsub.f32 %v12214_v50, %v534_v56  ;;  %7802 = vlog2.f32 %v514_v39  ;;  %v3727_v48 = vmin.f32 %v8906_v59, 0.0  ;;  %v1237_v40 = vcombine.low %v1229_v32, %v1236_v35  ;;  %v9000_v60 = vpop.xlane.xlu1 %319 }
  0xfd   :  { %v1262_v23 = vrot.slane %v1240_v7, %v8780_v25  ;;  %v7797_v56 = vpop.eup %7796  ;;  %7804 = vlog2.f32 %v513_v33  ;;  %v1269_v13 = vrot.slane %v1241_v9, %v8780_v25  ;;  %v1270_v51 = vcombine.low %v1248_v49, %v1255_v46  ;;  %12217 = vst [vmem:[#allocation63_spill] sm:$0xff] %v9000_v60 }
  0xfe   :  { %v710_v5 = vrot.slane %v8832_v54, %v8752_v0  ;;  %v3726_v36 = vmin.f32 %v8932_v20, 0.0  ;;  %1882 = vperm.xlu1 %7731, %v1237_v40   ;;  %v714_v10 = vrot.slane %v8832_v54, %v8755_v11  ;;  %v718_v39 = vrot.slane %v8832_v54, %v8758_v63 }
  0xff   :  { %v722_v7 = vrot.slane %v8832_v54, %v8761_v24  ;;  %v1271_v57 = vcombine.low %v1262_v23, %v1269_v13  ;;  %v1278_v46 = vrot.slane %v1270_v51, %v8780_v25  ;;  %v726_v49 = vrot.slane %v8832_v54, %v8765_v58 }
 0x100   :  { %v730_v32 = vrot.slane %v8832_v54, %v8768_v30  ;;  %v734_v53 = vrot.slane %v8832_v54, %v8772_v12  ;;  %v738_v33 = vrot.slane %v8832_v54, %v8777_v22  ;;  %v1287_v45 = vcombine.low %v710_v5, %v714_v10 }
 0x101   :  { %v1288_v61 = vcombine.low %v718_v39, %v722_v7  ;;  %v9006_v14 = vpop.eup %7798  ;;  %v532_v50 = vmul.f32 0.6931472, %v8867_v18  ;;  %v3746_v35 = vmul.f32 1.442695, %v3724_v55  ;;  %v1285_v9 = vrot.slane %v1271_v57, %v8780_v25 }
 0x102   :  { %12218 = vst [vmem:[#allocation64_spill] sm:$0xff] %v9006_v14  ;;  %v1289_v40 = vcombine.low %v726_v49, %v730_v32  ;;  %v538_v23 = vmul.f32 0.6931472, %v8879_v62  ;;  %v1290_v13 = vcombine.low %v734_v53, %v738_v33  ;;  %v1297_v51 = vrot.slane %v1287_v45, %v8780_v25 }
 0x103   :  { %v1304_v17 = vrot.slane %v1288_v61, %v8780_v25  ;;  %7806 = vpow2.f32 %v8921_v38  ;;  %v3752_v54 = vmul.f32 1.442695, %v3727_v48  ;;  %v1286_v5 = vcombine.low %v1278_v46, %v1285_v9  ;;  %v9027_v48 = vpop.xlane.xlu0 %316 }
 0x104   :  { %v1311_v10 = vrot.slane %v1289_v40, %v8780_v25  ;;  %v536_v39 = vmul.f32 0.6931472, %v8910_v16  ;;  %v3750_v18 = vmul.f32 1.442695, %v3726_v36  ;;  %v1318_v55 = vrot.slane %v1290_v13, %v8780_v25  ;;  %12221 = vst [vmem:[#allocation67_spill] sm:$0xff] %v9027_v48 }
 0x105   :  { %v1319_v7 = vcombine.low %v1297_v51, %v1304_v17  ;;  %v9017_v57 = vpop.eup %7800  ;;  %v542_v62 = vmul.f32 0.6931472, %v7795_v15  ;;  %7808 = vpow2.f32 %v3748_v2  ;;  %v9021_v49 = vadd.f32 %v8898_v37, %v8620_v41  ;;  %1885 = vperm.xlu1 %7731, %v1286_v5   ;;  %v9034_v2 = vpop.xlane.xlu1 %357 }
 0x106   :  { %12219 = vst [vmem:[#allocation65_spill] sm:$0xff] %v9017_v57  ;;  %v9025_v38 = vadd.f32 %v8906_v59, %v8622_v42  ;;  %v7803_v16 = vpop.eup %7802  ;;  %v12222_v36 = vmin.f32 %v8704_v26, 0.0  ;;  %7810 = vpow2.f32 %v3746_v35  ;;  %v1320_v17 = vcombine.low %v1311_v10, %v1318_v55  ;;  %12223 = vst [vmem:[#allocation68_spill] sm:$0xff] %v9034_v2 }
 0x107   :  { %v1327_v15 = vrot.slane %v1319_v7, %v8780_v25  ;;  %v7805_v41 = vpop.eup %7804  ;;  %v12224_v32 = vmin.f32 %v8711_v29, 0.0  ;;  %7812 = vpow2.f32 %v3752_v54  ;;  %v9042_v42 = vadd.f32 %v8932_v20, %v8624_v43  ;;  %v9073_v54 = vpop.xlane.xlu0 %354 }
 0x108   :  { %12220 = vst [vmem:[#allocation66_spill] sm:$0xff] %v9025_v38  ;;  %v9031_v46 = vsub.f32 %v12222_v36, %v532_v50  ;;  %v3729_v26 = vmin.f32 %v8940_v21, 0.0  ;;  %v12226_v33 = vmin.f32 %v8719_v4, 0.0  ;;  %v9049_v61 = vmul.f32 0.6931472, %v7797_v56  ;;  %12229 = vst [vmem:[#allocation71_spill] sm:$0xff] %v9073_v54 }
 0x109   :  { %v9038_v53 = vsub.f32 %v12224_v32, %v538_v23  ;;  %12225 = vst [vmem:[#allocation69_spill] sm:$0xff] %v9042_v42  ;;  %7814 = vpow2.f32 %v3750_v18  ;;  %v1334_v50 = vrot.slane %v1320_v17, %v8780_v25  ;;  %v12228_v29 = vmin.f32 %v8728_v28, 0.0 }
 0x10a   :  { %v9047_v45 = vsub.f32 %v12226_v33, %v536_v39  ;;  %v9058_v9 = vsub.f32 %v9034_v2, %v8791_v8  ;;  %v5995_v43 = vadd.f32 %v9034_v2, %v8638_v52  ;;  %v870_v4 = vrot.slane %v8974_v6, %v8752_v0 }
 0x10b   :  { %v9054_v35 = vsub.f32 %v12228_v29, %v542_v62  ;;  %v9064_v40 = vmul.f32 0.6931472, %v7803_v16  ;;  %v9066_v56 = vmul.f32 0.6931472, %v7805_v41  ;;  %v1335_v23 = vcombine.low %v1327_v15, %v1334_v50  ;;  %v12233_v29 = vld [vmem:[#allocation12_spill] sm:$0xff] }
 0x10c   :  { %12227 = vst [vmem:[#allocation70_spill] sm:$0xff] %v9047_v45  ;;  %v874_v28 = vrot.slane %v8974_v6, %v8755_v11  ;;  %v9070_v13 = vmul.f32 1.442695, %v3729_v26  ;;  %v3728_v51 = vmin.f32 %v8968_v44, 0.0  ;;  %v878_v52 = vrot.slane %v8974_v6, %v8758_v63  ;;  %v12231_v26 = vld [vmem:[#allocation43_spill] sm:$0xff] }
 0x10d   :  { %v882_v5 = vrot.slane %v8974_v6, %v8761_v24  ;;  %v3731_v10 = vmin.f32 %v8977_v1, 0.0  ;;  %1888 = vperm.xlu1 %7731, %v1335_v23   ;;  %v886_v39 = vrot.slane %v8974_v6, %v8765_v58  ;;  %v890_v18 = vrot.slane %v8974_v6, %v8768_v30  ;;  %v9086_v7 = vpop.eup %7806 }
 0x10e   :  { %v894_v55 = vrot.slane %v8974_v6, %v8772_v12  ;;  %12230 = vst [vmem:[#allocation72_spill] sm:$0xff] %v9086_v7  ;;  %v2094_v62 = vand.u32 2147483647, %v9058_v9  ;;  %v9090_v16 = vsub.f32 %v8811_v31, %v5995_v43  ;;  %v898_v36 = vrot.slane %v8974_v6, %v8777_v22 }
 0x10f   :  { %v1532_v17 = vcombine.low %v870_v4, %v874_v28  ;;  %v9096_v15 = vsub.f32 %v9073_v54, %v8796_v3  ;;  %v1533_v41 = vcombine.low %v878_v52, %v882_v5  ;;  %v1534_v32 = vcombine.low %v886_v39, %v890_v18  ;;  %v9100_v50 = vpop.eup %7808 }
 0x110   :  { %v742_v33 = vrot.slane %v12231_v26, %v8752_v0  ;;  %12232 = vst [vmem:[#allocation43_spill] sm:$0xff] %v9100_v50  ;;  %v5994_v23 = vadd.f32 %v9073_v54, %v12233_v29  ;;  %v1535_v31 = vcombine.low %v894_v55, %v898_v36  ;;  %v746_v6 = vrot.slane %v12231_v26, %v8755_v11  ;;  %v9107_v4 = vpop.eup %7810 }
 0x111   :  { %v1542_v43 = vrot.slane %v1532_v17, %v8780_v25  ;;  %12234 = vst [vmem:[#allocation12_spill] sm:$0xff] %v9107_v4  ;;  %v1549_v28 = vrot.slane %v1533_v41, %v8780_v25  ;;  %v1556_v52 = vrot.slane %v1534_v32, %v8780_v25  ;;  %v750_v5 = vrot.slane %v12231_v26, %v8758_v63  ;;  %v9115_v18 = vpop.eup %7812 }
 0x112   :  { %v754_v39 = vrot.slane %v12231_v26, %v8761_v24  ;;  %12235 = vst [vmem:[#allocation73_spill] sm:$0xff] %v9115_v18  ;;  %v1563_v55 = vrot.slane %v1535_v31, %v8780_v25  ;;  %v758_v36 = vrot.slane %v12231_v26, %v8765_v58  ;;  %v762_v17 = vrot.slane %v12231_v26, %v8768_v30  ;;  %v12237_v31 = vld [vmem:[#allocation42_spill] sm:$0xff] }
 0x113   :  { %v766_v41 = vrot.slane %v12231_v26, %v8772_v12  ;;  %v9124_v32 = vpop.eup %7814  ;;  %v1564_v29 = vcombine.low %v1542_v43, %v1549_v28  ;;  %v770_v50 = vrot.slane %v12231_v26, %v8777_v22  ;;  %v1336_v4 = vcombine.low %v742_v33, %v746_v6 }
 0x114   :  { %12236 = vst [vmem:[#allocation74_spill] sm:$0xff] %v9124_v32  ;;  %v1337_v57 = vcombine.low %v750_v5, %v754_v39  ;;  %v3730_v18 = vmin.f32 %v8993_v19, 0.0  ;;  %v9130_v14 = vsub.f32 %v12237_v31, %v5994_v23  ;;  %v1565_v8 = vcombine.low %v1556_v52, %v1563_v55  ;;  %v12238_v55 = vld [vmem:[#allocation25_spill] sm:$0xff] }
 0x115   :  { %v1338_v7 = vcombine.low %v758_v36, %v762_v17  ;;  %v2110_v3 = vsub.f32 0.0, %v2094_v62  ;;  %v1572_v42 = vrot.slane %v1564_v29, %v8780_v25  ;;  %v1339_v45 = vcombine.low %v766_v41, %v770_v50  ;;  %v12240_v41 = vld [vmem:[#allocation29_spill] sm:$0xff] }
 0x116   :  { %v1346_v38 = vrot.slane %v1336_v4, %v8780_v25  ;;  %v6043_v43 = vand.u32 2147483647, %v9090_v16  ;;  %v1579_v28 = vrot.slane %v1565_v8, %v8780_v25  ;;  %v1353_v26 = vrot.slane %v1337_v57, %v8780_v25 }
 0x117   :  { %v1360_v33 = vrot.slane %v1338_v7, %v8780_v25  ;;  %v3754_v6 = vmul.f32 1.442695, %v3728_v51  ;;  %v3760_v5 = vmul.f32 1.442695, %v3731_v10  ;;  %v2093_v23 = vand.u32 2147483647, %v9096_v15 }
 0x118   :  { %v1367_v52 = vrot.slane %v1339_v45, %v8780_v25  ;;  %v3733_v62 = vmin.f32 %v9000_v60, 0.0  ;;  %v6042_v50 = vand.u32 2147483647, %v9130_v14  ;;  %v1580_v39 = vcombine.low %v1572_v42, %v1579_v28 }
 0x119   :  { %v1368_v4 = vcombine.low %v1346_v38, %v1353_v26  ;;  %v12239_v36 = vmin.f32 %v12238_v55, 0.0  ;;  %v3758_v57 = vmul.f32 1.442695, %v3730_v18  ;;  %v3732_v7 = vmin.f32 %v9027_v48, 0.0  ;;  %v12242_v18 = vld [vmem:[#allocation30_spill] sm:$0xff] }
 0x11a   :  { %v1369_v51 = vcombine.low %v1360_v33, %v1367_v52  ;;  %7816 = vpow2.f32 %v9070_v13  ;;  %v2127_v10 = vmul.f32 1.442695, %v2110_v3  ;;  %v6059_v17 = vsub.f32 0.0, %v6043_v43  ;;  %1903 = vperm.xlu0 %7730, %v1580_v39   ;;  %v12245_v43 = vld [vmem:[#allocation6_spill] sm:$0xff]  ;;  %v12246_v52 = vld [vmem:[#allocation7_spill] sm:$0xff] }
 0x11b   :  { %v9145_v8 = vsub.f32 %v12239_v36, %v9049_v61  ;;  %v1376_v45 = vrot.slane %v1368_v4, %v8780_v25  ;;  %v12241_v42 = vmin.f32 %v12240_v41, 0.0  ;;  %7818 = vpow2.f32 %v3754_v6  ;;  %v12253_v41 = vld [vmem:[#allocation10_spill] sm:$0xff] }
 0x11c   :  { %v2109_v29 = vsub.f32 0.0, %v2093_v23  ;;  %v1383_v61 = vrot.slane %v1369_v51, %v8780_v25  ;;  %v12243_v31 = vmin.f32 %v12242_v18, 0.0  ;;  %7820 = vpow2.f32 %v3760_v5  ;;  %v12250_v51 = vld [vmem:[#allocation9_spill] sm:$0xff] }
 0x11d   :  { %v9153_v38 = vsub.f32 %v12241_v42, %v9064_v40  ;;  %v3764_v3 = vmul.f32 1.442695, %v3733_v62  ;;  %v6058_v13 = vsub.f32 0.0, %v6042_v50  ;;  %v9163_v26 = vadd.f32 %v8940_v21, %v12245_v43 }
 0x11e   :  { %v9159_v28 = vsub.f32 %v12243_v31, %v9066_v56  ;;  %7822 = vpow2.f32 %v3758_v57  ;;  %v3762_v33 = vmul.f32 1.442695, %v3732_v7  ;;  %v1384_v40 = vcombine.low %v1376_v45, %v1383_v61  ;;  %v12248_v57 = vld [vmem:[#allocation8_spill] sm:$0xff]  ;;  %v9202_v31 = vpop.xlane.xlu0 %360 }
 0x11f   :  { %v9167_v6 = vadd.f32 %v8968_v44, %v12246_v52  ;;  %7824 = vpow2.f32 %v2127_v10  ;;  %v3916_v23 = vmin.f32 %v9034_v2, 0.0  ;;  %v6076_v39 = vmul.f32 1.442695, %v6059_v17  ;;  %v9188_v17 = vpop.xlane.xlu1 %363  ;;  %12255 = vst [vmem:[#allocation8_spill] sm:$0xff] %v9202_v31 }
 0x120   :  { %12244 = vst [vmem:[#allocation42_spill] sm:$0xff] %v9159_v28  ;;  %v2125_v56 = vmul.f32 1.442695, %v2109_v29  ;;  %1891 = vperm.xlu1 %7731, %v1384_v40   ;;  %v934_v5 = vrot.slane %v9038_v53, %v8752_v0  ;;  %v938_v62 = vrot.slane %v9038_v53, %v8755_v11  ;;  %v942_v50 = vrot.slane %v9038_v53, %v8758_v63 }
 0x121   :  { %12247 = vst [vmem:[#allocation25_spill] sm:$0xff] %v9167_v6  ;;  %7826 = vpow2.f32 %v3764_v3  ;;  %v6074_v4 = vmul.f32 1.442695, %v6058_v13  ;;  %v946_v55 = vrot.slane %v9038_v53, %v8761_v24  ;;  %v950_v36 = vrot.slane %v9038_v53, %v8765_v58  ;;  %12252 = vst [vmem:[#allocation6_spill] sm:$0xff] %v9188_v17 }
 0x122   :  { %v9182_v7 = vadd.f32 %v8977_v1, %v12248_v57  ;;  %v9186_v10 = vadd.f32 %v8993_v19, %v12250_v51  ;;  %7828 = vpow2.f32 %v3762_v33  ;;  %v954_v45 = vrot.slane %v9038_v53, %v8768_v30  ;;  %v12257_v33 = vld [vmem:[#allocation13_spill] sm:$0xff] }
 0x123   :  { %v9194_v42 = vadd.f32 %v9000_v60, %v12253_v41  ;;  %7830 = vpow2.f32 %v6076_v39  ;;  %v958_v29 = vrot.slane %v9038_v53, %v8772_v12  ;;  %v962_v61 = vrot.slane %v9038_v53, %v8777_v22  ;;  %v12259_v53 = vld [vmem:[#allocation41_spill] sm:$0xff] }
 0x124   :  { %12249 = vst [vmem:[#allocation29_spill] sm:$0xff] %v9182_v7  ;;  %12251 = vst [vmem:[#allocation30_spill] sm:$0xff] %v9186_v10  ;;  %v9200_v18 = vmul.f32 1.442695, %v3916_v23  ;;  %7832 = vpow2.f32 %v2125_v56  ;;  %v1630_v3 = vcombine.low %v934_v5, %v938_v62  ;;  %v1631_v13 = vcombine.low %v942_v50, %v946_v55  ;;  %v9204_v43 = vpop.eup %7816  ;;  %v12261_v50 = vld [vmem:[#allocation14_spill] sm:$0xff] }
 0x125   :  { %12254 = vst [vmem:[#allocation7_spill] sm:$0xff] %v9194_v42  ;;  %12256 = vst [vmem:[#allocation9_spill] sm:$0xff] %v9204_v43  ;;  %7834 = vpow2.f32 %v6074_v4  ;;  %v5997_v40 = vadd.f32 %v9188_v17, %v12257_v33  ;;  %v1632_v52 = vcombine.low %v950_v36, %v954_v45  ;;  %v1633_v39 = vcombine.low %v958_v29, %v962_v61  ;;  %v9208_v57 = vpop.eup %7818 }
 0x126   :  { %12258 = vst [vmem:[#allocation10_spill] sm:$0xff] %v9208_v57  ;;  %v3915_v51 = vmin.f32 %v9073_v54, 0.0  ;;  %v9213_v23 = vsub.f32 %v9188_v17, %v12259_v53  ;;  %v1640_v56 = vrot.slane %v1630_v3, %v8780_v25  ;;  %v1647_v5 = vrot.slane %v1631_v13, %v8780_v25  ;;  %v9217_v62 = vpop.eup %7820 }
 0x127   :  { %12260 = vst [vmem:[#allocation13_spill] sm:$0xff] %v9217_v62  ;;  %v5996_v4 = vadd.f32 %v9202_v31, %v12261_v50  ;;  %v1654_v55 = vrot.slane %v1632_v52, %v8780_v25  ;;  %v1661_v36 = vrot.slane %v1633_v39, %v8780_v25  ;;  %v774_v45 = vrot.slane %v8946_v27, %v8752_v0  ;;  %v12263_v50 = vld [vmem:[#allocation44_spill] sm:$0xff] }
 0x128   :  { %v9225_v41 = vpop.eup %7822  ;;  %v1662_v29 = vcombine.low %v1640_v56, %v1647_v5  ;;  %v778_v61 = vrot.slane %v8946_v27, %v8755_v11  ;;  %v782_v3 = vrot.slane %v8946_v27, %v8758_v63  ;;  %v786_v13 = vrot.slane %v8946_v27, %v8761_v24  ;;  %v12264_v5 = vld [vmem:[#allocation45_spill] sm:$0xff] }
 0x129   :  { %12262 = vst [vmem:[#allocation14_spill] sm:$0xff] %v9225_v41  ;;  %v7825_v33 = vpop.eup %7824  ;;  %v3918_v52 = vmin.f32 %v9188_v17, 0.0  ;;  %v9235_v39 = vsub.f32 %v12263_v50, %v5997_v40  ;;  %v1663_v62 = vcombine.low %v1654_v55, %v1661_v36  ;;  %v790_v43 = vrot.slane %v8946_v27, %v8765_v58  ;;  %v12266_v17 = vld [vmem:[#allocation47_spill] sm:$0xff] }
 0x12a   :  { %v2096_v56 = vand.u32 2147483647, %v9213_v23  ;;  %v9242_v41 = vsub.f32 %v9202_v31, %v12264_v5  ;;  %v1670_v57 = vrot.slane %v1662_v29, %v8780_v25  ;;  %v794_v32 = vrot.slane %v8946_v27, %v8768_v30 }
 0x12b   :  { %v9247_v53 = vpop.eup %7826  ;;  %v9250_v40 = vsub.f32 %v12266_v17, %v5996_v4  ;;  %v1677_v55 = vrot.slane %v1663_v62, %v8780_v25  ;;  %v798_v36 = vrot.slane %v8946_v27, %v8772_v12  ;;  %v802_v50 = vrot.slane %v8946_v27, %v8777_v22 }
 0x12c   :  { %12265 = vst [vmem:[#allocation44_spill] sm:$0xff] %v9247_v53  ;;  %v9257_v5 = vpop.eup %7828  ;;  %v2158_v54 = vadd.f32 1.0, %v7825_v33  ;;  %v1385_v29 = vcombine.low %v774_v45, %v778_v61  ;;  %v1386_v2 = vcombine.low %v782_v3, %v786_v13  ;;  %v1387_v42 = vcombine.low %v790_v43, %v794_v32 }
 0x12d   :  { %12267 = vst [vmem:[#allocation47_spill] sm:$0xff] %v9257_v5  ;;  %v7831_v60 = vpop.eup %7830  ;;  %v3931_v10 = vmul.f32 1.442695, %v3915_v51  ;;  %v6045_v53 = vand.u32 2147483647, %v9235_v39  ;;  %v1678_v17 = vcombine.low %v1670_v57, %v1677_v55  ;;  %v1388_v4 = vcombine.low %v798_v36, %v802_v50 }
 0x12e   :  { %v7833_v19 = vpop.eup %7832  ;;  %v2095_v62 = vand.u32 2147483647, %v9242_v41  ;;  %v1395_v28 = vrot.slane %v1385_v29, %v8780_v25  ;;  %v1402_v7 = vrot.slane %v1386_v2, %v8780_v25  ;;  %v1409_v27 = vrot.slane %v1387_v42, %v8780_v25 }
 0x12f   :  { %v7835_v5 = vpop.eup %7834  ;;  %v2112_v33 = vsub.f32 0.0, %v2096_v56  ;;  %v3937_v45 = vmul.f32 1.442695, %v3918_v52  ;;  %v6044_v32 = vand.u32 2147483647, %v9250_v40  ;;  %1909 = vperm.xlu0 %7730, %v1678_v17   ;;  %v1416_v43 = vrot.slane %v1388_v4, %v8780_v25 }
 0x130   :  { %7836 = vlog2.f32 %v2158_v54  ;;  %v6107_v57 = vadd.f32 1.0, %v7831_v60  ;;  %v3917_v51 = vmin.f32 %v9202_v31, 0.0  ;;  %v1417_v61 = vcombine.low %v1395_v28, %v1402_v7  ;;  %v12268_v54 = vld [vmem:[#allocation11_spill] sm:$0xff] }
 0x131   :  { %7838 = vpow2.f32 %v9200_v18  ;;  %v2157_v3 = vadd.f32 1.0, %v7833_v19  ;;  %v6061_v13 = vsub.f32 0.0, %v6045_v53  ;;  %v1418_v2 = vcombine.low %v1409_v27, %v1416_v43  ;;  %v9288_v43 = vpop.xlane.xlu1 %369 }
 0x132   :  { %7840 = vpow2.f32 %v3931_v10  ;;  %v6106_v42 = vadd.f32 1.0, %v7835_v5  ;;  %v2111_v55 = vsub.f32 0.0, %v2095_v62  ;;  %v1425_v52 = vrot.slane %v1417_v61, %v8780_v25  ;;  %12270 = vst [vmem:[#allocation75_spill] sm:$0xff] %v9288_v43 }
 0x133   :  { %v2131_v56 = vmul.f32 1.442695, %v2112_v33  ;;  %7842 = vpow2.f32 %v3937_v45  ;;  %v6060_v36 = vsub.f32 0.0, %v6044_v32  ;;  %v1432_v50 = vrot.slane %v1418_v2, %v8780_v25 }
 0x134   :  { %v9272_v60 = vadd.f32 %v9027_v48, %v12268_v54  ;;  %7844 = vlog2.f32 %v6107_v57  ;;  %v3935_v19 = vmul.f32 1.442695, %v3917_v51  ;;  %v6080_v10 = vmul.f32 1.442695, %v6061_v13 }
 0x135   :  { %7846 = vlog2.f32 %v2157_v3  ;;  %v1433_v18 = vcombine.low %v1425_v52, %v1432_v50  ;;  %v2129_v5 = vmul.f32 1.442695, %v2111_v55  ;;  %v998_v29 = vrot.slane %v9054_v35, %v8752_v0  ;;  %v9294_v3 = vpop.xlane.xlu0 %366 }
 0x136   :  { %12269 = vst [vmem:[#allocation11_spill] sm:$0xff] %v9272_v60  ;;  %7848 = vlog2.f32 %v6106_v42  ;;  %v6078_v17 = vmul.f32 1.442695, %v6060_v36  ;;  %v1002_v4 = vrot.slane %v9054_v35, %v8755_v11  ;;  %v1006_v62 = vrot.slane %v9054_v35, %v8758_v63  ;;  %12271 = vst [vmem:[#allocation76_spill] sm:$0xff] %v9294_v3 }
 0x137   :  { %7850 = vpow2.f32 %v2131_v56  ;;  %1894 = vperm.xlu1 %7731, %v1433_v18   ;;  %v1010_v45 = vrot.slane %v9054_v35, %v8761_v24  ;;  %v1014_v57 = vrot.slane %v9054_v35, %v8765_v58  ;;  %v1018_v51 = vrot.slane %v9054_v35, %v8768_v30  ;;  %v12273_v56 = vld [vmem:[#allocation46_spill] sm:$0xff] }
 0x138   :  { %7852 = vpow2.f32 %v3935_v19  ;;  %v1022_v13 = vrot.slane %v9054_v35, %v8772_v12  ;;  %v1026_v2 = vrot.slane %v9054_v35, %v8777_v22  ;;  %v1728_v42 = vcombine.low %v998_v29, %v1002_v4  ;;  %v12275_v19 = vld [vmem:[#allocation15_spill] sm:$0xff] }
 0x139   :  { %7854 = vpow2.f32 %v6080_v10  ;;  %v9305_v36 = vsub.f32 %v9288_v43, %v12273_v56  ;;  %v1729_v50 = vcombine.low %v1006_v62, %v1010_v45  ;;  %v5999_v10 = vadd.f32 %v9288_v43, %v12275_v19 }
 0x13a   :  { %v7837_v61 = vpop.eup %7836  ;;  %7856 = vpow2.f32 %v2129_v5  ;;  %v1730_v18 = vcombine.low %v1014_v57, %v1018_v51  ;;  %v1731_v5 = vcombine.low %v1022_v13, %v1026_v2  ;;  %v1738_v35 = vrot.slane %v1728_v42, %v8780_v25 }
 0x13b   :  { %v9300_v55 = vpop.eup %7838  ;;  %7858 = vpow2.f32 %v6078_v17  ;;  %v2176_v4 = vmul.f32 0.6931472, %v7837_v61  ;;  %v12277_v17 = vld [vmem:[#allocation16_spill] sm:$0xff]  ;;  %v1745_v33 = vrot.slane %v1729_v50, %v8780_v25  ;;  %v806_v57 = vrot.slane %v8891_v34, %v8752_v0 }
 0x13c   :  { %12272 = vst [vmem:[#allocation77_spill] sm:$0xff] %v9300_v55  ;;  %v9307_v54 = vpop.eup %7840  ;;  %v5998_v52 = vadd.f32 %v9294_v3, %v12277_v17  ;;  %v1752_v45 = vrot.slane %v1730_v18, %v8780_v25  ;;  %v1759_v27 = vrot.slane %v1731_v5, %v8780_v25  ;;  %v810_v51 = vrot.slane %v8891_v34, %v8755_v11  ;;  %v12278_v18 = vld [vmem:[#allocation49_spill] sm:$0xff] }
 0x13d   :  { %12274 = vst [vmem:[#allocation78_spill] sm:$0xff] %v9307_v54  ;;  %v9312_v29 = vpop.eup %7842  ;;  %v2098_v61 = vand.u32 2147483647, %v9305_v36  ;;  %v1760_v2 = vcombine.low %v1738_v35, %v1745_v33  ;;  %v814_v42 = vrot.slane %v8891_v34, %v8758_v63  ;;  %v818_v50 = vrot.slane %v8891_v34, %v8761_v24 }
 0x13e   :  { %12276 = vst [vmem:[#allocation15_spill] sm:$0xff] %v9312_v29  ;;  %v7845_v62 = vpop.eup %7844  ;;  %v9330_v17 = vsub.f32 %v12278_v18, %v5999_v10  ;;  %v1761_v5 = vcombine.low %v1752_v45, %v1759_v27  ;;  %v822_v32 = vrot.slane %v8891_v34, %v8765_v58  ;;  %v826_v53 = vrot.slane %v8891_v34, %v8768_v30  ;;  %v12280_v45 = vld [vmem:[#allocation54_spill] sm:$0xff] }
 0x13f   :  { %v7847_v13 = vpop.eup %7846  ;;  %v9338_v33 = vsub.f32 %v9294_v3, %v8860_v47  ;;  %v1768_v35 = vrot.slane %v1760_v2, %v8780_v25  ;;  %v830_v28 = vrot.slane %v8891_v34, %v8772_v12  ;;  %v834_v10 = vrot.slane %v8891_v34, %v8777_v22 }
 0x140   :  { %v7849_v19 = vpop.eup %7848  ;;  %v9348_v18 = vsub.f32 %v12280_v45, %v5998_v52  ;;  %v1775_v29 = vrot.slane %v1761_v5, %v8780_v25  ;;  %v1434_v56 = vcombine.low %v806_v57, %v810_v51  ;;  %v1435_v31 = vcombine.low %v814_v42, %v818_v50 }
 0x141   :  { %v7851_v7 = vpop.eup %7850  ;;  %v6125_v54 = vmul.f32 0.6931472, %v7845_v62  ;;  %v3920_v47 = vmin.f32 %v9288_v43, 0.0  ;;  %v1436_v2 = vcombine.low %v822_v32, %v826_v53  ;;  %v1437_v60 = vcombine.low %v830_v28, %v834_v10 }
 0x142   :  { %v9345_v27 = vpop.eup %7852  ;;  %v6047_v1 = vand.u32 2147483647, %v9330_v17  ;;  %v1776_v6 = vcombine.low %v1768_v35, %v1775_v29  ;;  %v1444_v34 = vrot.slane %v1434_v56, %v8780_v25  ;;  %v2160_v45 = vadd.f32 1.0, %v7851_v7 }
 0x143   :  { %12279 = vst [vmem:[#allocation16_spill] sm:$0xff] %v9345_v27  ;;  %v7855_v55 = vpop.eup %7854  ;;  %v1451_v27 = vrot.slane %v1435_v31, %v8780_v25  ;;  %v2097_v5 = vand.u32 2147483647, %v9338_v33  ;;  %v1458_v57 = vrot.slane %v1436_v2, %v8780_v25  ;;  %v1465_v62 = vrot.slane %v1437_v60, %v8780_v25 }
 0x144   :  { %v7857_v48 = vpop.eup %7856  ;;  %v6109_v51 = vadd.f32 1.0, %v7855_v55  ;;  %v2114_v42 = vsub.f32 0.0, %v2098_v61  ;;  %v6046_v28 = vand.u32 2147483647, %v9348_v18  ;;  %1915 = vperm.xlu0 %7730, %v1776_v6   ;;  %v2174_v32 = vmul.f32 0.6931472, %v7847_v13 }
 0x145   :  { %v7859_v52 = vpop.eup %7858  ;;  %v1466_v53 = vcombine.low %v1444_v34, %v1451_v27  ;;  %v6123_v29 = vmul.f32 0.6931472, %v7849_v19  ;;  %v2159_v50 = vadd.f32 1.0, %v7857_v48  ;;  %v1467_v56 = vcombine.low %v1458_v57, %v1465_v62  ;;  %v9386_v62 = vpop.xlane.xlu0 %372 }
 0x146   :  { %v12281_v31 = vmin.f32 %v9058_v9, 0.0  ;;  %v3941_v7 = vmul.f32 1.442695, %v3920_v47  ;;  %v6063_v10 = vsub.f32 0.0, %v6047_v1  ;;  %7860 = vlog2.f32 %v2160_v45  ;;  %12290 = vst [vmem:[#allocation82_spill] sm:$0xff] %v9386_v62 }
 0x147   :  { %v1474_v2 = vrot.slane %v1466_v53, %v8780_v25  ;;  %v6108_v60 = vadd.f32 1.0, %v7859_v52  ;;  %v2113_v55 = vsub.f32 0.0, %v2097_v5  ;;  %v1481_v61 = vrot.slane %v1467_v56, %v8780_v25  ;;  %v12292_v53 = vld [vmem:[#allocation17_spill] sm:$0xff] }
 0x148   :  { %v9361_v35 = vsub.f32 %v12281_v31, %v2176_v4  ;;  %v12283_v6 = vmin.f32 %v9090_v16, 0.0  ;;  %7862 = vlog2.f32 %v6109_v51  ;;  %v2135_v48 = vmul.f32 1.442695, %v2114_v42  ;;  %v12291_v42 = vld [vmem:[#allocation50_spill] sm:$0xff] }
 0x149   :  { %v6062_v13 = vsub.f32 0.0, %v6046_v28  ;;  %v12285_v9 = vmin.f32 %v9096_v15, 0.0  ;;  %v12287_v47 = vmin.f32 %v9130_v14, 0.0  ;;  %7864 = vlog2.f32 %v2159_v50 }
 0x14a   :  { %12282 = vst [vmem:[#allocation49_spill] sm:$0xff] %v9361_v35  ;;  %v9367_v27 = vsub.f32 %v12283_v6, %v6125_v54  ;;  %v1482_v19 = vcombine.low %v1474_v2, %v1481_v61  ;;  %7866 = vpow2.f32 %v3941_v7  ;;  %v6084_v52 = vmul.f32 1.442695, %v6063_v10  ;;  %v9379_v54 = vpop.xlane.xlu1 %375 }
 0x14b   :  { %v9371_v4 = vsub.f32 %v12285_v9, %v2174_v32  ;;  %v9375_v1 = vsub.f32 %v12287_v47, %v6123_v29  ;;  %v3919_v16 = vmin.f32 %v9294_v3, 0.0  ;;  %12289 = vst [vmem:[#allocation81_spill] sm:$0xff] %v9379_v54  ;;  %7868 = vlog2.f32 %v6108_v60  ;;  %v12293_v9 = vld [vmem:[#allocation58_spill] sm:$0xff] }
 0x14c   :  { %12284 = vst [vmem:[#allocation54_spill] sm:$0xff] %v9367_v27  ;;  %v2133_v45 = vmul.f32 1.442695, %v2113_v55  ;;  %1897 = vperm.xlu1 %7731, %v1482_v19   ;;  %v1062_v15 = vrot.slane %v9153_v38, %v8752_v0  ;;  %v1066_v14 = vrot.slane %v9153_v38, %v8755_v11  ;;  %7870 = vpow2.f32 %v2135_v48 }
 0x14d   :  { %12286 = vst [vmem:[#allocation79_spill] sm:$0xff] %v9371_v4  ;;  %12288 = vst [vmem:[#allocation80_spill] sm:$0xff] %v9375_v1  ;;  %v6082_v57 = vmul.f32 1.442695, %v6062_v13  ;;  %v1070_v51 = vrot.slane %v9153_v38, %v8758_v63  ;;  %v9392_v28 = vsub.f32 %v9379_v54, %v12291_v42  ;;  %v6001_v32 = vadd.f32 %v9379_v54, %v12292_v53 }
 0x14e   :  { %v1074_v29 = vrot.slane %v9153_v38, %v8761_v24  ;;  %v1078_v50 = vrot.slane %v9153_v38, %v8765_v58  ;;  %7872 = vpow2.f32 %v6084_v52  ;;  %v1082_v31 = vrot.slane %v9153_v38, %v8768_v30 }
 0x14f   :  { %v1086_v7 = vrot.slane %v9153_v38, %v8772_v12  ;;  %7874 = vpow2.f32 %v2133_v45  ;;  %v9407_v10 = vsub.f32 %v9386_v62, %v8898_v37  ;;  %v1090_v2 = vrot.slane %v9153_v38, %v8777_v22 }
 0x150   :  { %v1826_v60 = vcombine.low %v1062_v15, %v1066_v14  ;;  %v3939_v55 = vmul.f32 1.442695, %v3919_v16  ;;  %7876 = vpow2.f32 %v6082_v57  ;;  %v1827_v61 = vcombine.low %v1070_v51, %v1074_v29  ;;  %v7861_v48 = vpop.eup %7860  ;;  %v12294_v57 = vld [vmem:[#allocation18_spill] sm:$0xff] }
 0x151   :  { %v1828_v6 = vcombine.low %v1078_v50, %v1082_v31  ;;  %v2100_v13 = vand.u32 2147483647, %v9392_v28  ;;  %v9413_v47 = vsub.f32 %v12293_v9, %v6001_v32  ;;  %v1829_v19 = vcombine.low %v1086_v7, %v1090_v2 }
 0x152   :  { %v1836_v52 = vrot.slane %v1826_v60, %v8780_v25  ;;  %v7863_v45 = vpop.eup %7862  ;;  %v1843_v53 = vrot.slane %v1827_v61, %v8780_v25  ;;  %v838_v38 = vrot.slane %v9031_v46, %v8752_v0  ;;  %v842_v16 = vrot.slane %v9031_v46, %v8755_v11 }
 0x153   :  { %v1850_v5 = vrot.slane %v1828_v6, %v8780_v25  ;;  %v7865_v15 = vpop.eup %7864  ;;  %v2099_v14 = vand.u32 2147483647, %v9407_v10  ;;  %v6000_v51 = vadd.f32 %v9386_v62, %v12294_v57  ;;  %v1857_v32 = vrot.slane %v1829_v19, %v8780_v25 }
 0x154   :  { %v846_v29 = vrot.slane %v9031_v46, %v8758_v63  ;;  %v9428_v50 = vpop.eup %7866  ;;  %v1858_v31 = vcombine.low %v1836_v52, %v1843_v53  ;;  %v850_v7 = vrot.slane %v9031_v46, %v8761_v24  ;;  %v854_v2 = vrot.slane %v9031_v46, %v8765_v58 }
 0x155   :  { %12295 = vst [vmem:[#allocation17_spill] sm:$0xff] %v9428_v50  ;;  %v858_v60 = vrot.slane %v9031_v46, %v8768_v30  ;;  %v7869_v61 = vpop.eup %7868  ;;  %v2116_v6 = vsub.f32 0.0, %v2100_v13  ;;  %v1859_v9 = vcombine.low %v1850_v5, %v1857_v32  ;;  %v862_v19 = vrot.slane %v9031_v46, %v8772_v12 }
 0x156   :  { %v866_v57 = vrot.slane %v9031_v46, %v8777_v22  ;;  %v7871_v56 = vpop.eup %7870  ;;  %v6049_v52 = vand.u32 2147483647, %v9413_v47  ;;  %v1866_v53 = vrot.slane %v1858_v31, %v8780_v25  ;;  %v1483_v34 = vcombine.low %v838_v38, %v842_v16 }
 0x157   :  { %v1484_v42 = vcombine.low %v846_v29, %v850_v7  ;;  %v2115_v50 = vsub.f32 0.0, %v2099_v14  ;;  %v1873_v37 = vrot.slane %v1859_v9, %v8780_v25  ;;  %v1485_v43 = vcombine.low %v854_v2, %v858_v60  ;;  %v12300_v60 = vld [vmem:[#allocation19_spill] sm:$0xff] }
 0x158   :  { %v1486_v27 = vcombine.low %v862_v19, %v866_v57  ;;  %v7873_v13 = vpop.eup %7872  ;;  %v2180_v5 = vmul.f32 0.6931472, %v7861_v48  ;;  %v9444_v32 = vsub.f32 %v9021_v49, %v6000_v51  ;;  %v1493_v3 = vrot.slane %v1483_v34, %v8780_v25  ;;  %v9450_v34 = vpop.xlane.xlu1 %381 }
 0x159   :  { %v1500_v46 = vrot.slane %v1484_v42, %v8780_v25  ;;  %v7875_v1 = vpop.eup %7874  ;;  %v2162_v35 = vadd.f32 1.0, %v7871_v56  ;;  %v1874_v4 = vcombine.low %v1866_v53, %v1873_v37  ;;  %v1507_v38 = vrot.slane %v1485_v43, %v8780_v25  ;;  %12296 = vst [vmem:[#allocation58_spill] sm:$0xff] %v9450_v34 }
 0x15a   :  { %v1514_v16 = vrot.slane %v1486_v27, %v8780_v25  ;;  %v7877_v14 = vpop.eup %7876  ;;  %v6129_v29 = vmul.f32 0.6931472, %v7863_v45  ;;  %7878 = vpow2.f32 %v3939_v55  ;;  %v2139_v31 = vmul.f32 1.442695, %v2116_v6 }
 0x15b   :  { %v1515_v7 = vcombine.low %v1493_v3, %v1500_v46  ;;  %v2178_v48 = vmul.f32 0.6931472, %v7865_v15  ;;  %v6065_v2 = vsub.f32 0.0, %v6049_v52  ;;  %v2137_v49 = vmul.f32 1.442695, %v2115_v50  ;;  %1921 = vperm.xlu0 %7730, %v1874_v4   ;;  %v12304_v46 = vld [vmem:[#allocation66_spill] sm:$0xff] }
 0x15c   :  { %v1516_v51 = vcombine.low %v1507_v38, %v1514_v16  ;;  %v6111_v42 = vadd.f32 1.0, %v7873_v13  ;;  %v6048_v37 = vand.u32 2147483647, %v9444_v32  ;;  %7880 = vlog2.f32 %v2162_v35  ;;  %v9470_v35 = vpop.xlane.xlu0 %378  ;;  %v12305_v16 = vld [vmem:[#allocation70_spill] sm:$0xff] }
 0x15d   :  { %v1523_v43 = vrot.slane %v1515_v7, %v8780_v25  ;;  %v2161_v27 = vadd.f32 1.0, %v7875_v1  ;;  %v9458_v3 = vsub.f32 %v9450_v34, %v8906_v59  ;;  %v12297_v4 = vmin.f32 %v9213_v23, 0.0  ;;  %12301 = vst [vmem:[#allocation19_spill] sm:$0xff] %v9470_v35 }
 0x15e   :  { %v1530_v55 = vrot.slane %v1516_v51, %v8780_v25  ;;  %v12298_v15 = vmin.f32 %v9235_v39, 0.0  ;;  %7882 = vpow2.f32 %v2139_v31  ;;  %v6003_v6 = vadd.f32 %v9450_v34, %v12300_v60 }
 0x15f   :  { %v9462_v45 = vsub.f32 %v12297_v4, %v2180_v5  ;;  %v12302_v1 = vmin.f32 %v9242_v41, 0.0  ;;  %v6088_v19 = vmul.f32 1.442695, %v6065_v2  ;;  %7884 = vpow2.f32 %v2137_v49  ;;  %v12303_v5 = vld [vmem:[#allocation20_spill] sm:$0xff] }
 0x160   :  { %v9466_v50 = vsub.f32 %v12298_v15, %v6129_v29  ;;  %v1531_v57 = vcombine.low %v1523_v43, %v1530_v55  ;;  %v6127_v23 = vmul.f32 0.6931472, %v7869_v61  ;;  %7886 = vlog2.f32 %v6111_v42  ;;  %v12307_v43 = vld [vmem:[#allocation69_spill] sm:$0xff] }
 0x161   :  { %v9474_v9 = vsub.f32 %v12302_v1, %v2178_v48  ;;  %v6110_v52 = vadd.f32 1.0, %v7877_v14  ;;  %v6064_v53 = vsub.f32 0.0, %v6048_v37  ;;  %7888 = vlog2.f32 %v2161_v27 }
 0x162   :  { %12299 = vst [vmem:[#allocation18_spill] sm:$0xff] %v9466_v50  ;;  %1900 = vperm.xlu1 %7731, %v1531_v57   ;;  %v2102_v39 = vand.u32 2147483647, %v9458_v3  ;;  %v9479_v13 = vsub.f32 %v9470_v35, %v8932_v20  ;;  %v6002_v41 = vadd.f32 %v9470_v35, %v12303_v5  ;;  %v9484_v38 = vsub.f32 %v12304_v46, %v6003_v6  ;;  %v12316_v50 = vld [vmem:[#allocation25_spill] sm:$0xff] }
 0x163   :  { %v902_v61 = vrot.slane %v12305_v16, %v8752_v0  ;;  %v906_v14 = vrot.slane %v12305_v16, %v8755_v11  ;;  %v910_v29 = vrot.slane %v12305_v16, %v8758_v63  ;;  %v3922_v31 = vmin.f32 %v9379_v54, 0.0 }
 0x164   :  { %7890 = vpow2.f32 %v6088_v19  ;;  %v914_v7 = vrot.slane %v12305_v16, %v8761_v24  ;;  %v918_v48 = vrot.slane %v12305_v16, %v8765_v58  ;;  %v9497_v2 = vpop.eup %7878  ;;  %v3921_v49 = vmin.f32 %v9386_v62, 0.0  ;;  %v9511_v19 = vpop.xlane.xlu1 %387 }
 0x165   :  { %12306 = vst [vmem:[#allocation20_spill] sm:$0xff] %v9497_v2  ;;  %7892 = vlog2.f32 %v6110_v52  ;;  %v6086_v51 = vmul.f32 1.442695, %v6064_v53  ;;  %v922_v42 = vrot.slane %v12305_v16, %v8768_v30  ;;  %v2101_v37 = vand.u32 2147483647, %v9479_v13  ;;  %12308 = vst [vmem:[#allocation66_spill] sm:$0xff] %v9511_v19 }
 0x166   :  { %v9504_v27 = vsub.f32 %v12307_v43, %v6002_v41  ;;  %v926_v55 = vrot.slane %v12305_v16, %v8772_v12  ;;  %v930_v4 = vrot.slane %v12305_v16, %v8777_v22  ;;  %v2118_v15 = vsub.f32 0.0, %v2102_v39  ;;  %v7881_v57 = vpop.eup %7880 }
 0x167   :  { %v6051_v60 = vand.u32 2147483647, %v9484_v38  ;;  %v1581_v6 = vcombine.low %v902_v61, %v906_v14  ;;  %v1582_v1 = vcombine.low %v910_v29, %v914_v7  ;;  %v12309_v52 = vmin.f32 %v9250_v40, 0.0 }
 0x168   :  { %v1583_v5 = vcombine.low %v918_v48, %v922_v42  ;;  %v1584_v41 = vcombine.low %v926_v55, %v930_v4  ;;  %v9519_v46 = vsub.f32 %v9511_v19, %v8940_v21  ;;  %v7883_v43 = vpop.eup %7882  ;;  %v3945_v16 = vmul.f32 1.442695, %v3922_v31 }
 0x169   :  { %v9515_v53 = vsub.f32 %v12309_v52, %v6127_v23  ;;  %v3943_v39 = vmul.f32 1.442695, %v3921_v49  ;;  %v1591_v56 = vrot.slane %v1581_v6, %v8780_v25  ;;  %v1598_v61 = vrot.slane %v1582_v1, %v8780_v25  ;;  %v7885_v14 = vpop.eup %7884 }
 0x16a   :  { %v2117_v29 = vsub.f32 0.0, %v2101_v37  ;;  %v6050_v7 = vand.u32 2147483647, %v9504_v27  ;;  %v1605_v40 = vrot.slane %v1583_v5, %v8780_v25  ;;  %v1612_v23 = vrot.slane %v1584_v41, %v8780_v25  ;;  %v7887_v48 = vpop.eup %7886 }
 0x16b   :  { %12310 = vst [vmem:[#allocation70_spill] sm:$0xff] %v9515_v53  ;;  %7894 = vpow2.f32 %v6086_v51  ;;  %v2143_v42 = vmul.f32 1.442695, %v2118_v15  ;;  %v6067_v55 = vsub.f32 0.0, %v6051_v60  ;;  %v1613_v4 = vcombine.low %v1591_v56, %v1598_v61  ;;  %v7889_v52 = vpop.eup %7888 }
 0x16c   :  { %v2164_v49 = vadd.f32 1.0, %v7883_v43  ;;  %v1614_v6 = vcombine.low %v1605_v40, %v1612_v23  ;;  %v2104_v1 = vand.u32 2147483647, %v9519_v46  ;;  %7896 = vpow2.f32 %v3945_v16  ;;  %v9532_v40 = vpop.xlane.xlu0 %384 }
 0x16d   :  { %v2163_v21 = vadd.f32 1.0, %v7885_v14  ;;  %v1621_v5 = vrot.slane %v1613_v4, %v8780_v25  ;;  %7898 = vpow2.f32 %v3943_v39  ;;  %v2141_v41 = vmul.f32 1.442695, %v2117_v29  ;;  %12311 = vst [vmem:[#allocation69_spill] sm:$0xff] %v9532_v40  ;;  %v12312_v14 = vld [vmem:[#allocation21_spill] sm:$0xff] }
 0x16e   :  { %v7891_v59 = vpop.eup %7890  ;;  %v6066_v51 = vsub.f32 0.0, %v6050_v7  ;;  %v1628_v15 = vrot.slane %v1614_v6, %v8780_v25  ;;  %v2184_v60 = vmul.f32 0.6931472, %v7881_v57  ;;  %7900 = vpow2.f32 %v2143_v42 }
 0x16f   :  { %v7893_v56 = vpop.eup %7892  ;;  %v6092_v43 = vmul.f32 1.442695, %v6067_v55  ;;  %7902 = vlog2.f32 %v2164_v49  ;;  %v2120_v23 = vsub.f32 0.0, %v2104_v1  ;;  %v6005_v4 = vadd.f32 %v9511_v19, %v12312_v14 }
 0x170   :  { %v1629_v16 = vcombine.low %v1621_v5, %v1628_v15  ;;  %v6133_v37 = vmul.f32 0.6931472, %v7887_v48  ;;  %v6113_v39 = vadd.f32 1.0, %v7891_v59  ;;  %7904 = vlog2.f32 %v2163_v21  ;;  %v12313_v5 = vld [vmem:[#allocation22_spill] sm:$0xff] }
 0x171   :  { %v2182_v7 = vmul.f32 0.6931472, %v7889_v52  ;;  %7906 = vpow2.f32 %v2141_v41  ;;  %v6090_v57 = vmul.f32 1.442695, %v6066_v51  ;;  %v9539_v42 = vsub.f32 %v9532_v40, %v8968_v44 }
 0x172   :  { %1906 = vperm.xlu1 %7731, %v1629_v16   ;;  %v6131_v55 = vmul.f32 0.6931472, %v7893_v56  ;;  %7908 = vpow2.f32 %v6092_v43  ;;  %v966_v49 = vrot.slane %v9145_v8, %v8752_v0  ;;  %v970_v48 = vrot.slane %v9145_v8, %v8755_v11 }
 0x173   :  { %v2147_v59 = vmul.f32 1.442695, %v2120_v23  ;;  %v9546_v21 = vsub.f32 %v9163_v26, %v6005_v4  ;;  %v974_v52 = vrot.slane %v9145_v8, %v8758_v63  ;;  %v978_v6 = vrot.slane %v9145_v8, %v8761_v24 }
 0x174   :  { %7910 = vlog2.f32 %v6113_v39  ;;  %v6004_v41 = vadd.f32 %v9532_v40, %v12313_v5  ;;  %v982_v51 = vrot.slane %v9145_v8, %v8765_v58  ;;  %v986_v15 = vrot.slane %v9145_v8, %v8768_v30 }
 0x175   :  { %v7895_v1 = vpop.eup %7894  ;;  %v3924_v26 = vmin.f32 %v9450_v34, 0.0  ;;  %7912 = vpow2.f32 %v6090_v57  ;;  %v2103_v56 = vand.u32 2147483647, %v9539_v42  ;;  %v990_v43 = vrot.slane %v9145_v8, %v8772_v12 }
 0x176   :  { %v9562_v16 = vpop.eup %7896  ;;  %v3923_v23 = vmin.f32 %v9470_v35, 0.0  ;;  %v994_v14 = vrot.slane %v9145_v8, %v8777_v22  ;;  %v1679_v4 = vcombine.low %v966_v49, %v970_v48  ;;  %v1680_v39 = vcombine.low %v974_v52, %v978_v6 }
 0x177   :  { %12314 = vst [vmem:[#allocation21_spill] sm:$0xff] %v9562_v16  ;;  %v9567_v5 = vpop.eup %7898  ;;  %v6112_v29 = vadd.f32 1.0, %v7895_v1  ;;  %7914 = vpow2.f32 %v2147_v59  ;;  %v6053_v57 = vand.u32 2147483647, %v9546_v21  ;;  %v1681_v61 = vcombine.low %v982_v51, %v986_v15 }
 0x178   :  { %12315 = vst [vmem:[#allocation22_spill] sm:$0xff] %v9567_v5  ;;  %v7901_v31 = vpop.eup %7900  ;;  %v9571_v53 = vsub.f32 %v12316_v50, %v6004_v41  ;;  %v1682_v44 = vcombine.low %v990_v43, %v994_v14  ;;  %v1689_v20 = vrot.slane %v1679_v4, %v8780_v25  ;;  %v1696_v2 = vrot.slane %v1680_v39, %v8780_v25 }
 0x179   :  { %v7903_v34 = vpop.eup %7902  ;;  %v12317_v8 = vmin.f32 %v9305_v36, 0.0  ;;  %v12319_v48 = vmin.f32 %v9330_v17, 0.0  ;;  %v2119_v52 = vsub.f32 0.0, %v2103_v56  ;;  %v1703_v6 = vrot.slane %v1681_v61, %v8780_v25 }
 0x17a   :  { %v7905_v1 = vpop.eup %7904  ;;  %v12321_v50 = vmin.f32 %v9338_v33, 0.0  ;;  %v3949_v51 = vmul.f32 1.442695, %v3924_v26  ;;  %v1710_v15 = vrot.slane %v1682_v44, %v8780_v25  ;;  %v1711_v43 = vcombine.low %v1689_v20, %v1696_v2 }
 0x17b   :  { %v9577_v49 = vsub.f32 %v12317_v8, %v2184_v60  ;;  %v9581_v59 = vsub.f32 %v12319_v48, %v6133_v37  ;;  %v7907_v14 = vpop.eup %7906  ;;  %v12322_v36 = vmin.f32 %v9348_v18, 0.0  ;;  %7916 = vlog2.f32 %v6112_v29 }
 0x17c   :  { %v9586_v41 = vsub.f32 %v12321_v50, %v2182_v7  ;;  %v2166_v17 = vadd.f32 1.0, %v7901_v31  ;;  %v3947_v37 = vmul.f32 1.442695, %v3923_v23  ;;  %v7909_v56 = vpop.eup %7908  ;;  %v6069_v4 = vsub.f32 0.0, %v6053_v57  ;;  %v9595_v7 = vpop.xlane.xlu1 %393 }
 0x17d   :  { %12318 = vst [vmem:[#allocation25_spill] sm:$0xff] %v9577_v49  ;;  %12320 = vst [vmem:[#allocation83_spill] sm:$0xff] %v9581_v59  ;;  %v9591_v60 = vsub.f32 %v12322_v36, %v6131_v55  ;;  %v6052_v61 = vand.u32 2147483647, %v9571_v53  ;;  %v1712_v39 = vcombine.low %v1703_v6, %v1710_v15  ;;  %v1719_v33 = vrot.slane %v1711_v43, %v8780_v25  ;;  %v12325_v55 = vld [vmem:[#allocation61_spill] sm:$0xff]  ;;  %v12326_v6 = vld [vmem:[#allocation23_spill] sm:$0xff] }
 0x17e   :  { %12324 = vst [vmem:[#allocation85_spill] sm:$0xff] %v9595_v7  ;;  %v2188_v26 = vmul.f32 0.6931472, %v7903_v34  ;;  %v2145_v18 = vmul.f32 1.442695, %v2119_v52  ;;  %v7911_v2 = vpop.eup %7910  ;;  %7918 = vpow2.f32 %v3949_v51  ;;  %v2165_v29 = vadd.f32 1.0, %v7907_v14 }
 0x17f   :  { %12323 = vst [vmem:[#allocation84_spill] sm:$0xff] %v9591_v60  ;;  %v1726_v31 = vrot.slane %v1712_v39, %v8780_v25  ;;  %v9602_v23 = vsub.f32 %v9595_v7, %v12325_v55  ;;  %v7913_v57 = vpop.eup %7912  ;;  %v2186_v8 = vmul.f32 0.6931472, %v7905_v1  ;;  %v6115_v48 = vadd.f32 1.0, %v7909_v56 }
 0x180   :  { %7920 = vpow2.f32 %v3947_v37  ;;  %v6007_v34 = vadd.f32 %v9595_v7, %v12326_v6  ;;  %v6096_v50 = vmul.f32 1.442695, %v6069_v4  ;;  %v6068_v15 = vsub.f32 0.0, %v6052_v61  ;;  %v9616_v61 = vpop.xlane.xlu0 %390 }
 0x181   :  { %7922 = vlog2.f32 %v2166_v17  ;;  %v1727_v52 = vcombine.low %v1719_v33, %v1726_v31  ;;  %v7915_v43 = vpop.eup %7914  ;;  %v12327_v51 = vmin.f32 %v9392_v28, 0.0  ;;  %v6137_v1 = vmul.f32 0.6931472, %v7911_v2  ;;  %v12329_v17 = vld [vmem:[#allocation29_spill] sm:$0xff]  ;;  %v12331_v28 = vld [vmem:[#allocation42_spill] sm:$0xff] }
 0x182   :  { %7924 = vpow2.f32 %v2145_v18  ;;  %v6114_v37 = vadd.f32 1.0, %v7913_v57  ;;  %v2106_v56 = vand.u32 2147483647, %v9602_v23  ;;  %v9614_v4 = vsub.f32 %v12329_v17, %v6007_v34  ;;  %12330 = vst [vmem:[#allocation29_spill] sm:$0xff] %v9616_v61 }
 0x183   :  { %v9608_v14 = vsub.f32 %v12327_v51, %v2188_v26  ;;  %7926 = vlog2.f32 %v2165_v29  ;;  %1912 = vperm.xlu1 %7731, %v1727_v52   ;;  %v1030_v33 = vrot.slane %v12331_v28, %v8752_v0  ;;  %v1034_v26 = vrot.slane %v12331_v28, %v8755_v11 }
 0x184   :  { %7928 = vlog2.f32 %v6115_v48  ;;  %v12332_v18 = vmin.f32 %v9407_v10, 0.0  ;;  %v6094_v29 = vmul.f32 1.442695, %v6068_v15  ;;  %v1038_v31 = vrot.slane %v12331_v28, %v8758_v63 }
 0x185   :  { %12328 = vst [vmem:[#allocation23_spill] sm:$0xff] %v9608_v14  ;;  %7930 = vpow2.f32 %v6096_v50  ;;  %v7917_v57 = vpop.eup %7916  ;;  %v2168_v48 = vadd.f32 1.0, %v7915_v43  ;;  %v1042_v6 = vrot.slane %v12331_v28, %v8761_v24  ;;  %v1046_v34 = vrot.slane %v12331_v28, %v8765_v58  ;;  %v12333_v50 = vld [vmem:[#allocation62_spill] sm:$0xff] }
 0x186   :  { %v9624_v2 = vsub.f32 %v12332_v18, %v2186_v8  ;;  %v1050_v52 = vrot.slane %v12331_v28, %v8768_v30  ;;  %7932 = vlog2.f32 %v6114_v37  ;;  %v3926_v10 = vmin.f32 %v9511_v19, 0.0 }
 0x187   :  { %v2122_v8 = vsub.f32 0.0, %v2106_v56  ;;  %v9637_v15 = vsub.f32 %v9616_v61, %v12333_v50  ;;  %v6055_v51 = vand.u32 2147483647, %v9614_v4  ;;  %v1054_v43 = vrot.slane %v12331_v28, %v8772_v12 }
 0x188   :  { %v1058_v17 = vrot.slane %v12331_v28, %v8777_v22  ;;  %v1777_v18 = vcombine.low %v1030_v33, %v1034_v26  ;;  %v9644_v39 = vpop.eup %7918  ;;  %v6135_v36 = vmul.f32 0.6931472, %v7917_v57  ;;  %v3925_v37 = vmin.f32 %v9532_v40, 0.0 }
 0x189   :  { %12334 = vst [vmem:[#allocation42_spill] sm:$0xff] %v9644_v39  ;;  %7934 = vpow2.f32 %v6094_v29  ;;  %v1778_v56 = vcombine.low %v1038_v31, %v1042_v6  ;;  %v1779_v20 = vcombine.low %v1046_v34, %v1050_v52  ;;  %v3953_v50 = vmul.f32 1.442695, %v3926_v10  ;;  %v12336_v39 = vld [vmem:[#allocation24_spill] sm:$0xff]  ;;  %v12341_v10 = vld [vmem:[#allocation30_spill] sm:$0xff] }
 0x18a   :  { %v9647_v44 = vpop.eup %7920  ;;  %7936 = vlog2.f32 %v2168_v48  ;;  %v1780_v59 = vcombine.low %v1054_v43, %v1058_v17  ;;  %v1787_v55 = vrot.slane %v1777_v18, %v8780_v25  ;;  %v2151_v19 = vmul.f32 1.442695, %v2122_v8 }
 0x18b   :  { %12335 = vst [vmem:[#allocation86_spill] sm:$0xff] %v9647_v44  ;;  %v7923_v60 = vpop.eup %7922  ;;  %v2105_v28 = vand.u32 2147483647, %v9637_v15  ;;  %v1794_v33 = vrot.slane %v1778_v56, %v8780_v25  ;;  %v6071_v57 = vsub.f32 0.0, %v6055_v51  ;;  %v6006_v29 = vadd.f32 %v9616_v61, %v12336_v39 }
 0x18c   :  { %v7925_v26 = vpop.eup %7924  ;;  %v1801_v31 = vrot.slane %v1779_v20, %v8780_v25  ;;  %v1808_v48 = vrot.slane %v1780_v59, %v8780_v25  ;;  %v12337_v34 = vmin.f32 %v9413_v47, 0.0  ;;  %v3928_v8 = vmin.f32 %v9595_v7, 0.0 }
 0x18d   :  { %v7927_v6 = vpop.eup %7926  ;;  %v1809_v43 = vcombine.low %v1787_v55, %v1794_v33  ;;  %v12339_v51 = vmin.f32 %v9444_v32, 0.0  ;;  %v3951_v20 = vmul.f32 1.442695, %v3925_v37  ;;  %7938 = vpow2.f32 %v3953_v50 }
 0x18e   :  { %v9658_v52 = vsub.f32 %v12337_v34, %v6137_v1  ;;  %v7929_v17 = vpop.eup %7928  ;;  %v1810_v56 = vcombine.low %v1801_v31, %v1808_v48  ;;  %v2167_v40 = vadd.f32 1.0, %v7925_v26  ;;  %v2121_v47 = vsub.f32 0.0, %v2105_v28 }
 0x18f   :  { %v9664_v18 = vsub.f32 %v12339_v51, %v6135_v36  ;;  %v7931_v59 = vpop.eup %7930  ;;  %v1817_v1 = vrot.slane %v1809_v43, %v8780_v25  ;;  %7940 = vpow2.f32 %v2151_v19  ;;  %v6100_v34 = vmul.f32 1.442695, %v6071_v57  ;;  %v12344_v43 = vld [vmem:[#allocation63_spill] sm:$0xff] }
 0x190   :  { %12338 = vst [vmem:[#allocation24_spill] sm:$0xff] %v9658_v52  ;;  %v9669_v52 = vsub.f32 %v12341_v10, %v6006_v29  ;;  %v1824_v55 = vrot.slane %v1810_v56, %v8780_v25  ;;  %v7933_v32 = vpop.eup %7932  ;;  %v2192_v36 = vmul.f32 0.6931472, %v7923_v60  ;;  %v3957_v51 = vmul.f32 1.442695, %v3928_v8  ;;  %v9675_v29 = vpop.xlane.xlu1 %399 }
 0x191   :  { %12340 = vst [vmem:[#allocation87_spill] sm:$0xff] %v9664_v18  ;;  %v3927_v37 = vmin.f32 %v9616_v61, 0.0  ;;  %v2190_v31 = vmul.f32 0.6931472, %v7927_v6  ;;  %v6117_v50 = vadd.f32 1.0, %v7931_v59  ;;  %7942 = vpow2.f32 %v3951_v20  ;;  %12343 = vst [vmem:[#allocation88_spill] sm:$0xff] %v9675_v29 }
 0x192   :  { %12342 = vst [vmem:[#allocation30_spill] sm:$0xff] %v9669_v52  ;;  %v1825_v28 = vcombine.low %v1817_v1, %v1824_v55  ;;  %v6141_v48 = vmul.f32 0.6931472, %v7929_v17  ;;  %7944 = vlog2.f32 %v2167_v40  ;;  %v2149_v57 = vmul.f32 1.442695, %v2121_v47 }
 0x193   :  { %v7935_v26 = vpop.eup %7934  ;;  %7946 = vpow2.f32 %v6100_v34  ;;  %v6054_v8 = vand.u32 2147483647, %v9669_v52  ;;  %v9681_v6 = vsub.f32 %v9675_v29, %v12344_v43  ;;  %v12345_v20 = vmin.f32 %v9458_v3, 0.0  ;;  %v12348_v34 = vld [vmem:[#allocation26_spill] sm:$0xff] }
 0x194   :  { %v7937_v10 = vpop.eup %7936  ;;  %1918 = vperm.xlu1 %7731, %v1825_v28   ;;  %v6139_v40 = vmul.f32 0.6931472, %v7933_v32  ;;  %7948 = vpow2.f32 %v3957_v51  ;;  %v3955_v56 = vmul.f32 1.442695, %v3927_v37  ;;  %v12347_v59 = vmin.f32 %v9479_v13, 0.0  ;;  %v12351_v51 = vld [vmem:[#allocation79_spill] sm:$0xff] }
 0x195   :  { %v9685_v17 = vsub.f32 %v12345_v20, %v2192_v36  ;;  %7950 = vlog2.f32 %v6117_v50  ;;  %v6116_v1 = vadd.f32 1.0, %v7935_v26  ;;  %v6009_v55 = vadd.f32 %v9675_v29, %v12348_v34  ;;  %v9702_v13 = vld [vmem:[%s11967_s6] ss:$0 sm:$0xff]  ;;  %v12355_v20 = vld [vmem:[#allocation7_spill] sm:$0xff]  ;;  %v9726_v34 = vpop.xlane.xlu0 %396 }
 0x196   :  { %v9689_v47 = vsub.f32 %v12347_v59, %v2190_v31  ;;  %v12349_v28 = vmin.f32 %v9484_v38, 0.0  ;;  %v2196_v19 = vmul.f32 0.6931472, %v7937_v10  ;;  %7952 = vpow2.f32 %v2149_v57  ;;  %v9719_v57 = vld [vmem:[%s11968_s7] ss:$0 sm:$0xff] }
 0x197   :  { %12346 = vst [vmem:[#allocation89_spill] sm:$0xff] %v9685_v17  ;;  %v6070_v32 = vsub.f32 0.0, %v6054_v8  ;;  %v2108_v36 = vand.u32 2147483647, %v9681_v6  ;;  %v2240_v37 = vrot.slane %v12351_v51, %v8752_v0  ;;  %v2244_v38 = vrot.slane %v12351_v51, %v8755_v11  ;;  %v9709_v31 = vpop.eup %7938 }
 0x198   :  { %v9695_v60 = vsub.f32 %v12349_v28, %v6141_v48  ;;  %3805 = vbcast.lane.b32.xlu1 %v9702_v13, 288  ;;  %12352 = vst [vmem:[#allocation79_spill] sm:$0xff] %v9709_v31  ;;  %v12353_v50 = vmin.f32 %v9504_v27, 0.0  ;;  %7954 = vpow2.f32 %v3955_v56  ;;  %v2248_v10 = vrot.slane %v12351_v51, %v8758_v63 }
 0x199   :  { %v7941_v8 = vpop.eup %7940  ;;  %7956 = vlog2.f32 %v6116_v1  ;;  %v9724_v59 = vsub.f32 %v12355_v20, %v6009_v55  ;;  %v2252_v27 = vrot.slane %v12351_v51, %v8761_v24  ;;  %v12356_v56 = vmin.f32 %v9519_v46, 0.0 }
 0x19a   :  { %12350 = vst [vmem:[#allocation26_spill] sm:$0xff] %v9695_v60  ;;  %v9713_v26 = vsub.f32 %v12353_v50, %v6139_v40  ;;  %v2256_v40 = vrot.slane %v12351_v51, %v8765_v58  ;;  %v2260_v50 = vrot.slane %v12351_v51, %v8768_v30  ;;  %v2264_v1 = vrot.slane %v12351_v51, %v8772_v12 }
 0x19b   :  { %v9734_v28 = vsub.f32 %v12356_v56, %v2196_v19  ;;  %v2268_v55 = vrot.slane %v12351_v51, %v8777_v22  ;;  %v9742_v20 = vpop.eup %7942  ;;  %v6098_v48 = vmul.f32 1.442695, %v6070_v32  ;;  %v2124_v3 = vsub.f32 0.0, %v2108_v36  ;;  %v12359_v56 = vld [vmem:[#allocation67_spill] sm:$0xff] }
 0x19c   :  { %12354 = vst [vmem:[#allocation90_spill] sm:$0xff] %v9713_v26  ;;  %12358 = vst [vmem:[#allocation91_spill] sm:$0xff] %v9742_v20  ;;  %4010 = vbcast.lane.b32.xlu1 %v9719_v57, 304  ;;  %v2749_v33 = vcombine.low %v2240_v37, %v2244_v38  ;;  %v2750_v39 = vcombine.low %v2248_v10, %v2252_v27  ;;  %v7945_v46 = vpop.eup %7944  ;;  %v2170_v19 = vadd.f32 1.0, %v7941_v8  ;;  %v6057_v43 = vand.u32 2147483647, %v9724_v59 }
 0x19d   :  { %12357 = vst [vmem:[#allocation7_spill] sm:$0xff] %v9734_v28  ;;  %v9747_v52 = vsub.f32 %v9726_v34, %v12359_v56  ;;  %v2751_v28 = vcombine.low %v2256_v40, %v2260_v50  ;;  %v2752_v60 = vcombine.low %v2264_v1, %v2268_v55  ;;  %v7947_v26 = vpop.eup %7946  ;;  %v12361_v51 = vld [vmem:[#allocation27_spill] sm:$0xff]  ;;  %v9762_v50 = vmul.f32 0.6931472, %v7945_v46 }
 0x19e   :  { %v6008_v18 = vadd.f32 %v9726_v34, %v12361_v51  ;;  %v2759_v32 = vrot.slane %v2749_v33, %v8780_v25  ;;  %v2766_v36 = vrot.slane %v2750_v39, %v8780_v25  ;;  %v9754_v37 = vpop.eup %7948  ;;  %7958 = vpow2.f32 %v6098_v48  ;;  %v12363_v56 = vld [vmem:[#allocation11_spill] sm:$0xff] }
 0x19f   :  { %12360 = vst [vmem:[#allocation92_spill] sm:$0xff] %v9747_v52  ;;  %12362 = vst [vmem:[#allocation27_spill] sm:$0xff] %v9754_v37  ;;  %v2773_v8 = vrot.slane %v2751_v28, %v8780_v25  ;;  %v2780_v27 = vrot.slane %v2752_v60, %v8780_v25  ;;  %v9760_v40 = vpop.eup %7950  ;;  %v2155_v1 = vmul.f32 1.442695, %v2124_v3  ;;  %7960 = vlog2.f32 %v2170_v19 }
 0x1a0   :  { %4014 = vbcast.lane.b32.xlu1 %v9719_v57, 312  ;;  %v2781_v33 = vcombine.low %v2759_v32, %v2766_v36  ;;  %v7953_v39 = vpop.eup %7952  ;;  %v6119_v55 = vadd.f32 1.0, %v7947_v26  ;;  %v2107_v51 = vand.u32 2147483647, %v9747_v52  ;;  %v6073_v10 = vsub.f32 0.0, %v6057_v43 }
 0x1a1   :  { %v2782_v38 = vcombine.low %v2773_v8, %v2780_v27  ;;  %v9767_v28 = vsub.f32 %v12363_v56, %v6008_v18  ;;  %v2304_v46 = vrot.slane %v9474_v9, %v8752_v0  ;;  %v2308_v19 = vrot.slane %v9474_v9, %v8755_v11 }
 0x1a2   :  { %v2789_v60 = vrot.slane %v2781_v33, %v8780_v25  ;;  %v9772_v48 = vpop.eup %7954  ;;  %v2312_v26 = vrot.slane %v9474_v9, %v8758_v63  ;;  %v2316_v43 = vrot.slane %v9474_v9, %v8761_v24  ;;  %v2169_v56 = vadd.f32 1.0, %v7953_v39 }
 0x1a3   :  { %12364 = vst [vmem:[#allocation11_spill] sm:$0xff] %v9767_v28  ;;  %12365 = vst [vmem:[#allocation93_spill] sm:$0xff] %v9772_v48  ;;  %v2796_v3 = vrot.slane %v2782_v38, %v8780_v25  ;;  %v9781_v18 = vpop.eup %7956  ;;  %7962 = vpow2.f32 %v2155_v1  ;;  %v2320_v32 = vrot.slane %v9474_v9, %v8765_v58  ;;  %v2324_v36 = vrot.slane %v9474_v9, %v8768_v30 }
 0x1a4   :  { %4018 = vbcast.lane.b32.xlu1 %v9719_v57, 320  ;;  %v2328_v8 = vrot.slane %v9474_v9, %v8772_v12  ;;  %v2332_v27 = vrot.slane %v9474_v9, %v8777_v22  ;;  %v2368_v33 = vrot.slane %v9586_v41, %v8752_v0  ;;  %v6104_v39 = vmul.f32 1.442695, %v6073_v10  ;;  %v9801_v9 = vpop.permute.xlu1 %1879 }
 0x1a5   :  { %v2797_v38 = vcombine.low %v2789_v60, %v2796_v3  ;;  %v2123_v1 = vsub.f32 0.0, %v2107_v51  ;;  %v6056_v52 = vand.u32 2147483647, %v9767_v28  ;;  %v2372_v37 = vrot.slane %v9586_v41, %v8755_v11 }
 0x1a6   :  { %v2847_v48 = vcombine.low %v2304_v46, %v2308_v19  ;;  %v2848_v31 = vcombine.low %v2312_v26, %v2316_v43  ;;  %v2376_v60 = vrot.slane %v9586_v41, %v8758_v63  ;;  %v2380_v3 = vrot.slane %v9586_v41, %v8761_v24 }
 0x1a7   :  { %3534 = vperm.xlu0 %7730, %v2797_v38   ;;  %v2849_v10 = vcombine.low %v2320_v32, %v2324_v36  ;;  %v2384_v51 = vrot.slane %v9586_v41, %v8765_v58  ;;  %v2388_v28 = vrot.slane %v9586_v41, %v8768_v30  ;;  %v2392_v46 = vrot.slane %v9586_v41, %v8772_v12 }
 0x1a8   :  { %4022 = vbcast.lane.b32.xlu1 %v9719_v57, 328  ;;  %7964 = vlog2.f32 %v6119_v55  ;;  %v2850_v19 = vcombine.low %v2328_v8, %v2332_v27  ;;  %v2396_v26 = vrot.slane %v9586_v41, %v8777_v22  ;;  %v2945_v43 = vcombine.low %v2368_v33, %v2372_v37  ;;  %v9812_v38 = vpop.eup %7958 }
 0x1a9   :  { %7966 = vpow2.f32 %v6104_v39  ;;  %v2153_v20 = vmul.f32 1.442695, %v2123_v1  ;;  %v6072_v32 = vsub.f32 0.0, %v6056_v52  ;;  %v2946_v36 = vcombine.low %v2376_v60, %v2380_v3  ;;  %v9814_v7 = vpop.eup %7960  ;;  %v9833_v60 = vpop.permute.xlu1 %1882 }
 0x1aa   :  { %v2947_v61 = vcombine.low %v2384_v51, %v2388_v28  ;;  %v2948_v44 = vcombine.low %v2392_v46, %v2396_v26  ;;  %v2432_v55 = vrot.slane %v9624_v2, %v8752_v0  ;;  %v2436_v8 = vrot.slane %v9624_v2, %v8755_v11 }
 0x1ab   :  { %3793 = vbcast.lane.b32.xlu0 %v9702_v13, 264  ;;  %v2857_v41 = vrot.slane %v2847_v48, %v8780_v25  ;;  %v2864_v37 = vrot.slane %v2848_v31, %v8780_v25  ;;  %v2871_v52 = vrot.slane %v2849_v10, %v8780_v25  ;;  %v2440_v27 = vrot.slane %v9624_v2, %v8758_v63 }
 0x1ac   :  { %4026 = vbcast.lane.b32.xlu1 %v9719_v57, 336  ;;  %v2878_v28 = vrot.slane %v2850_v19, %v8780_v25  ;;  %v2955_v33 = vrot.slane %v2945_v43, %v8780_v25  ;;  %v2444_v39 = vrot.slane %v9624_v2, %v8761_v24  ;;  %v2448_v1 = vrot.slane %v9624_v2, %v8765_v58 }
 0x1ad   :  { %v7963_v48 = vpop.eup %7962  ;;  %v2962_v31 = vrot.slane %v2946_v36, %v8780_v25  ;;  %v2452_v3 = vrot.slane %v9624_v2, %v8768_v30  ;;  %v2456_v10 = vrot.slane %v9624_v2, %v8772_v12  ;;  %v2460_v51 = vrot.slane %v9624_v2, %v8777_v22 }
 0x1ae   :  { %v2969_v46 = vrot.slane %v2947_v61, %v8780_v25  ;;  %v2976_v19 = vrot.slane %v2948_v44, %v8780_v25  ;;  %v3043_v26 = vcombine.low %v2432_v55, %v2436_v8  ;;  %v3044_v43 = vcombine.low %v2440_v27, %v2444_v39 }
 0x1af   :  { %3986 = vbcast.lane.b32.xlu0 %v9719_v57, 256  ;;  %v12366_v36 = vmin.f32 %v9539_v42, 0.0  ;;  %7968 = vlog2.f32 %v2169_v56  ;;  %v12367_v5 = vmin.f32 %v9675_v29, 0.0  ;;  %v3045_v2 = vcombine.low %v2448_v1, %v2452_v3 }
 0x1b0   :  { %4030 = vbcast.lane.b32.xlu1 %v9719_v57, 344  ;;  %v2172_v54 = vadd.f32 1.0, %v7963_v48  ;;  %7970 = vpow2.f32 %v2153_v20  ;;  %v6102_v61 = vmul.f32 1.442695, %v6072_v32  ;;  %v3046_v62 = vcombine.low %v2456_v10, %v2460_v51  ;;  %v9864_v32 = vpop.permute.xlu1 %1885 }
 0x1b1   :  { %v9848_v16 = vsub.f32 %v12366_v36, %v9762_v50  ;;  %v9852_v35 = vmul.f32 1.442695, %v12367_v5  ;;  %v2879_v44 = vcombine.low %v2857_v41, %v2864_v37  ;;  %v2880_v55 = vcombine.low %v2871_v52, %v2878_v28  ;;  %v9891_v36 = vpop.permute.xlu0 %3789 }
 0x1b2   :  { %v2977_v8 = vcombine.low %v2955_v33, %v2962_v31  ;;  %v2496_v42 = vrot.slane %v9689_v47, %v8752_v0  ;;  %v9857_v50 = vpop.eup %7964  ;;  %v2978_v56 = vcombine.low %v2969_v46, %v2976_v19  ;;  %v3053_v5 = vrot.slane %v3043_v26, %v8780_v25 }
 0x1b3   :  { %3990 = vbcast.lane.b32.xlu0 %v9719_v57, 264  ;;  %v3060_v27 = vrot.slane %v3044_v43, %v8780_v25  ;;  %v2500_v20 = vrot.slane %v9689_v47, %v8755_v11  ;;  %v7967_v41 = vpop.eup %7966  ;;  %v3067_v37 = vrot.slane %v3045_v2, %v8780_v25  ;;  %v2504_v52 = vrot.slane %v9689_v47, %v8758_v63 }
 0x1b4   :  { %4034 = vbcast.lane.b32.xlu1 %v9719_v57, 352  ;;  %v2508_v28 = vrot.slane %v9689_v47, %v8761_v24  ;;  %v2512_v33 = vrot.slane %v9689_v47, %v8765_v58  ;;  %v3074_v39 = vrot.slane %v3046_v62, %v8780_v25  ;;  %v2516_v1 = vrot.slane %v9689_v47, %v8768_v30 }
 0x1b5   :  { %v2520_v48 = vrot.slane %v9689_v47, %v8772_v12  ;;  %v2524_v31 = vrot.slane %v9689_v47, %v8777_v22  ;;  %v9882_v3 = vmul.f32 0.6931472, %v9760_v40  ;;  %7972 = vpow2.f32 %v6102_v61  ;;  %v1877_v29 = vpop.permute.xlu0 %1876 }
 0x1b6   :  { %v3141_v10 = vcombine.low %v2496_v42, %v2500_v20  ;;  %v3142_v51 = vcombine.low %v2504_v52, %v2508_v28  ;;  %7974 = vlog2.f32 %v2172_v54  ;;  %v3143_v62 = vcombine.low %v2512_v33, %v2516_v1  ;;  %v9901_v20 = vpop.permute.xlu1 %1888 }
 0x1b7   :  { %3797 = vbcast.lane.b32.xlu0 %v9702_v13, 272  ;;  %v3144_v19 = vcombine.low %v2520_v48, %v2524_v31  ;;  %v2887_v26 = vrot.slane %v2879_v44, %v8780_v25  ;;  %v2894_v43 = vrot.slane %v2880_v55, %v8780_v25  ;;  %v2985_v47 = vrot.slane %v2977_v8, %v8780_v25 }
 0x1b8   :  { %4038 = vbcast.lane.b32.xlu1 %v9719_v57, 360  ;;  %v2992_v40 = vrot.slane %v2978_v56, %v8780_v25  ;;  %v9893_v2 = vcombine.low %v3053_v5, %v3060_v27  ;;  %v9895_v54 = vcombine.low %v3067_v37, %v3074_v39  ;;  %v2560_v61 = vrot.slane %v9848_v16, %v8752_v0 }
 0x1b9   :  { %v2564_v42 = vrot.slane %v9848_v16, %v8755_v11  ;;  %v9903_v44 = vpop.eup %7968  ;;  %v3151_v55 = vrot.slane %v3141_v10, %v8780_v25  ;;  %v3158_v8 = vrot.slane %v3142_v51, %v8780_v25  ;;  %v3165_v56 = vrot.slane %v3143_v62, %v8780_v25 }
 0x1ba   :  { %v3172_v5 = vrot.slane %v3144_v19, %v8780_v25  ;;  %v9909_v27 = vpop.eup %7970  ;;  %v2568_v37 = vrot.slane %v9848_v16, %v8758_v63  ;;  %v2572_v52 = vrot.slane %v9848_v16, %v8761_v24  ;;  %v2576_v28 = vrot.slane %v9848_v16, %v8765_v58 }
 0x1bb   :  { %3994 = vbcast.lane.b32.xlu0 %v9719_v57, 272  ;;  %v2580_v33 = vrot.slane %v9848_v16, %v8768_v30  ;;  %v6121_v39 = vadd.f32 1.0, %v7967_v41  ;;  %v2895_v1 = vcombine.low %v2887_v26, %v2894_v43  ;;  %v2993_v48 = vcombine.low %v2985_v47, %v2992_v40  ;;  %v12369_v43 = vld [vmem:[#allocation28_spill] sm:$0xff] }
 0x1bc   :  { %4042 = vbcast.lane.b32.xlu1 %v9719_v57, 368  ;;  %v12368_v31 = vlaneseq  ;;  %v3083_v51 = vrot.slane %v9893_v2, %v8780_v25  ;;  %v2584_v62 = vrot.slane %v9848_v16, %v8772_v12  ;;  %v2588_v19 = vrot.slane %v9848_v16, %v8777_v22 }
 0x1bd   :  { %v3239_v46 = vcombine.low %v2560_v61, %v2564_v42  ;;  %v3090_v41 = vrot.slane %v9895_v54, %v8780_v25  ;;  %v9939_v2 = vcombine.low %v3151_v55, %v3158_v8  ;;  %v3240_v16 = vcombine.low %v2568_v37, %v2572_v52  ;;  %v1892_v42 = vpop.permute.xlu1 %1891 }
 0x1be   :  { %v9922_v10 = vand.u32 127, %v12368_v31  ;;  %v9941_v31 = vcombine.low %v3165_v56, %v3172_v5  ;;  %v3241_v61 = vcombine.low %v2576_v28, %v2580_v33  ;;  %v3242_v56 = vcombine.low %v2584_v62, %v2588_v19 }
 0x1bf   :  { %3801 = vbcast.lane.b32.xlu0 %v9702_v13, 280  ;;  %v9943_v17 = vpop.eup %7972  ;;  %v3249_v5 = vrot.slane %v3239_v46, %v8780_v25  ;;  %v3256_v33 = vrot.slane %v3240_v16, %v8780_v25  ;;  %7976 = vlog2.f32 %v6121_v39  ;;  %v3091_v39 = vcombine.low %v3083_v51, %v3090_v41 }
 0x1c0   :  { %v1929_v26 = vadd.s32 4294967288, %v9922_v10  ;;  %v9935_v47 = vsub.s32 %v9922_v10, %v12369_v43  ;;  %v1936_v40 = vadd.s32 4294967280, %v9922_v10  ;;  %4046 = vbcast.lane.b32.xlu1 %v9719_v57, 376  ;;  %v1943_v55 = vadd.s32 4294967272, %v9922_v10  ;;  %v9954_v8 = vpop.eup %7974 }
 0x1c1   :  { %v1950_v37 = vadd.s32 4294967264, %v9922_v10  ;;  %v1957_v62 = vadd.s32 4294967256, %v9922_v10  ;;  %7978 = vpow2.f32 %v9852_v35  ;;  %v1971_v51 = vadd.s32 4294967240, %v9922_v10 }
 0x1c2   :  { %v9947_v54 = vsub.s32 %v1929_v26, %v12369_v43  ;;  %v1928_v14 = vrot.slane %v1877_v29, %v9935_v47  ;;  %v9951_v49 = vsub.s32 %v1936_v40, %v12369_v43  ;;  %v9963_v28 = vsub.s32 %v1943_v55, %v12369_v43 }
 0x1c3   :  { %3998 = vbcast.lane.b32.xlu0 %v9719_v57, 280  ;;  %v9968_v46 = vsub.s32 %v1950_v37, %v12369_v43  ;;  %v3263_v26 = vrot.slane %v3241_v61, %v8780_v25  ;;  %v9980_v55 = vsub.s32 %v1957_v62, %v12369_v43  ;;  %v1895_v37 = vpop.permute.xlu1 %1894  ;;  %v12380_v41 = vmin.f32 %v9571_v53, 0.0 }
 0x1c4   :  { %12370 = vst [vmem:[#allocation28_spill] sm:$0xff] %v9947_v54  ;;  %12371 = vst [vmem:[#allocation94_spill] sm:$0xff] %v9951_v49  ;;  %v1933_v52 = vrot.slane %v9801_v9, %v9947_v54  ;;  %v1940_v29 = vrot.slane %v9833_v60, %v9951_v49  ;;  %3540 = vperm.xlu1 %7731, %v2895_v1   ;;  %v1947_v19 = vrot.slane %v9864_v32, %v9963_v28 }
 0x1c5   :  { %12372 = vst [vmem:[#allocation95_spill] sm:$0xff] %v9963_v28  ;;  %12373 = vst [vmem:[#allocation96_spill] sm:$0xff] %v9968_v46  ;;  %v1964_v60 = vadd.s32 4294967248, %v9922_v10  ;;  %v1954_v16 = vrot.slane %v9901_v20, %v9968_v46  ;;  %v3270_v1 = vrot.slane %v3242_v56, %v8780_v25  ;;  %v6143_v20 = vmul.f32 0.6931472, %v9781_v18  ;;  %v12458_v46 = vld [vmem:[#allocation65_spill] sm:$0xff] }
 0x1c6   :  { %v1935_v9 = vsel %vm1934_vm1, %v1933_v52, %v1928_v14  ;;  %12374 = vst [vmem:[#allocation97_spill] sm:$0xff] %v9980_v55  ;;  %v1961_v52 = vrot.slane %v1892_v42, %v9980_v55  ;;  %v12376_v56 = vmin.f32 %v9726_v34, 0.0  ;;  %v3188_v42 = vrot.slane %v9941_v31, %v8780_v25 }
 0x1c7   :  { %v1942_v40 = vsel %vm1941_vm2, %v1940_v29, %v1935_v9  ;;  %v9985_v32 = vsub.s32 %v1964_v60, %v12369_v43  ;;  %4002 = vbcast.lane.b32.xlu0 %v9719_v57, 288  ;;  %v12377_v9 = vld [vmem:[#allocation40_spill] sm:$0xff]  ;;  %v3181_v60 = vrot.slane %v9939_v2, %v8780_v25  ;;  %v3271_v18 = vcombine.low %v3249_v5, %v3256_v33 }
 0x1c8   :  { %v1949_v14 = vsel %vm1948_vm3, %v1947_v19, %v1942_v40  ;;  %v3959_v29 = vmul.f32 1.442695, %v12376_v56  ;;  %3546 = vperm.xlu1 %7731, %v2993_v48   ;;  %v3702_v19 = vadd.f32 1.0, %v12377_v9  ;;  %v12378_v48 = vmin.f32 %v9546_v21, 0.0  ;;  %v12382_v5 = vld [vmem:[#allocation52_spill] sm:$0xff] }
 0x1c9   :  { %12375 = vst [vmem:[#allocation98_spill] sm:$0xff] %v9985_v32  ;;  %v1956_v61 = vsel %vm1955_vm4, %v1954_v16, %v1949_v14  ;;  %v1968_v62 = vrot.slane %v1895_v37, %v9985_v32  ;;  %v3272_v16 = vcombine.low %v3263_v26, %v3270_v1  ;;  %vm3686_vm7 = vcmp.gt.f32.partialorder %v12377_v9, 0.0 }
 0x1ca   :  { %v1963_v40 = vsel %vm1962_vm5, %v1961_v52, %v1956_v61  ;;  %v10005_v14 = vsub.f32 %v12378_v48, %v9882_v3  ;;  %v10013_v2 = vsub.f32 %v12380_v41, %v6143_v20  ;;  %v6118_v31 = vadd.f32 1.0, %v9812_v38 }
 0x1cb   :  { %v1970_v35 = vsel %vm12102_vm6, %v1968_v62, %v1963_v40  ;;  %3809 = vbcast.lane.b32.xlu0 %v9702_v13, 296  ;;  %7980 = vpow2.f32 %v3959_v29  ;;  %v3766_v33 = vsel %vm3686_vm7, %v3702_v19, %v12382_v5  ;;  %v1898_v21 = vpop.permute.xlu1 %1897  ;;  %v2200_v3 = vmul.f32 0.6931472, %v9814_v7  ;;  %v12384_v29 = vld [vmem:[#allocation49_spill] sm:$0xff]  ;;  %v7977_v19 = vpop.eup %7976 }
 0x1cc   :  { %12379 = vst [vmem:[#allocation40_spill] sm:$0xff] %v10005_v14  ;;  %12381 = vst [vmem:[#allocation99_spill] sm:$0xff] %v10013_v2  ;;  %3552 = vperm.xlu1 %7731, %v3091_v39   ;;  %v6149_v26 = vmul.f32 0.6931472, %v9857_v50  ;;  %v10020_v1 = vmul.f32 %v9891_v36, %v3766_v33  ;;  %v10023_v61 = vsub.s32 %v1971_v51, %v12369_v43  ;;  %v2198_v20 = vmul.f32 0.6931472, %v9903_v44 }
 0x1cd   :  { %v3189_v53 = vcombine.low %v3181_v60, %v3188_v42  ;;  %v3279_v52 = vrot.slane %v3271_v18, %v8780_v25  ;;  %v3286_v38 = vrot.slane %v3272_v16, %v8780_v25  ;;  %v2204_v56 = vmul.f32 0.6931472, %v9954_v8  ;;  %v10048_v60 = vpop.eup %7978 }
 0x1ce   :  { %12383 = vst [vmem:[#allocation52_spill] sm:$0xff] %v10023_v61  ;;  %v2171_v7 = vadd.f32 1.0, %v9909_v27  ;;  %v1975_v50 = vrot.slane %v1898_v21, %v10023_v61  ;;  %v1985_v36 = vadd.s32 4294967224, %v9922_v10  ;;  %v2272_v62 = vrot.slane %v12384_v29, %v8752_v0 }
 0x1cf   :  { %4006 = vbcast.lane.b32.xlu0 %v9719_v57, 296  ;;  %v2276_v9 = vrot.slane %v12384_v29, %v8755_v11  ;;  %v2280_v44 = vrot.slane %v12384_v29, %v8758_v63  ;;  %v2284_v27 = vrot.slane %v12384_v29, %v8761_v24  ;;  %v2288_v57 = vrot.slane %v12384_v29, %v8765_v58 }
 0x1d0   :  { %3558 = vperm.xlu1 %7731, %v3189_v53   ;;  %v2292_v8 = vrot.slane %v12384_v29, %v8768_v30  ;;  %v10046_v39 = vsel %vm12101_vm8, %v1975_v50, %v1970_v35  ;;  %v12385_v40 = vmin.f32 %v9602_v23, 0.0  ;;  %v12387_v18 = vmin.f32 %v9614_v4, 0.0 }
 0x1d1   :  { %7982 = vlog2.f32 %v6118_v31  ;;  %v3287_v48 = vcombine.low %v3279_v52, %v3286_v38  ;;  %v12389_v51 = vmin.f32 %v9637_v15, 0.0  ;;  %v12391_v5 = vmin.f32 %v9681_v6, 0.0 }
 0x1d2   :  { %v10052_v42 = vsub.f32 %v12385_v40, %v2200_v3  ;;  %v10056_v16 = vsub.f32 %v12387_v18, %v6149_v26  ;;  %7984 = vlog2.f32 %v2171_v7  ;;  %v10067_v33 = vadd.f32 1.0, %v9943_v17 }
 0x1d3   :  { %v10060_v41 = vsub.f32 %v12389_v51, %v2198_v20  ;;  %v10064_v35 = vsub.f32 %v12391_v5, %v2204_v56  ;;  %3813 = vbcast.lane.b32.xlu0 %v9702_v13, 304  ;;  %v10070_v23 = vmul.f32 0.6931472, %v7977_v19  ;;  %v10073_v4 = vsub.s32 %v1985_v36, %v12369_v43 }
 0x1d4   :  { %12386 = vst [vmem:[#allocation49_spill] sm:$0xff] %v10052_v42  ;;  %12388 = vst [vmem:[#allocation100_spill] sm:$0xff] %v10056_v16  ;;  %3564 = vperm.xlu1 %7731, %v3287_v48   ;;  %v10076_v15 = vadd.s32 4294967208, %v9922_v10  ;;  %v2296_v6 = vrot.slane %v12384_v29, %v8772_v12  ;;  %v2300_v31 = vrot.slane %v12384_v29, %v8777_v22  ;;  %v12395_v29 = vld [vmem:[#allocation25_spill] sm:$0xff]  ;;  %v1978_v40 = vadd.s32 4294967232, %v9922_v10 }
 0x1d5   :  { %12390 = vst [vmem:[#allocation101_spill] sm:$0xff] %v10060_v41  ;;  %12392 = vst [vmem:[#allocation102_spill] sm:$0xff] %v10064_v35  ;;  %v2798_v21 = vcombine.low %v2272_v62, %v2276_v9  ;;  %v2799_v17 = vcombine.low %v2280_v44, %v2284_v27  ;;  %v10082_v3 = vcombine.low %v2288_v57, %v2292_v8  ;;  %v10084_v26 = vpop.eup %7980  ;;  %vm2018_vm8 = vcmask 917312  }
 0x1d6   :  { %12393 = vst [vmem:[#allocation103_spill] sm:$0xff] %v10067_v33  ;;  %12394 = vst [vmem:[#allocation104_spill] sm:$0xff] %v10073_v4  ;;  %v2336_v53 = vrot.slane %v9462_v45, %v8752_v0  ;;  %v2340_v52 = vrot.slane %v9462_v45, %v8755_v11  ;;  %v2344_v38 = vrot.slane %v9462_v45, %v8758_v63  ;;  %vm3897_vm6 = vcmp.gt.f32.partialorder %v9726_v34, 0.0 }
 0x1d7   :  { %v2348_v20 = vrot.slane %v9462_v45, %v8761_v24  ;;  %3817 = vbcast.lane.b32.xlu0 %v9702_v13, 312  ;;  %v2352_v56 = vrot.slane %v9462_v45, %v8765_v58  ;;  %v2356_v7 = vrot.slane %v9462_v45, %v8768_v30  ;;  %v2360_v50 = vrot.slane %v9462_v45, %v8772_v12 }
 0x1d8   :  { %v2364_v36 = vrot.slane %v9462_v45, %v8777_v22  ;;  %v2400_v62 = vrot.slane %v12395_v29, %v8752_v0  ;;  %v2404_v9 = vrot.slane %v12395_v29, %v8755_v11  ;;  %v2408_v44 = vrot.slane %v12395_v29, %v8758_v63 }
 0x1d9   :  { %v2412_v19 = vrot.slane %v12395_v29, %v8761_v24  ;;  %v2801_v27 = vcombine.low %v2296_v6, %v2300_v31  ;;  %v2808_v57 = vrot.slane %v2798_v21, %v8780_v25  ;;  %v2815_v8 = vrot.slane %v2799_v17, %v8780_v25 }
 0x1da   :  { %v2416_v45 = vrot.slane %v12395_v29, %v8765_v58  ;;  %v2420_v18 = vrot.slane %v12395_v29, %v8768_v30  ;;  %v2424_v48 = vrot.slane %v12395_v29, %v8772_v12  ;;  %v2428_v51 = vrot.slane %v12395_v29, %v8777_v22 }
 0x1db   :  { %3821 = vbcast.lane.b32.xlu0 %v9702_v13, 320  ;;  %v2822_v5 = vrot.slane %v10082_v3, %v8780_v25  ;;  %v2013_v6 = vadd.s32 4294967192, %v9922_v10  ;;  %v2896_v31 = vcombine.low %v2336_v53, %v2340_v52  ;;  %v2897_v21 = vcombine.low %v2344_v38, %v2348_v20  ;;  %v10126_v17 = vpop.eup %7982  ;;  %v12399_v53 = vld [vmem:[#allocation23_spill] sm:$0xff]  ;;  %v10141_v20 = vpop.permute.xlu0 %1903 }
 0x1dc   :  { %12396 = vst [vmem:[#allocation25_spill] sm:$0xff] %v10126_v17  ;;  %v2898_v37 = vcombine.low %v2352_v56, %v2356_v7  ;;  %v2899_v33 = vcombine.low %v2360_v50, %v2364_v36  ;;  %v2994_v35 = vcombine.low %v2400_v62, %v2404_v9  ;;  %v2995_v16 = vcombine.low %v2408_v44, %v2412_v19  ;;  %v10128_v42 = vpop.eup %7984 }
 0x1dd   :  { %12397 = vst [vmem:[#allocation105_spill] sm:$0xff] %v10128_v42  ;;  %v2829_v41 = vrot.slane %v2801_v27, %v8780_v25  ;;  %v10131_v29 = vcombine.low %v2808_v57, %v2815_v8  ;;  %v10134_v61 = vsub.s32 %v1978_v40, %v12369_v43  ;;  %v2996_v3 = vcombine.low %v2416_v45, %v2420_v18 }
 0x1de   :  { %v2997_v55 = vcombine.low %v2424_v48, %v2428_v51  ;;  %v2464_v52 = vrot.slane %v12399_v53, %v8752_v0  ;;  %v2468_v38 = vrot.slane %v12399_v53, %v8755_v11  ;;  %v2906_v56 = vrot.slane %v2896_v31, %v8780_v25  ;;  %v12400_v48 = vld [vmem:[#allocation89_spill] sm:$0xff] }
 0x1df   :  { %12398 = vst [vmem:[#allocation106_spill] sm:$0xff] %v10134_v61  ;;  %3825 = vbcast.lane.b32.xlu0 %v9702_v13, 328  ;;  %v2913_v7 = vrot.slane %v2897_v21, %v8780_v25  ;;  %v2472_v50 = vrot.slane %v12399_v53, %v8758_v63  ;;  %v2476_v36 = vrot.slane %v12399_v53, %v8761_v24 }
 0x1e0   :  { %v2920_v62 = vrot.slane %v2898_v37, %v8780_v25  ;;  %v2927_v9 = vrot.slane %v2899_v33, %v8780_v25  ;;  %v3004_v44 = vrot.slane %v2994_v35, %v8780_v25  ;;  %v3011_v19 = vrot.slane %v2995_v16, %v8780_v25 }
 0x1e1   :  { %v1901_v27 = vpop.permute.xlu1 %1900  ;;  %v2480_v57 = vrot.slane %v12399_v53, %v8765_v58  ;;  %v2484_v8 = vrot.slane %v12399_v53, %v8768_v30  ;;  %v2488_v40 = vrot.slane %v12399_v53, %v8772_v12  ;;  %v2492_v45 = vrot.slane %v12399_v53, %v8777_v22 }
 0x1e2   :  { %v1982_v37 = vrot.slane %v1901_v27, %v10134_v61  ;;  %v3018_v33 = vrot.slane %v2996_v3, %v8780_v25  ;;  %v3025_v35 = vrot.slane %v2997_v55, %v8780_v25  ;;  %v3092_v16 = vcombine.low %v2464_v52, %v2468_v38  ;;  %v10181_v38 = vpop.permute.xlu0 %1909 }
 0x1e3   :  { %3829 = vbcast.lane.b32.xlu0 %v9702_v13, 336  ;;  %v3093_v18 = vcombine.low %v2472_v50, %v2476_v36  ;;  %v2528_v51 = vrot.slane %v12400_v48, %v8752_v0  ;;  %v2532_v31 = vrot.slane %v12400_v48, %v8755_v11  ;;  %v2536_v21 = vrot.slane %v12400_v48, %v8758_v63 }
 0x1e4   :  { %v10173_v53 = vsel %vm12100_vm9, %v1982_v37, %v10046_v39  ;;  %v2540_v55 = vrot.slane %v12400_v48, %v8761_v24  ;;  %v2544_v3 = vrot.slane %v12400_v48, %v8765_v58  ;;  %v2548_v52 = vrot.slane %v12400_v48, %v8768_v30 }
 0x1e5   :  { %v3094_v50 = vcombine.low %v2480_v57, %v2484_v8  ;;  %v3095_v36 = vcombine.low %v2488_v40, %v2492_v45  ;;  %v2552_v27 = vrot.slane %v12400_v48, %v8772_v12  ;;  %v2556_v39 = vrot.slane %v12400_v48, %v8777_v22 }
 0x1e6   :  { %v10189_v37 = vsub.s32 %v10076_v15, %v12369_v43  ;;  %v2831_v42 = vcombine.low %v2822_v5, %v2829_v41  ;;  %v10192_v17 = vsub.s32 %v2013_v6, %v12369_v43  ;;  %v2928_v28 = vcombine.low %v2906_v56, %v2913_v7 }
 0x1e7   :  { %3833 = vbcast.lane.b32.xlu0 %v9702_v13, 344  ;;  %v2838_v57 = vrot.slane %v10131_v29, %v8780_v25  ;;  %v2929_v8 = vcombine.low %v2920_v62, %v2927_v9  ;;  %v3026_v40 = vcombine.low %v3004_v44, %v3011_v19  ;;  %v3027_v45 = vcombine.low %v3018_v33, %v3025_v35  ;;  %v10206_v9 = vpop.permute.xlu0 %1915 }
 0x1e8   :  { %12401 = vst [vmem:[#allocation23_spill] sm:$0xff] %v10189_v37  ;;  %12402 = vst [vmem:[#allocation89_spill] sm:$0xff] %v10192_v17  ;;  %v3190_v54 = vcombine.low %v2528_v51, %v2532_v31  ;;  %v3191_v61 = vcombine.low %v2536_v21, %v2540_v55  ;;  %v3192_v48 = vcombine.low %v2544_v3, %v2548_v52  ;;  %v2027_v29 = vadd.s32 4294967176, %v9922_v10 }
 0x1e9   :  { %v3193_v14 = vcombine.low %v2552_v27, %v2556_v39  ;;  %v3102_v15 = vrot.slane %v3092_v16, %v8780_v25  ;;  %v3109_v41 = vrot.slane %v3093_v18, %v8780_v25  ;;  %v3116_v5 = vrot.slane %v3094_v50, %v8780_v25 }
 0x1ea   :  { %v3123_v6 = vrot.slane %v3095_v36, %v8780_v25  ;;  %v2845_v56 = vrot.slane %v2831_v42, %v8780_v25  ;;  %v2936_v7 = vrot.slane %v2928_v28, %v8780_v25  ;;  %v1992_v62 = vadd.s32 4294967216, %v9922_v10 }
 0x1eb   :  { %3837 = vbcast.lane.b32.xlu0 %v9702_v13, 352  ;;  %v2943_v44 = vrot.slane %v2929_v8, %v8780_v25  ;;  %v3034_v19 = vrot.slane %v3026_v40, %v8780_v25  ;;  %v3041_v33 = vrot.slane %v3027_v45, %v8780_v25  ;;  %v2006_v35 = vadd.s32 4294967200, %v9922_v10  ;;  %v12408_v45 = vld [vmem:[#allocation82_spill] sm:$0xff] }
 0x1ec   :  { %v3200_v42 = vrot.slane %v3190_v54, %v8780_v25  ;;  %v3207_v28 = vrot.slane %v3191_v61, %v8780_v25  ;;  %v3214_v16 = vrot.slane %v3192_v48, %v8780_v25  ;;  %v3221_v18 = vrot.slane %v3193_v14, %v8780_v25 }
 0x1ed   :  { %v12403_v51 = vmin.f32 %v9724_v59, 0.0  ;;  %v1989_v21 = vrot.slane %v10141_v20, %v10073_v4  ;;  %v3124_v55 = vcombine.low %v3102_v15, %v3109_v41  ;;  %v3125_v3 = vcombine.low %v3116_v5, %v3123_v6  ;;  %v12409_v41 = vld [vmem:[#allocation81_spill] sm:$0xff]  ;;  %v12410_v6 = vld [vmem:[#allocation19_spill] sm:$0xff] }
 0x1ee   :  { %v2003_v52 = vrot.slane %v10181_v38, %v10189_v37  ;;  %v2846_v54 = vcombine.low %v2838_v57, %v2845_v56  ;;  %v10228_v50 = vsub.s32 %v1992_v62, %v12369_v43  ;;  %v10231_v59 = vcombine.low %v2936_v7, %v2943_v44  ;;  %v12440_v38 = vld [vmem:[#allocation64_spill] sm:$0xff] }
 0x1ef   :  { %v10219_v31 = vsub.f32 %v12403_v51, %v10070_v23  ;;  %3841 = vbcast.lane.b32.xlu0 %v9702_v13, 360  ;;  %v10234_v14 = vsub.s32 %v2027_v29, %v12369_v43  ;;  %v10236_v23 = vcombine.low %v3034_v19, %v3041_v33  ;;  %v10239_v20 = vsub.s32 %v2006_v35, %v12369_v43  ;;  %v12411_v29 = vld [vmem:[#allocation48_spill] sm:$0xff] }
 0x1f0   :  { %12405 = vst [vmem:[#allocation108_spill] sm:$0xff] %v10228_v50  ;;  %v3222_v36 = vcombine.low %v3200_v42, %v3207_v28  ;;  %v3223_v27 = vcombine.low %v3214_v16, %v3221_v18  ;;  %v3132_v57 = vrot.slane %v3124_v55, %v8780_v25  ;;  %v3139_v8 = vrot.slane %v3125_v3, %v8780_v25  ;;  %v12414_v28 = vld [vmem:[#allocation22_spill] sm:$0xff]  ;;  %v12415_v18 = vld [vmem:[#allocation21_spill] sm:$0xff]  ;;  %v12446_v37 = vld [vmem:[#allocation76_spill] sm:$0xff] }
 0x1f1   :  { %12404 = vst [vmem:[#allocation107_spill] sm:$0xff] %v10219_v31  ;;  %12406 = vst [vmem:[#allocation109_spill] sm:$0xff] %v10234_v14  ;;  %v1907_v39 = vpop.permute.xlu1 %1906  ;;  %v2020_v40 = vadd.s32 4294967184, %v9922_v10  ;;  %v3905_v48 = vadd.f32 1.0, %v12408_v45  ;;  %vm3889_vm13 = vcmp.gt.f32.partialorder %v12408_v45, 0.0  ;;  %v3906_v5 = vadd.f32 1.0, %v12409_v41 }
 0x1f2   :  { %12407 = vst [vmem:[#allocation110_spill] sm:$0xff] %v10239_v20  ;;  %v1996_v15 = vrot.slane %v1907_v39, %v10228_v50  ;;  %v3907_v56 = vadd.f32 1.0, %v12410_v6  ;;  %v1991_v7 = vsel %vm12099_vm10, %v1989_v21, %v10173_v53  ;;  %v3706_v62 = vadd.f32 1.0, %v12411_v29  ;;  %v12413_v53 = vld [vmem:[#allocation72_spill] sm:$0xff]  ;;  %v12416_v21 = vld [vmem:[#allocation86_spill] sm:$0xff] }
 0x1f3   :  { %3845 = vbcast.lane.b32.xlu0 %v9702_v13, 368  ;;  %vm3890_vm14 = vcmp.gt.f32.partialorder %v12409_v41, 0.0  ;;  %vm3891_vm15 = vcmp.gt.f32.partialorder %v12410_v6, 0.0  ;;  %v3230_v44 = vrot.slane %v3222_v36, %v8780_v25  ;;  %v3237_v19 = vrot.slane %v3223_v27, %v8780_v25  ;;  %v12417_v3 = vld [vmem:[#allocation58_spill] sm:$0xff]  ;;  %v12422_v41 = vld [vmem:[#allocation85_spill] sm:$0xff] }
 0x1f4   :  { %v1998_v10 = vsel %vm12098_vm11, %v1996_v15, %v1991_v7  ;;  %vm3690_vm0 = vcmp.gt.f32.partialorder %v12411_v29, 0.0  ;;  %v10259_v33 = vcombine.low %v3132_v57, %v3139_v8  ;;  %v10262_v35 = vsub.s32 %v2020_v40, %v12369_v43  ;;  %v12418_v43 = vld [vmem:[#allocation69_spill] sm:$0xff]  ;;  %v12419_v39 = vld [vmem:[#allocation66_spill] sm:$0xff]  ;;  %v12420_v40 = vld [vmem:[#allocation39_spill] sm:$0xff] }
 0x1f5   :  { %v10265_v42 = vsel %vm3690_vm0, %v3706_v62, %v12413_v53  ;;  %v10268_v16 = vsel %vm3889_vm13, %v3905_v48, %v12414_v28  ;;  %v10271_v51 = vsel %vm3890_vm14, %v3906_v5, %v12415_v18  ;;  %v10274_v55 = vsel %vm3891_vm15, %v3907_v56, %v12416_v21  ;;  %v12421_v48 = vld [vmem:[#allocation29_spill] sm:$0xff]  ;;  %v12424_v56 = vld [vmem:[#allocation42_spill] sm:$0xff]  ;;  %v12425_v29 = vld [vmem:[#allocation71_spill] sm:$0xff] }
 0x1f6   :  { %12412 = vst [vmem:[#allocation82_spill] sm:$0xff] %v10262_v35  ;;  %vm3892_vm7 = vcmp.gt.f32.partialorder %v12417_v3, 0.0  ;;  %v3908_v36 = vadd.f32 1.0, %v12417_v3  ;;  %vm3893_vm11 = vcmp.gt.f32.partialorder %v12418_v43, 0.0  ;;  %v3909_v27 = vadd.f32 1.0, %v12418_v43  ;;  %v12427_v28 = vld [vmem:[#allocation79_spill] sm:$0xff] }
 0x1f7   :  { %3849 = vbcast.lane.b32.xlu0 %v9702_v13, 376  ;;  %vm3894_vm0 = vcmp.gt.f32.partialorder %v12419_v39, 0.0  ;;  %v3910_v57 = vadd.f32 1.0, %v12419_v39  ;;  %v10283_v8 = vcombine.low %v3230_v44, %v3237_v19  ;;  %v3703_v45 = vadd.f32 1.0, %v12420_v40  ;;  %v12423_v13 = vld [vmem:[#allocation68_spill] sm:$0xff]  ;;  %v12426_v19 = vld [vmem:[#allocation91_spill] sm:$0xff] }
 0x1f8   :  { %v3911_v15 = vadd.f32 1.0, %v12421_v48  ;;  %v3912_v5 = vadd.f32 1.0, %v12422_v41  ;;  %vm3687_vm13 = vcmp.gt.f32.partialorder %v12420_v40, 0.0  ;;  %vm3895_vm14 = vcmp.gt.f32.partialorder %v12421_v48, 0.0  ;;  %v12429_v21 = vld [vmem:[#allocation51_spill] sm:$0xff]  ;;  %v12432_v40 = vld [vmem:[#allocation78_spill] sm:$0xff] }
 0x1f9   :  { %vm3896_vm15 = vcmp.gt.f32.partialorder %v12422_v41, 0.0  ;;  %v3900_v6 = vadd.f32 1.0, %v12423_v13  ;;  %vm2011_vm10 = vcmask 851712   ;;  %v10295_v7 = vsel %vm3892_vm7, %v3908_v36, %v12424_v56  ;;  %v12430_v36 = vld [vmem:[#allocation93_spill] sm:$0xff]  ;;  %v12433_v43 = vld [vmem:[#allocation27_spill] sm:$0xff]  ;;  %v12438_v56 = vld [vmem:[#allocation88_spill] sm:$0xff] }
 0x1fa   :  { %v3899_v62 = vadd.f32 1.0, %v12425_v29  ;;  %vm3884_vm9 = vcmp.gt.f32.partialorder %v12423_v13, 0.0  ;;  %v3913_v44 = vadd.f32 1.0, %v9726_v34  ;;  %v10303_v53 = vsel %vm3893_vm11, %v3909_v27, %v12426_v19  ;;  %v12435_v34 = vld [vmem:[#allocation77_spill] sm:$0xff]  ;;  %v12447_v50 = vld [vmem:[#allocation54_spill] sm:$0xff] }
 0x1fb   :  { %3537 = vperm.xlu0 %7730, %v2846_v54   ;;  %v10308_v18 = vsel %vm3894_vm0, %v3910_v57, %v12427_v28  ;;  %vm3883_vm7 = vcmp.gt.f32.partialorder %v12425_v29, 0.0  ;;  %v10313_v3 = vsel %vm3687_vm13, %v3703_v45, %v12429_v21  ;;  %v10316_v54 = vsel %vm3895_vm14, %v3911_v15, %v12430_v36  ;;  %v12436_v45 = vld [vmem:[#allocation45_spill] sm:$0xff] }
 0x1fc   :  { %12428 = vst [vmem:[#allocation81_spill] sm:$0xff] %v10308_v18  ;;  %12431 = vst [vmem:[#allocation19_spill] sm:$0xff] %v10316_v54  ;;  %v10319_v48 = vsel %vm3883_vm7, %v3899_v62, %v12432_v40  ;;  %v10324_v27 = vsel %vm3896_vm15, %v3912_v5, %v12433_v43  ;;  %v2005_v39 = vsel %vm2004_vm12, %v2003_v52, %v1998_v10  ;;  %vm3688_vm11 = vcmp.gt.f32.partialorder %v12436_v45, 0.0  ;;  %v12439_v5 = vld [vmem:[#allocation8_spill] sm:$0xff]  ;;  %v12442_v28 = vld [vmem:[#allocation41_spill] sm:$0xff] }
 0x1fd   :  { %12434 = vst [vmem:[#allocation48_spill] sm:$0xff] %v10324_v27  ;;  %v10331_v57 = vsel %vm3884_vm9, %v3900_v6, %v12435_v34  ;;  %v3704_v15 = vadd.f32 1.0, %v12436_v45  ;;  %v10336_v13 = vsel %vm3897_vm6, %v3913_v44, %v10084_v26  ;;  %vm3898_vm0 = vcmp.gt.f32.partialorder %v12438_v56, 0.0  ;;  %v12441_v10 = vld [vmem:[#allocation80_spill] sm:$0xff] }
 0x1fe   :  { %12437 = vst [vmem:[#allocation72_spill] sm:$0xff] %v10336_v13  ;;  %v3914_v41 = vadd.f32 1.0, %v12438_v56  ;;  %v3901_v29 = vadd.f32 1.0, %v12439_v5  ;;  %vm3885_vm9 = vcmp.gt.f32.partialorder %v12439_v5, 0.0  ;;  %v6189_v6 = vrot.slane %v12441_v10, %v8752_v0  ;;  %v12444_v45 = vld [vmem:[#allocation16_spill] sm:$0xff]  ;;  %v12445_v5 = vld [vmem:[#allocation6_spill] sm:$0xff] }
 0x1ff   :  { %3543 = vperm.xlu0 %7730, %v10231_v59   ;;  %v10343_v52 = vsel %vm3688_vm11, %v3704_v15, %v12440_v38  ;;  %v6193_v26 = vrot.slane %v12441_v10, %v8755_v11  ;;  %v6197_v62 = vrot.slane %v12441_v10, %v8758_v63  ;;  %v6201_v44 = vrot.slane %v12441_v10, %v8761_v24 }
 0x200   :  { %v6205_v59 = vrot.slane %v12441_v10, %v8765_v58  ;;  %v6209_v19 = vrot.slane %v12441_v10, %v8768_v30  ;;  %vm3689_vm6 = vcmp.gt.f32.partialorder %v12442_v28, 0.0  ;;  %v3705_v21 = vadd.f32 1.0, %v12442_v28 }
 0x201   :  { %v6213_v36 = vrot.slane %v12441_v10, %v8772_v12  ;;  %v6217_v40 = vrot.slane %v12441_v10, %v8777_v22  ;;  %v10367_v34 = vsel %vm3898_vm0, %v3914_v41, %v10048_v60  ;;  %v10370_v15 = vsel %vm3885_vm9, %v3901_v29, %v12444_v45 }
 0x202   :  { %v1913_v43 = vpop.permute.xlu1 %1912  ;;  %12443 = vst [vmem:[#allocation22_spill] sm:$0xff] %v10367_v34  ;;  %vm3886_vm13 = vcmp.gt.f32.partialorder %v12445_v5, 0.0  ;;  %v3902_v38 = vadd.f32 1.0, %v12445_v5  ;;  %vm3887_vm14 = vcmp.gt.f32.partialorder %v12446_v37, 0.0  ;;  %v6698_v10 = vcombine.low %v6189_v6, %v6193_v26 }
 0x203   :  { %3549 = vperm.xlu0 %7730, %v10236_v23   ;;  %v2010_v61 = vrot.slane %v1913_v43, %v10239_v20  ;;  %v6221_v14 = vrot.slane %v12447_v50, %v8752_v0  ;;  %v6699_v56 = vcombine.low %v6197_v62, %v6201_v44  ;;  %v6700_v60 = vcombine.low %v6205_v59, %v6209_v19  ;;  %v12452_v43 = vld [vmem:[#allocation15_spill] sm:$0xff] }
 0x204   :  { %v6225_v41 = vrot.slane %v12447_v50, %v8755_v11  ;;  %v6229_v29 = vrot.slane %v12447_v50, %v8758_v63  ;;  %v6701_v31 = vcombine.low %v6213_v36, %v6217_v40  ;;  %v6233_v23 = vrot.slane %v12447_v50, %v8761_v24  ;;  %v12451_v36 = vld [vmem:[#allocation46_spill] sm:$0xff] }
 0x205   :  { %v2012_v45 = vsel %vm2011_vm10, %v2010_v61, %v2005_v39  ;;  %v6237_v6 = vrot.slane %v12447_v50, %v8765_v58  ;;  %v12448_v26 = vrot.slane %v10206_v9, %v10192_v17  ;;  %v6241_v44 = vrot.slane %v12447_v50, %v8768_v30  ;;  %v12449_v39 = vld [vmem:[#allocation57_spill] sm:$0xff] }
 0x206   :  { %v6245_v59 = vrot.slane %v12447_v50, %v8772_v12  ;;  %v6249_v61 = vrot.slane %v12447_v50, %v8777_v22  ;;  %v10404_v19 = vsel %vm3689_vm6, %v3705_v21, %v12449_v39  ;;  %v3903_v9 = vadd.f32 1.0, %v12446_v37 }
 0x207   :  { %v10392_v62 = vsel %vm2018_vm8, %v12448_v26, %v2012_v45  ;;  %3555 = vperm.xlu0 %7730, %v10259_v33   ;;  %12450 = vst [vmem:[#allocation21_spill] sm:$0xff] %v10404_v19  ;;  %vm3691_vm15 = vcmp.gt.f32.partialorder %v12451_v36, 0.0  ;;  %v3707_v40 = vadd.f32 1.0, %v12451_v36  ;;  %v10412_v45 = vsel %vm3886_vm13, %v3902_v38, %v12452_v43  ;;  %v12454_v26 = vld [vmem:[#allocation75_spill] sm:$0xff]  ;;  %v12455_v33 = vld [vmem:[#allocation53_spill] sm:$0xff]  ;;  %v12456_v38 = vld [vmem:[#allocation20_spill] sm:$0xff] }
 0x208   :  { %12453 = vst [vmem:[#allocation86_spill] sm:$0xff] %v10412_v45  ;;  %vm3888_vm7 = vcmp.gt.f32.partialorder %v12454_v26, 0.0  ;;  %v3904_v50 = vadd.f32 1.0, %v12454_v26  ;;  %vm3692_vm11 = vcmp.gt.f32.partialorder %v12455_v33, 0.0  ;;  %v6708_v28 = vrot.slane %v6698_v10, %v8780_v25  ;;  %v12467_v26 = vld [vmem:[#allocation70_spill] sm:$0xff] }
 0x209   :  { %v6715_v21 = vrot.slane %v6699_v56, %v8780_v25  ;;  %v6722_v39 = vrot.slane %v6700_v60, %v8780_v25  ;;  %v6729_v17 = vrot.slane %v6701_v31, %v8780_v25  ;;  %v6747_v20 = vcombine.low %v6221_v14, %v6225_v41  ;;  %v12460_v31 = vld [vmem:[#allocation56_spill] sm:$0xff]  ;;  %v12461_v14 = vld [vmem:[#allocation17_spill] sm:$0xff] }
 0x20a   :  { %v6748_v4 = vcombine.low %v6229_v29, %v6233_v23  ;;  %v6749_v32 = vcombine.low %v6237_v6, %v6241_v44  ;;  %v6750_v5 = vcombine.low %v6245_v59, %v6249_v61  ;;  %vm2025_vm0 = vcmask 982912   ;;  %v12463_v41 = vld [vmem:[#allocation60_spill] sm:$0xff]  ;;  %v12466_v23 = vld [vmem:[#allocation62_spill] sm:$0xff] }
 0x20b   :  { %3561 = vperm.xlu0 %7730, %v10283_v8   ;;  %v10425_v43 = vsel %vm3887_vm14, %v3903_v9, %v12456_v38  ;;  %v10430_v10 = vsel %vm3691_vm15, %v3707_v40, %v12458_v46  ;;  %v3708_v56 = vadd.f32 1.0, %v12455_v33  ;;  %vm3694_vm9 = vcmp.gt.f32.partialorder %v12460_v31, 0.0  ;;  %v12464_v29 = vld [vmem:[#allocation12_spill] sm:$0xff]  ;;  %v12469_v38 = vld [vmem:[#allocation74_spill] sm:$0xff] }
 0x20c   :  { %12457 = vst [vmem:[#allocation58_spill] sm:$0xff] %v10425_v43  ;;  %12459 = vst [vmem:[#allocation69_spill] sm:$0xff] %v10430_v10  ;;  %v10437_v60 = vsel %vm3888_vm7, %v3904_v50, %v12461_v14  ;;  %v3710_v8 = vadd.f32 1.0, %v12460_v31  ;;  %vm3696_vm6 = vcmp.gt.f32.partialorder %v12463_v41, 0.0  ;;  %v3712_v37 = vadd.f32 1.0, %v12463_v41  ;;  %v12471_v14 = vld [vmem:[#allocation10_spill] sm:$0xff] }
 0x20d   :  { %12462 = vst [vmem:[#allocation66_spill] sm:$0xff] %v10437_v60  ;;  %v10445_v46 = vsel %vm3692_vm11, %v3708_v56, %v12464_v29  ;;  %v3714_v6 = vadd.f32 1.0, %v12466_v23  ;;  %v6730_v44 = vcombine.low %v6708_v28, %v6715_v21  ;;  %v6731_v59 = vcombine.low %v6722_v39, %v6729_v17  ;;  %v12468_v39 = vld [vmem:[#allocation50_spill] sm:$0xff] }
 0x20e   :  { %12465 = vst [vmem:[#allocation39_spill] sm:$0xff] %v10445_v46  ;;  %vm3698_vm13 = vcmp.gt.f32.partialorder %v12466_v23, 0.0  ;;  %v6757_v61 = vrot.slane %v6747_v20, %v8780_v25  ;;  %v6764_v9 = vrot.slane %v6748_v4, %v8780_v25  ;;  %v6771_v36 = vrot.slane %v6749_v32, %v8780_v25  ;;  %v12473_v46 = vld [vmem:[#allocation67_spill] sm:$0xff]  ;;  %v12474_v41 = vld [vmem:[#allocation18_spill] sm:$0xff] }
 0x20f   :  { %v6778_v40 = vrot.slane %v6750_v5, %v8780_v25  ;;  %v6253_v50 = vrot.slane %v12467_v26, %v8752_v0  ;;  %v6257_v33 = vrot.slane %v12467_v26, %v8755_v11  ;;  %v6261_v28 = vrot.slane %v12467_v26, %v8758_v63 }
 0x210   :  { %v6265_v17 = vrot.slane %v12467_v26, %v8761_v24  ;;  %v6269_v20 = vrot.slane %v12467_v26, %v8765_v58  ;;  %v6273_v32 = vrot.slane %v12467_v26, %v8768_v30  ;;  %v6277_v4 = vrot.slane %v12467_v26, %v8772_v12 }
 0x211   :  { %v6281_v21 = vrot.slane %v12467_v26, %v8777_v22  ;;  %vm3693_vm14 = vcmp.gt.f32.partialorder %v12468_v39, 0.0  ;;  %v3709_v5 = vadd.f32 1.0, %v12468_v39  ;;  %v10474_v56 = vsel %vm3694_vm9, %v3710_v8, %v12469_v38 }
 0x212   :  { %12470 = vst [vmem:[#allocation29_spill] sm:$0xff] %v10474_v56  ;;  %v10479_v29 = vsel %vm3696_vm6, %v3712_v37, %v12471_v14  ;;  %v6738_v49 = vrot.slane %v6730_v44, %v8780_v25  ;;  %v6745_v34 = vrot.slane %v6731_v59, %v8780_v25  ;;  %vm3700_vm15 = vcmp.gt.f32.partialorder %v12473_v46, 0.0 }
 0x213   :  { %12472 = vst [vmem:[#allocation85_spill] sm:$0xff] %v10479_v29  ;;  %v3716_v26 = vadd.f32 1.0, %v12473_v46  ;;  %v1919_v13 = vpop.permute.xlu1 %1918  ;;  %v6779_v60 = vcombine.low %v6757_v61, %v6764_v9  ;;  %v6780_v10 = vcombine.low %v6771_v36, %v6778_v40  ;;  %v6796_v27 = vcombine.low %v6253_v50, %v6257_v33  ;;  %v12476_v33 = vld [vmem:[#allocation43_spill] sm:$0xff] }
 0x214   :  { %v6797_v31 = vcombine.low %v6261_v28, %v6265_v17  ;;  %v2024_v8 = vrot.slane %v1919_v13, %v10262_v35  ;;  %v6798_v38 = vcombine.low %v6269_v20, %v6273_v32  ;;  %v6799_v56 = vcombine.low %v6277_v4, %v6281_v21  ;;  %v12478_v17 = vld [vmem:[#allocation14_spill] sm:$0xff]  ;;  %v12481_v32 = vld [vmem:[#allocation47_spill] sm:$0xff] }
 0x215   :  { %v6285_v37 = vrot.slane %v12474_v41, %v8752_v0  ;;  %v6289_v44 = vrot.slane %v12474_v41, %v8755_v11  ;;  %v6293_v59 = vrot.slane %v12474_v41, %v8758_v63  ;;  %v6297_v14 = vrot.slane %v12474_v41, %v8761_v24  ;;  %v12483_v21 = vld [vmem:[#allocation55_spill] sm:$0xff] }
 0x216   :  { %v6301_v61 = vrot.slane %v12474_v41, %v8765_v58  ;;  %v10498_v13 = vsel %vm2025_vm0, %v2024_v8, %v10392_v62  ;;  %v6305_v9 = vrot.slane %v12474_v41, %v8768_v30  ;;  %v6309_v36 = vrot.slane %v12474_v41, %v8772_v12 }
 0x217   :  { %12475 = vst [vmem:[#allocation68_spill] sm:$0xff] %v10498_v13  ;;  %v6313_v40 = vrot.slane %v12474_v41, %v8777_v22  ;;  %v10506_v50 = vpop.permute.xlu1 %3805  ;;  %v10511_v28 = vsel %vm3693_vm14, %v3709_v5, %v12476_v33  ;;  %v10516_v62 = vsel %vm3698_vm13, %v3714_v6, %v12478_v17  ;;  %v10518_v20 = vcombine.low %v6738_v49, %v6745_v34 }
 0x218   :  { %12477 = vst [vmem:[#allocation42_spill] sm:$0xff] %v10511_v28  ;;  %12479 = vst [vmem:[#allocation71_spill] sm:$0xff] %v10516_v62  ;;  %v10523_v4 = vsel %vm3700_vm15, %v3716_v26, %v12481_v32  ;;  %vm3695_vm7 = vcmp.gt.f32.partialorder %v12483_v21, 0.0  ;;  %v3711_v8 = vadd.f32 1.0, %v12483_v21  ;;  %v6787_v39 = vrot.slane %v6779_v60, %v8780_v25  ;;  %v12484_v32 = vld [vmem:[#allocation84_spill] sm:$0xff]  ;;  %v12487_v28 = vld [vmem:[#allocation73_spill] sm:$0xff] }
 0x219   :  { %12480 = vst [vmem:[#allocation91_spill] sm:$0xff] %v10518_v20  ;;  %12482 = vst [vmem:[#allocation79_spill] sm:$0xff] %v10523_v4  ;;  %v6794_v5 = vrot.slane %v6780_v10, %v8780_v25  ;;  %v6806_v41 = vrot.slane %v6796_v27, %v8780_v25  ;;  %v6813_v23 = vrot.slane %v6797_v31, %v8780_v25  ;;  %vm12586_vm13 = vcmask 458112  }
 0x21a   :  { %v6820_v49 = vrot.slane %v6798_v38, %v8780_v25  ;;  %v6827_v34 = vrot.slane %v6799_v56, %v8780_v25  ;;  %v6845_v6 = vcombine.low %v6285_v37, %v6289_v44  ;;  %v6846_v46 = vcombine.low %v6293_v59, %v6297_v14  ;;  %v12485_v44 = vld [vmem:[#allocation59_spill] sm:$0xff] }
 0x21b   :  { %v6847_v26 = vcombine.low %v6301_v61, %v6305_v9  ;;  %v6848_v33 = vcombine.low %v6309_v36, %v6313_v40  ;;  %v10533_v17 = vpop.permute.xlu1 %4010  ;;  %v6317_v35 = vrot.slane %v12484_v32, %v8752_v0  ;;  %v6321_v10 = vrot.slane %v12484_v32, %v8755_v11  ;;  %v12486_v9 = vld [vmem:[#allocation61_spill] sm:$0xff] }
 0x21c   :  { %v6325_v27 = vrot.slane %v12484_v32, %v8758_v63  ;;  %v6329_v60 = vrot.slane %v12484_v32, %v8761_v24  ;;  %v6333_v56 = vrot.slane %v12484_v32, %v8765_v58  ;;  %v6337_v31 = vrot.slane %v12484_v32, %v8768_v30 }
 0x21d   :  { %v6341_v38 = vrot.slane %v12484_v32, %v8772_v12  ;;  %v6345_v37 = vrot.slane %v12484_v32, %v8777_v22  ;;  %vm3697_vm11 = vcmp.gt.f32.partialorder %v12485_v44, 0.0  ;;  %v3713_v59 = vadd.f32 1.0, %v12485_v44 }
 0x21e   :  { %v10553_v14 = vcombine.low %v6806_v41, %v6813_v23  ;;  %v6829_v61 = vcombine.low %v6820_v49, %v6827_v34  ;;  %vm3699_vm9 = vcmp.gt.f32.partialorder %v12486_v9, 0.0  ;;  %v3715_v36 = vadd.f32 1.0, %v12486_v9 }
 0x21f   :  { %v6855_v40 = vrot.slane %v6845_v6, %v8780_v25  ;;  %v6862_v13 = vrot.slane %v6846_v46, %v8780_v25  ;;  %v4015_v4 = vpop.permute.xlu1 %4014  ;;  %v6869_v20 = vrot.slane %v6847_v26, %v8780_v25  ;;  %v6876_v32 = vrot.slane %v6848_v33, %v8780_v25  ;;  %v12490_v6 = vld [vmem:[#allocation83_spill] sm:$0xff]  ;;  %v10576_v33 = vpop.permute.xlu0 %1921 }
 0x220   :  { %v6894_v62 = vcombine.low %v6317_v35, %v6321_v10  ;;  %v6895_v29 = vcombine.low %v6325_v27, %v6329_v60  ;;  %v10564_v41 = vsel %vm3695_vm7, %v3711_v8, %v12487_v28  ;;  %v10566_v23 = vcombine.low %v6787_v39, %v6794_v5  ;;  %12491 = vst [vmem:[#allocation78_spill] sm:$0xff] %v10576_v33  ;;  %v12492_v28 = vld [vmem:[#allocation9_spill] sm:$0xff] }
 0x221   :  { %12488 = vst [vmem:[#allocation51_spill] sm:$0xff] %v10564_v41  ;;  %v6896_v49 = vcombine.low %v6333_v56, %v6337_v31  ;;  %v6897_v34 = vcombine.low %v6341_v38, %v6345_v37  ;;  %v6349_v54 = vrot.slane %v12490_v6, %v8752_v0  ;;  %v6353_v46 = vrot.slane %v12490_v6, %v8755_v11  ;;  %v12494_v8 = vld [vmem:[#allocation13_spill] sm:$0xff] }
 0x222   :  { %12489 = vst [vmem:[#allocation93_spill] sm:$0xff] %v10566_v23  ;;  %v6357_v26 = vrot.slane %v12490_v6, %v8758_v63  ;;  %v6361_v35 = vrot.slane %v12490_v6, %v8761_v24  ;;  %v10581_v21 = vsel %vm3697_vm11, %v3713_v59, %v12492_v28  ;;  %v10586_v39 = vsel %vm3699_vm9, %v3715_v36, %v12494_v8 }
 0x223   :  { %12493 = vst [vmem:[#allocation27_spill] sm:$0xff] %v10581_v21  ;;  %12495 = vst [vmem:[#allocation77_spill] sm:$0xff] %v10586_v39  ;;  %v6836_v5 = vrot.slane %v10553_v14, %v8780_v25  ;;  %v6843_v10 = vrot.slane %v6829_v61, %v8780_v25  ;;  %v10591_v27 = vpop.permute.xlu1 %4018  ;;  %v6877_v60 = vcombine.low %v6855_v40, %v6862_v13  ;;  %vm12589_vm14 = vcmask 523712  }
 0x224   :  { %v6878_v56 = vcombine.low %v6869_v20, %v6876_v32  ;;  %v6904_v31 = vrot.slane %v6894_v62, %v8780_v25  ;;  %v6911_v38 = vrot.slane %v6895_v29, %v8780_v25  ;;  %v6918_v37 = vrot.slane %v6896_v49, %v8780_v25  ;;  %v12497_v29 = vld [vmem:[#allocation87_spill] sm:$0xff] }
 0x225   :  { %v6925_v44 = vrot.slane %v6897_v34, %v8780_v25  ;;  %v6365_v59 = vrot.slane %v12490_v6, %v8765_v58  ;;  %v6369_v14 = vrot.slane %v12490_v6, %v8768_v30  ;;  %v6373_v61 = vrot.slane %v12490_v6, %v8772_v12 }
 0x226   :  { %v6377_v13 = vrot.slane %v12490_v6, %v8777_v22  ;;  %v6943_v20 = vcombine.low %v6349_v54, %v6353_v46  ;;  %v6944_v62 = vcombine.low %v6357_v26, %v6361_v35  ;;  %v10605_v9 = vpop.permute.xlu0 %3534  ;;  %v6381_v36 = vrot.slane %v12497_v29, %v8752_v0  ;;  %v12498_v35 = vld [vmem:[#allocation63_spill] sm:$0xff] }
 0x227   :  { %12496 = vst [vmem:[#allocation45_spill] sm:$0xff] %v10605_v9  ;;  %v6385_v40 = vrot.slane %v12497_v29, %v8755_v11  ;;  %v6389_v32 = vrot.slane %v12497_v29, %v8758_v63  ;;  %v6393_v49 = vrot.slane %v12497_v29, %v8761_v24  ;;  %v10615_v34 = vpop.permute.xlu1 %4022  ;;  %v6397_v54 = vrot.slane %v12497_v29, %v8765_v58 }
 0x228   :  { %v6401_v6 = vrot.slane %v12497_v29, %v8768_v30  ;;  %v6405_v46 = vrot.slane %v12497_v29, %v8772_v12  ;;  %v6409_v26 = vrot.slane %v12497_v29, %v8777_v22  ;;  %vm3701_vm6 = vcmp.gt.f32.partialorder %v12498_v35, 0.0 }
 0x229   :  { %v3717_v28 = vadd.f32 1.0, %v12498_v35  ;;  %v6885_v8 = vrot.slane %v6877_v60, %v8780_v25  ;;  %v6892_v33 = vrot.slane %v6878_v56, %v8780_v25  ;;  %v6926_v23 = vcombine.low %v6904_v31, %v6911_v38 }
 0x22a   :  { %v6927_v39 = vcombine.low %v6918_v37, %v6925_v44  ;;  %v6945_v21 = vcombine.low %v6365_v59, %v6369_v14  ;;  %v6946_v41 = vcombine.low %v6373_v61, %v6377_v13  ;;  %v3794_v43 = vpop.permute.xlu0 %3793  ;;  %v6953_v2 = vrot.slane %v6943_v20, %v8780_v25  ;;  %v12499_v44 = vld [vmem:[#allocation44_spill] sm:$0xff] }
 0x22b   :  { %v6960_v45 = vrot.slane %v6944_v62, %v8780_v25  ;;  %v6992_v19 = vcombine.low %v6381_v36, %v6385_v40  ;;  %v6993_v18 = vcombine.low %v6389_v32, %v6393_v49  ;;  %v10633_v29 = vmul.f32 %v10506_v50, %v10265_v42  ;;  %v10635_v9 = vpop.permute.xlu1 %4026  ;;  %v12501_v61 = vld [vmem:[#allocation24_spill] sm:$0xff] }
 0x22c   :  { %v10637_v60 = vcombine.low %v6836_v5, %v6843_v10  ;;  %v6994_v56 = vcombine.low %v6397_v54, %v6401_v6  ;;  %v6995_v31 = vcombine.low %v6405_v46, %v6409_v26  ;;  %v10641_v38 = vmul.f32 %v10533_v17, %v10268_v16 }
 0x22d   :  { %v10644_v37 = vmul.f32 %v4015_v4, %v10271_v51  ;;  %v10649_v59 = vsel %vm3701_vm6, %v3717_v28, %v12499_v44  ;;  %v10651_v42 = vcombine.low %v6885_v8, %v6892_v33  ;;  %v6934_v50 = vrot.slane %v6926_v23, %v8780_v25 }
 0x22e   :  { %12500 = vst [vmem:[#allocation88_spill] sm:$0xff] %v10649_v59  ;;  %v6941_v5 = vrot.slane %v6927_v39, %v8780_v25  ;;  %v6967_v10 = vrot.slane %v6945_v21, %v8780_v25  ;;  %v6974_v14 = vrot.slane %v6946_v41, %v8780_v25  ;;  %v3987_v16 = vpop.permute.xlu0 %3986  ;;  %v10657_v17 = vcombine.low %v6953_v2, %v6960_v45  ;;  %v12519_v59 = vld [vmem:[#allocation22_spill] sm:$0xff] }
 0x22f   :  { %v7002_v51 = vrot.slane %v6992_v19, %v8780_v25  ;;  %v7009_v4 = vrot.slane %v6993_v18, %v8780_v25  ;;  %v6413_v13 = vrot.slane %v12501_v61, %v8752_v0  ;;  %v10663_v33 = vpop.permute.xlu1 %4030  ;;  %v4064_v23 = vmul.f32 %v3987_v16, %v10319_v48 }
 0x230   :  { %v7016_v39 = vrot.slane %v6994_v56, %v8780_v25  ;;  %v7023_v21 = vrot.slane %v6995_v31, %v8780_v25  ;;  %v6417_v41 = vrot.slane %v12501_v61, %v8755_v11  ;;  %v6421_v2 = vrot.slane %v12501_v61, %v8758_v63  ;;  %v12502_v56 = vld [vmem:[#allocation90_spill] sm:$0xff] }
 0x231   :  { %v6425_v18 = vrot.slane %v12501_v61, %v8761_v24  ;;  %v6429_v19 = vrot.slane %v12501_v61, %v8765_v58  ;;  %v6433_v45 = vrot.slane %v12501_v61, %v8768_v30  ;;  %v10680_v48 = vmul.f32 %v10591_v27, %v10274_v55 }
 0x232   :  { %v10683_v20 = vsub.f32 %v10020_v1, %v4064_v23  ;;  %v6437_v62 = vrot.slane %v12501_v61, %v8772_v12  ;;  %v6441_v36 = vrot.slane %v12501_v61, %v8777_v22  ;;  %v3991_v40 = vpop.permute.xlu0 %3990  ;;  %v10689_v32 = vcombine.low %v6934_v50, %v6941_v5 }
 0x233   :  { %v6976_v49 = vcombine.low %v6967_v10, %v6974_v14  ;;  %v6983_v54 = vrot.slane %v10657_v17, %v8780_v25  ;;  %v7024_v6 = vcombine.low %v7002_v51, %v7009_v4  ;;  %v3868_v55 = vmul.f32 %v3794_v43, %v10313_v3  ;;  %v10696_v26 = vpop.permute.xlu1 %4034 }
 0x234   :  { %v4113_v27 = vand.u32 2147483647, %v10683_v20  ;;  %v4065_v1 = vmul.f32 %v3991_v40, %v10331_v57  ;;  %v7025_v46 = vcombine.low %v7016_v39, %v7023_v21  ;;  %v7041_v35 = vcombine.low %v6413_v13, %v6417_v41 }
 0x235   :  { %v7042_v28 = vcombine.low %v6421_v2, %v6425_v18  ;;  %v7043_v8 = vcombine.low %v6429_v19, %v6433_v45  ;;  %v6445_v31 = vrot.slane %v12502_v56, %v8752_v0  ;;  %v7044_v5 = vcombine.low %v6437_v62, %v6441_v36 }
 0x236   :  { %v4129_v44 = vsub.f32 0.0, %v4113_v27  ;;  %v10700_v50 = vsub.f32 %v3868_v55, %v4065_v1  ;;  %v6449_v3 = vrot.slane %v12502_v56, %v8755_v11  ;;  %v3798_v43 = vpop.permute.xlu0 %3797  ;;  %v6453_v57 = vrot.slane %v12502_v56, %v8758_v63 }
 0x237   :  { %v6457_v10 = vrot.slane %v12502_v56, %v8761_v24  ;;  %v6461_v14 = vrot.slane %v12502_v56, %v8765_v58  ;;  %v6465_v16 = vrot.slane %v12502_v56, %v8768_v30  ;;  %v6469_v4 = vrot.slane %v12502_v56, %v8772_v12  ;;  %v10723_v19 = vpop.permute.xlu1 %4038 }
 0x238   :  { %v4145_v17 = vmul.f32 1.442695, %v4129_v44  ;;  %v4114_v51 = vand.u32 2147483647, %v10700_v50  ;;  %v6473_v61 = vrot.slane %v12502_v56, %v8777_v22  ;;  %v6990_v13 = vrot.slane %v6976_v49, %v8780_v25 }
 0x239   :  { %v7032_v23 = vrot.slane %v7024_v6, %v8780_v25  ;;  %v7039_v39 = vrot.slane %v7025_v46, %v8780_v25  ;;  %v7051_v21 = vrot.slane %v7041_v35, %v8780_v25  ;;  %v7058_v2 = vrot.slane %v7042_v28, %v8780_v25  ;;  %v12503_v28 = vld [vmem:[#allocation45_spill] sm:$0xff] }
 0x23a   :  { %7986 = vpow2.f32 %v4145_v17  ;;  %v4130_v41 = vsub.f32 0.0, %v4114_v51  ;;  %v7065_v18 = vrot.slane %v7043_v8, %v8780_v25  ;;  %v3995_v45 = vpop.permute.xlu0 %3994  ;;  %v7072_v62 = vrot.slane %v7044_v5, %v8780_v25 }
 0x23b   :  { %v7090_v36 = vcombine.low %v6445_v31, %v6449_v3  ;;  %v7091_v40 = vcombine.low %v6453_v57, %v6457_v10  ;;  %v7092_v49 = vcombine.low %v6461_v14, %v6465_v16  ;;  %v3869_v6 = vmul.f32 %v3798_v43, %v10343_v52  ;;  %v12504_v3 = vld [vmem:[#allocation26_spill] sm:$0xff]  ;;  %v10757_v10 = vpop.permute.xlu1 %4042 }
 0x23c   :  { %v4147_v55 = vmul.f32 1.442695, %v4130_v41  ;;  %v4066_v27 = vmul.f32 %v3995_v45, %v10370_v15  ;;  %v7093_v1 = vcombine.low %v6469_v4, %v6473_v61  ;;  %v10730_v46 = vmul.f32 %v10615_v34, %v10295_v7  ;;  %v12505_v4 = vld [vmem:[#allocation81_spill] sm:$0xff] }
 0x23d   :  { %v10734_v35 = vmul.f32 %v10635_v9, %v10303_v53  ;;  %v10738_v56 = vcombine.low %v6983_v54, %v6990_v13  ;;  %v10742_v52 = vcombine.low %v7032_v23, %v7039_v39  ;;  %v10744_v15 = vcombine.low %v7051_v21, %v7058_v2 }
 0x23e   :  { %7988 = vpow2.f32 %v4147_v55  ;;  %v10740_v31 = vsub.f32 %v3869_v6, %v4066_v27  ;;  %v3802_v44 = vpop.permute.xlu0 %3801  ;;  %v10746_v5 = vcombine.low %v7065_v18, %v7072_v62  ;;  %v7100_v7 = vrot.slane %v7090_v36, %v8780_v25  ;;  %v12506_v36 = vld [vmem:[#allocation21_spill] sm:$0xff] }
 0x23f   :  { %v7107_v53 = vrot.slane %v7091_v40, %v8780_v25  ;;  %v7114_v9 = vrot.slane %v7092_v49, %v8780_v25  ;;  %v7121_v54 = vrot.slane %v7093_v1, %v8780_v25  ;;  %v6477_v43 = vrot.slane %v12504_v3, %v8752_v0  ;;  %v12507_v49 = vld [vmem:[#allocation86_spill] sm:$0xff] }
 0x240   :  { %v4115_v34 = vand.u32 2147483647, %v10740_v31  ;;  %v6481_v57 = vrot.slane %v12504_v3, %v8755_v11  ;;  %v6485_v14 = vrot.slane %v12504_v3, %v8758_v63  ;;  %v6489_v16 = vrot.slane %v12504_v3, %v8761_v24 }
 0x241   :  { %v6493_v17 = vrot.slane %v12504_v3, %v8765_v58  ;;  %v6497_v51 = vrot.slane %v12504_v3, %v8768_v30  ;;  %v10769_v61 = vmul.f32 %v10663_v33, %v12505_v4  ;;  %v6501_v23 = vrot.slane %v12504_v3, %v8772_v12 }
 0x242   :  { %v4131_v13 = vsub.f32 0.0, %v4115_v34  ;;  %v6505_v39 = vrot.slane %v12504_v3, %v8777_v22  ;;  %v3999_v41 = vpop.permute.xlu0 %3998  ;;  %v7081_v2 = vrot.slane %v10744_v15, %v8780_v25  ;;  %v7088_v18 = vrot.slane %v10746_v5, %v8780_v25  ;;  %v12508_v5 = vld [vmem:[#allocation99_spill] sm:$0xff] }
 0x243   :  { %v10780_v45 = vcombine.low %v7100_v7, %v7107_v53  ;;  %v3870_v40 = vmul.f32 %v3802_v44, %v12506_v36  ;;  %v4067_v55 = vmul.f32 %v3999_v41, %v12507_v49  ;;  %v10784_v6 = vcombine.low %v7114_v9, %v7121_v54  ;;  %v10790_v53 = vpop.permute.xlu1 %4046 }
 0x244   :  { %v7987_v33 = vpop.eup %7986  ;;  %v4149_v62 = vmul.f32 1.442695, %v4131_v13  ;;  %v7139_v1 = vcombine.low %v6477_v43, %v6481_v57  ;;  %v7140_v34 = vcombine.low %v6485_v14, %v6489_v16  ;;  %v7141_v3 = vcombine.low %v6493_v17, %v6497_v51  ;;  %v12509_v14 = vld [vmem:[#allocation58_spill] sm:$0xff] }
 0x245   :  { %v4177_v27 = vadd.f32 1.0, %v7987_v33  ;;  %v10786_v4 = vsub.f32 %v3870_v40, %v4067_v55  ;;  %v7142_v15 = vcombine.low %v6501_v23, %v6505_v39  ;;  %v6509_v7 = vrot.slane %v12508_v5, %v8752_v0 }
 0x246   :  { %7990 = vpow2.f32 %v4149_v62  ;;  %v4003_v13 = vpop.permute.xlu0 %4002  ;;  %v6513_v44 = vrot.slane %v12508_v5, %v8755_v11  ;;  %v6517_v9 = vrot.slane %v12508_v5, %v8758_v63  ;;  %v6521_v54 = vrot.slane %v12508_v5, %v8761_v24 }
 0x247   :  { %7992 = vlog2.f32 %v4177_v27  ;;  %v4116_v57 = vand.u32 2147483647, %v10786_v4  ;;  %v4068_v16 = vmul.f32 %v4003_v13, %v12509_v14  ;;  %v6525_v17 = vrot.slane %v12508_v5, %v8765_v58 }
 0x248   :  { %v7989_v43 = vpop.eup %7988  ;;  %v6529_v51 = vrot.slane %v12508_v5, %v8768_v30  ;;  %v7149_v39 = vrot.slane %v7139_v1, %v8780_v25  ;;  %v6533_v41 = vrot.slane %v12508_v5, %v8772_v12  ;;  %v6537_v33 = vrot.slane %v12508_v5, %v8777_v22 }
 0x249   :  { %v4178_v23 = vadd.f32 1.0, %v7989_v43  ;;  %v4132_v62 = vsub.f32 0.0, %v4116_v57  ;;  %v10810_v36 = vsub.f32 %v10633_v29, %v4068_v16  ;;  %v7156_v40 = vrot.slane %v7140_v34, %v8780_v25  ;;  %v12510_v43 = vld [vmem:[#allocation19_spill] sm:$0xff]  ;;  %v12511_v29 = vld [vmem:[#allocation48_spill] sm:$0xff] }
 0x24a   :  { %v7163_v49 = vrot.slane %v7141_v3, %v8780_v25  ;;  %v3810_v55 = vpop.permute.xlu0 %3809  ;;  %v7170_v27 = vrot.slane %v7142_v15, %v8780_v25  ;;  %v7188_v13 = vcombine.low %v6509_v7, %v6513_v44  ;;  %v7189_v1 = vcombine.low %v6517_v9, %v6521_v54  ;;  %v10825_v3 = vpop.permute.xlu1 %3540 }
 0x24b   :  { %7994 = vlog2.f32 %v4178_v23  ;;  %v10817_v14 = vmul.f32 %v10696_v26, %v12510_v43  ;;  %v4151_v8 = vmul.f32 1.442695, %v4132_v62  ;;  %v4117_v5 = vand.u32 2147483647, %v10810_v36 }
 0x24c   :  { %v7190_v57 = vcombine.low %v6525_v17, %v6529_v51  ;;  %v10822_v16 = vmul.f32 %v10723_v19, %v12511_v29  ;;  %v10827_v23 = vcombine.low %v7081_v2, %v7088_v18  ;;  %v7191_v15 = vcombine.low %v6533_v41, %v6537_v33  ;;  %v12513_v2 = vld [vmem:[#allocation69_spill] sm:$0xff]  ;;  %v12514_v41 = vld [vmem:[#allocation66_spill] sm:$0xff] }
 0x24d   :  { %7996 = vpow2.f32 %v4151_v8  ;;  %v4133_v7 = vsub.f32 0.0, %v4117_v5  ;;  %v7130_v26 = vrot.slane %v10780_v45, %v8780_v25  ;;  %v7137_v44 = vrot.slane %v10784_v6, %v8780_v25  ;;  %v12515_v6 = vld [vmem:[#allocation7_spill] sm:$0xff] }
 0x24e   :  { %12512 = vst [vmem:[#allocation8_spill] sm:$0xff] %v10827_v23  ;;  %v4007_v9 = vpop.permute.xlu0 %4006  ;;  %v7171_v54 = vcombine.low %v7149_v39, %v7156_v40  ;;  %v7172_v17 = vcombine.low %v7163_v49, %v7170_v27  ;;  %v7198_v19 = vrot.slane %v7188_v13, %v8780_v25  ;;  %v7205_v51 = vrot.slane %v7189_v1, %v8780_v25  ;;  %v12516_v1 = vld [vmem:[#allocation72_spill] sm:$0xff] }
 0x24f   :  { %v4153_v43 = vmul.f32 1.442695, %v4133_v7  ;;  %v3872_v18 = vmul.f32 %v3810_v55, %v12513_v2  ;;  %v4069_v8 = vmul.f32 %v4007_v9, %v12514_v41  ;;  %v7212_v33 = vrot.slane %v7190_v57, %v8780_v25 }
 0x250   :  { %v7991_v62 = vpop.eup %7990  ;;  %v7219_v29 = vrot.slane %v7191_v15, %v8780_v25  ;;  %v2592_v39 = vrot.slane %v12515_v6, %v8752_v0  ;;  %v2596_v40 = vrot.slane %v12515_v6, %v8755_v11  ;;  %v2600_v55 = vrot.slane %v12515_v6, %v8758_v63  ;;  %v10853_v15 = vpop.permute.xlu1 %3546 }
 0x251   :  { %v7993_v5 = vpop.eup %7992  ;;  %v4179_v45 = vadd.f32 1.0, %v7991_v62  ;;  %7998 = vpow2.f32 %v4153_v43  ;;  %v10843_v49 = vsub.f32 %v3872_v18, %v4069_v8  ;;  %v2604_v27 = vrot.slane %v12515_v6, %v8761_v24  ;;  %v12517_v43 = vld [vmem:[#allocation39_spill] sm:$0xff] }
 0x252   :  { %v4194_v13 = vmul.f32 0.6931472, %v7993_v5  ;;  %v10851_v57 = vmul.f32 %v10757_v10, %v12516_v1  ;;  %v3814_v7 = vpop.permute.xlu0 %3813  ;;  %v7179_v9 = vrot.slane %v7171_v54, %v8780_v25  ;;  %v7186_v18 = vrot.slane %v7172_v17, %v8780_v25 }
 0x253   :  { %8000 = vlog2.f32 %v4179_v45  ;;  %v4118_v62 = vand.u32 2147483647, %v10843_v49  ;;  %v3873_v2 = vmul.f32 %v3814_v7, %v12517_v43  ;;  %v7220_v41 = vcombine.low %v7198_v19, %v7205_v51 }
 0x254   :  { %v2608_v5 = vrot.slane %v12515_v6, %v8765_v58  ;;  %v2612_v10 = vrot.slane %v12515_v6, %v8768_v30  ;;  %v2616_v45 = vrot.slane %v12515_v6, %v8772_v12  ;;  %v2620_v54 = vrot.slane %v12515_v6, %v8777_v22 }
 0x255   :  { %v7995_v8 = vpop.eup %7994  ;;  %v4134_v1 = vsub.f32 0.0, %v4118_v62  ;;  %v7221_v34 = vcombine.low %v7212_v33, %v7219_v29  ;;  %v3288_v21 = vcombine.low %v2592_v39, %v2596_v40  ;;  %v3289_v7 = vcombine.low %v2600_v55, %v2604_v27  ;;  %v12520_v33 = vld [vmem:[#allocation94_spill] sm:$0xff] }
 0x256   :  { %v12518_v17 = vmin.f32 %v10683_v20, 0.0  ;;  %v4099_v51 = vmin.f32 %v10740_v31, 0.0  ;;  %v10871_v43 = vsub.f32 %v3873_v2, %v10641_v38  ;;  %v3818_v58 = vpop.permute.xlu0 %3817  ;;  %v10873_v30 = vcombine.low %v7130_v26, %v7137_v44  ;;  %v10883_v20 = vpop.permute.xlu1 %3552 }
 0x257   :  { %v7997_v23 = vpop.eup %7996  ;;  %v4196_v12 = vmul.f32 0.6931472, %v7995_v8  ;;  %v10877_v6 = vmul.f32 %v10790_v53, %v12519_v59  ;;  %v10881_v39 = vcombine.low %v7179_v9, %v7186_v18  ;;  %v4155_v31 = vmul.f32 1.442695, %v4134_v1 }
 0x258   :  { %v4225_v19 = vsub.f32 %v12518_v17, %v4194_v13  ;;  %v4119_v38 = vand.u32 2147483647, %v10871_v43  ;;  %v3290_v40 = vcombine.low %v2608_v5, %v2612_v10  ;;  %v3291_v55 = vcombine.low %v2616_v45, %v2620_v54  ;;  %v12523_v5 = vld [vmem:[#allocation96_spill] sm:$0xff]  ;;  %v12525_v17 = vld [vmem:[#allocation98_spill] sm:$0xff] }
 0x259   :  { %12521 = vst [vmem:[#allocation64_spill] sm:$0xff] %v10881_v39  ;;  %v7228_v26 = vrot.slane %v7220_v41, %v8780_v25  ;;  %v7235_v44 = vrot.slane %v7221_v34, %v8780_v25  ;;  %v3298_v27 = vrot.slane %v3288_v21, %v8780_v25  ;;  %v3305_v59 = vrot.slane %v3289_v7, %v8780_v25  ;;  %v12524_v34 = vld [vmem:[#allocation42_spill] sm:$0xff] }
 0x25a   :  { %v4257_v53 = vcombine.high %v4225_v19, %v4225_v19  ;;  %v4180_v9 = vadd.f32 1.0, %v7997_v23  ;;  %v4135_v62 = vsub.f32 0.0, %v4119_v38  ;;  %v3822_v2 = vpop.permute.xlu0 %3821  ;;  %v12522_v8 = vmin.f32 %v10700_v50, 0.0 }
 0x25b   :  { %v7999_v18 = vpop.eup %7998  ;;  %v3874_v45 = vmul.f32 %v3818_v58, %v12524_v34  ;;  %v4264_v54 = vrot.slane %v4225_v19, %v8780_v25  ;;  %8002 = vpow2.f32 %v4155_v31  ;;  %v3312_v7 = vrot.slane %v3290_v40, %v8780_v25  ;;  %v10909_v19 = vpop.permute.xlu1 %3558 }
 0x25c   :  { %v4226_v1 = vsub.f32 %v12522_v8, %v4196_v12  ;;  %v3319_v23 = vrot.slane %v3291_v55, %v8780_v25  ;;  %v10902_v50 = vcombine.low %v7228_v26, %v7235_v44  ;;  %v10904_v12 = vcombine.low %v3298_v27, %v3305_v59  ;;  %12529 = vst [vmem:[#allocation16_spill] sm:$0xff] %v10909_v19  ;;  %v12530_v26 = vld [vmem:[#allocation29_spill] sm:$0xff]  ;;  %v12531_v59 = vld [vmem:[#allocation51_spill] sm:$0xff] }
 0x25d   :  { %v8001_v21 = vpop.eup %8000  ;;  %v4271_v58 = vrot.slane %v4257_v53, %v8780_v25  ;;  %8004 = vlog2.f32 %v4180_v9  ;;  %v4157_v31 = vmul.f32 1.442695, %v4135_v62  ;;  %v4181_v55 = vadd.f32 1.0, %v7999_v18  ;;  %v12547_v8 = vld [vmem:[#allocation77_spill] sm:$0xff] }
 0x25e   :  { %12526 = vst [vmem:[#allocation80_spill] sm:$0xff] %v10902_v50  ;;  %12527 = vst [vmem:[#allocation41_spill] sm:$0xff] %v10904_v12  ;;  %v4198_v34 = vmul.f32 0.6931472, %v8001_v21  ;;  %v3826_v40 = vpop.permute.xlu0 %3825  ;;  %v4306_v29 = vcombine.high %v4226_v1, %v4226_v1  ;;  %v10912_v41 = vsub.f32 %v3874_v45, %v10644_v37  ;;  %v3875_v44 = vmul.f32 %v3822_v2, %v12530_v26  ;;  %v12551_v19 = vld [vmem:[#allocation93_spill] sm:$0xff] }
 0x25f   :  { %v4272_v27 = vcombine.high %v4264_v54, %v4264_v54  ;;  %8006 = vpow2.f32 %v4157_v31  ;;  %v3876_v38 = vmul.f32 %v3826_v40, %v12531_v59  ;;  %v10916_v10 = vcombine.low %v3312_v7, %v3319_v23 }
 0x260   :  { %v4313_v53 = vrot.slane %v4226_v1, %v8780_v25  ;;  %v4120_v62 = vand.u32 2147483647, %v10912_v41  ;;  %v4273_v37 = vcombine.high %v4271_v58, %v4271_v58  ;;  %v4227_v45 = vsub.f32 %v4099_v51, %v4198_v34 }
 0x261   :  { %12532 = vst [vmem:[#allocation6_spill] sm:$0xff] %v10916_v10  ;;  %v10926_v31 = vsub.f32 %v3875_v44, %v10680_v48  ;;  %v4320_v7 = vrot.slane %v4306_v29, %v8780_v25  ;;  %8008 = vlog2.f32 %v4181_v55  ;;  %v4294_v26 = vrot.slane %v4272_v27, %v8780_v25 }
 0x262   :  { %v4136_v23 = vsub.f32 0.0, %v4120_v62  ;;  %v3830_v1 = vpop.permute.xlu0 %3829  ;;  %v10933_v59 = vsub.f32 %v3876_v38, %v10730_v46  ;;  %v4321_v34 = vcombine.high %v4313_v53, %v4313_v53  ;;  %v4280_v40 = vrot.slane %v4264_v54, %v8780_v25  ;;  %v12534_v38 = vld [vmem:[#allocation85_spill] sm:$0xff] }
 0x263   :  { %v4121_v29 = vand.u32 2147483647, %v10926_v31  ;;  %v4301_v27 = vrot.slane %v4273_v37, %v8780_v25  ;;  %v4355_v46 = vcombine.high %v4227_v45, %v4227_v45  ;;  %v3877_v18 = vmul.f32 %v3830_v1, %v12534_v38 }
 0x264   :  { %v4159_v44 = vmul.f32 1.442695, %v4136_v23  ;;  %v4322_v21 = vcombine.high %v4320_v7, %v4320_v7  ;;  %v4287_v23 = vrot.slane %v4271_v58, %v8780_v25  ;;  %v5041_v13 = vcombine.low %v4280_v40, %v4294_v26 }
 0x265   :  { %v8003_v62 = vpop.eup %8002  ;;  %v4137_v2 = vsub.f32 0.0, %v4121_v29  ;;  %v4122_v55 = vand.u32 2147483647, %v10933_v59  ;;  %v7681_v10 = vcombine.high %v4280_v40, %v4294_v26  ;;  %v10949_v54 = vrot.slane %v4321_v34, %v8780_v25 }
 0x266   :  { %v4182_v51 = vadd.f32 1.0, %v8003_v62  ;;  %8010 = vpow2.f32 %v4159_v44  ;;  %v4362_v37 = vrot.slane %v4227_v45, %v8780_v25  ;;  %v4369_v62 = vrot.slane %v4355_v46, %v8780_v25  ;;  %v3834_v34 = vpop.permute.xlu0 %3833 }
 0x267   :  { %v8005_v48 = vpop.eup %8004  ;;  %v4161_v44 = vmul.f32 1.442695, %v4137_v2  ;;  %v4138_v29 = vsub.f32 0.0, %v4122_v55  ;;  %v10954_v38 = vsub.f32 %v3877_v18, %v10734_v35  ;;  %v5043_v58 = vcombine.low %v4287_v23, %v4301_v27 }
 0x268   :  { %8012 = vlog2.f32 %v4182_v51  ;;  %v10957_v12 = vrot.slane %v4313_v53, %v8780_v25  ;;  %v10960_v40 = vrot.slane %v4322_v21, %v8780_v25  ;;  %v4200_v26 = vmul.f32 0.6931472, %v8005_v48  ;;  %v12535_v48 = vld [vmem:[#allocation27_spill] sm:$0xff] }
 0x269   :  { %v8007_v1 = vpop.eup %8006  ;;  %v7682_v63 = vcombine.high %v4287_v23, %v4301_v27  ;;  %8014 = vpow2.f32 %v4161_v44  ;;  %v4163_v51 = vmul.f32 1.442695, %v4138_v29  ;;  %v10963_v2 = vrot.slane %v4320_v7, %v8780_v25 }
 0x26a   :  { %v4183_v45 = vadd.f32 1.0, %v8007_v1  ;;  %v4370_v18 = vcombine.high %v4362_v37, %v4362_v37  ;;  %v4371_v55 = vcombine.high %v4369_v62, %v4369_v62  ;;  %v4123_v21 = vand.u32 2147483647, %v10954_v38 }
 0x26b   :  { %v8009_v24 = vpop.eup %8008  ;;  %v3878_v27 = vmul.f32 %v3834_v34, %v12535_v48  ;;  %v12536_v23 = vmin.f32 %v10786_v4, 0.0  ;;  %v10980_v0 = vrot.slane %v4362_v37, %v8780_v25  ;;  %v5058_v7 = vrot.slane %v7681_v10, %v8780_v25 }
 0x26c   :  { %8016 = vlog2.f32 %v4183_v45  ;;  %v4202_v29 = vmul.f32 0.6931472, %v8009_v24  ;;  %v4139_v53 = vsub.f32 0.0, %v4123_v21  ;;  %v5051_v45 = vrot.slane %v5041_v13, %v8780_v25 }
 0x26d   :  { %v4228_v1 = vsub.f32 %v12536_v23, %v4200_v26  ;;  %8018 = vpow2.f32 %v4163_v51  ;;  %v10983_v34 = vrot.slane %v4370_v18, %v8780_v25  ;;  %v10988_v4 = vrot.slane %v4371_v55, %v8780_v25 }
 0x26e   :  { %v4165_v24 = vmul.f32 1.442695, %v4139_v53  ;;  %v10991_v51 = vsub.f32 %v3878_v27, %v10769_v61  ;;  %v5065_v23 = vrot.slane %v5043_v58, %v8780_v25  ;;  %v5072_v18 = vrot.slane %v7682_v63, %v8780_v25  ;;  %v3838_v53 = vpop.permute.xlu0 %3837 }
 0x26f   :  { %v4404_v21 = vcombine.high %v4228_v1, %v4228_v1  ;;  %v4411_v37 = vrot.slane %v4228_v1, %v8780_v25  ;;  %v10997_v48 = vrot.slane %v4369_v62, %v8780_v25  ;;  %v12537_v10 = vmin.f32 %v10810_v36, 0.0 }
 0x270   :  { %v8011_v35 = vpop.eup %8010  ;;  %v5073_v1 = vcombine.low %v5051_v45, %v5058_v7  ;;  %v4124_v36 = vand.u32 2147483647, %v10991_v51  ;;  %v5074_v58 = vcombine.low %v5065_v23, %v5072_v18  ;;  %v12539_v63 = vmin.f32 %v10843_v49, 0.0 }
 0x271   :  { %v4184_v26 = vadd.f32 1.0, %v8011_v35  ;;  %v4229_v55 = vsub.f32 %v12537_v10, %v4202_v29  ;;  %v4418_v29 = vrot.slane %v4404_v21, %v8780_v25  ;;  %v12538_v35 = vld [vmem:[#allocation71_spill] sm:$0xff]  ;;  %v11022_v18 = vrot.slane %v4411_v37, %v8780_v25 }
 0x272   :  { %v8013_v13 = vpop.eup %8012  ;;  %v3879_v46 = vmul.f32 %v3838_v53, %v12538_v35  ;;  %v4140_v45 = vsub.f32 0.0, %v4124_v36  ;;  %v5081_v62 = vrot.slane %v5073_v1, %v8780_v25  ;;  %vm12595_vm15 = vcmask 589312  }
 0x273   :  { %8020 = vlog2.f32 %v4184_v26  ;;  %v4204_v27 = vmul.f32 0.6931472, %v8013_v13  ;;  %v8015_v44 = vpop.eup %8014  ;;  %v4419_v26 = vcombine.high %v4411_v37, %v4411_v37  ;;  %v4453_v13 = vcombine.high %v4229_v55, %v4229_v55 }
 0x274   :  { %8022 = vpow2.f32 %v4165_v24  ;;  %v4185_v10 = vadd.f32 1.0, %v8015_v44  ;;  %v4460_v7 = vrot.slane %v4229_v55, %v8780_v25  ;;  %v5088_v24 = vrot.slane %v5074_v58, %v8780_v25 }
 0x275   :  { %v4230_v11 = vsub.f32 %v12539_v63, %v4204_v27  ;;  %v11017_v23 = vsub.f32 %v3879_v46, %v10817_v14  ;;  %v4167_v35 = vmul.f32 1.442695, %v4140_v45  ;;  %v4420_v53 = vcombine.high %v4418_v29, %v4418_v29  ;;  %v12546_v14 = vld [vmem:[#allocation91_spill] sm:$0xff] }
 0x276   :  { %v8017_v61 = vpop.eup %8016  ;;  %8024 = vlog2.f32 %v4185_v10  ;;  %v11025_v36 = vrot.slane %v4419_v26, %v8780_v25  ;;  %v5089_v27 = vcombine.low %v5081_v62, %v5088_v24  ;;  %v4467_v1 = vrot.slane %v4453_v13, %v8780_v25 }
 0x277   :  { %v8019_v21 = vpop.eup %8018  ;;  %v4206_v55 = vmul.f32 0.6931472, %v8017_v61  ;;  %v4468_v63 = vcombine.high %v4460_v7, %v4460_v7  ;;  %8026 = vpow2.f32 %v4167_v35  ;;  %v4502_v46 = vcombine.high %v4230_v11, %v4230_v11 }
 0x278   :  { %v4186_v49 = vadd.f32 1.0, %v8019_v21  ;;  %5826 = vperm.xlu0 %7730, %v5089_v27   ;;  %v4125_v37 = vand.u32 2147483647, %v11017_v23  ;;  %v12540_v61 = vcombine.low %v10957_v12, %v10949_v54  ;;  %v12541_v10 = vmin.f32 %v10871_v43, 0.0 }
 0x279   :  { %v12542_v13 = vcombine.high %v10957_v12, %v10949_v54  ;;  %v12543_v24 = vcombine.low %v10963_v2, %v10960_v40  ;;  %v12544_v35 = vcombine.high %v10963_v2, %v10960_v40  ;;  %v11052_v43 = vrot.slane %v4420_v53, %v8780_v25 }
 0x27a   :  { %8028 = vlog2.f32 %v4186_v49  ;;  %v5100_v58 = vrot.slane %v12540_v61, %v8780_v25  ;;  %v4231_v62 = vsub.f32 %v12541_v10, %v4206_v55  ;;  %v11049_v61 = vrot.slane %v4418_v29, %v8780_v25  ;;  %v3842_v55 = vpop.permute.xlu0 %3841 }
 0x27b   :  { %v5107_v45 = vrot.slane %v12542_v13, %v8780_v25  ;;  %v5114_v21 = vrot.slane %v12543_v24, %v8780_v25  ;;  %v5121_v49 = vrot.slane %v12544_v35, %v8780_v25  ;;  %v4469_v10 = vcombine.high %v4467_v1, %v4467_v1 }
 0x27c   :  { %v4509_v13 = vrot.slane %v4230_v11, %v8780_v25  ;;  %v4141_v44 = vsub.f32 0.0, %v4125_v37  ;;  %v11060_v2 = vrot.slane %v4468_v63, %v8780_v25  ;;  %v4516_v29 = vrot.slane %v4502_v46, %v8780_v25  ;;  %7483 = vperm.xlu0 %7730, %v12546_v14  }
 0x27d   :  { %v8021_v26 = vpop.eup %8020  ;;  %v12545_v53 = vmin.f32 %v10912_v41, 0.0  ;;  %v5122_v12 = vcombine.low %v5100_v58, %v5107_v45  ;;  %v5123_v22 = vcombine.low %v5114_v21, %v5121_v49  ;;  %v11074_v41 = vrot.slane %v4469_v10, %v8780_v25 }
 0x27e   :  { %v8023_v27 = vpop.eup %8022  ;;  %v4208_v54 = vmul.f32 0.6931472, %v8021_v26  ;;  %v4551_v26 = vcombine.high %v4231_v62, %v4231_v62  ;;  %v4169_v40 = vmul.f32 1.442695, %v4141_v44  ;;  %v4517_v14 = vcombine.high %v4509_v13, %v4509_v13  ;;  %v3846_v49 = vpop.permute.xlu0 %3845 }
 0x27f   :  { %v4187_v24 = vadd.f32 1.0, %v8023_v27  ;;  %v11069_v27 = vrot.slane %v4460_v7, %v8780_v25  ;;  %v11078_v58 = vrot.slane %v4467_v1, %v8780_v25  ;;  %v5130_v21 = vrot.slane %v5122_v12, %v8780_v25 }
 0x280   :  { %v4232_v35 = vsub.f32 %v12545_v53, %v4208_v54  ;;  %v8025_v11 = vpop.eup %8024  ;;  %v4558_v54 = vrot.slane %v4231_v62, %v8780_v25  ;;  %v5137_v7 = vrot.slane %v5123_v22, %v8780_v25  ;;  %v4518_v53 = vcombine.high %v4516_v29, %v4516_v29 }
 0x281   :  { %8030 = vlog2.f32 %v4187_v24  ;;  %v4210_v45 = vmul.f32 0.6931472, %v8025_v11  ;;  %v8027_v24 = vpop.eup %8026  ;;  %v4565_v46 = vrot.slane %v4551_v26, %v8780_v25  ;;  %v11092_v37 = vrot.slane %v4517_v14, %v8780_v25 }
 0x282   :  { %v4600_v63 = vcombine.high %v4232_v35, %v4232_v35  ;;  %v4607_v1 = vrot.slane %v4232_v35, %v8780_v25  ;;  %8032 = vpow2.f32 %v4169_v40  ;;  %v5138_v12 = vcombine.low %v5130_v21, %v5137_v7 }
 0x283   :  { %v4566_v44 = vcombine.high %v4558_v54, %v4558_v54  ;;  %v3880_v50 = vmul.f32 %v3842_v55, %v12547_v8  ;;  %v12548_v26 = vmin.f32 %v10926_v31, 0.0  ;;  %v11101_v40 = vrot.slane %v4509_v13, %v8780_v25 }
 0x284   :  { %v8029_v62 = vpop.eup %8028  ;;  %v4614_v11 = vrot.slane %v4600_v63, %v8780_v25  ;;  %5829 = vperm.xlu1 %7731, %v5138_v12   ;;  %v4567_v21 = vcombine.high %v4565_v46, %v4565_v46  ;;  %v4188_v7 = vadd.f32 1.0, %v8027_v24  ;;  %v11105_v22 = vrot.slane %v4516_v29, %v8780_v25 }
 0x285   :  { %v4233_v9 = vsub.f32 %v12548_v26, %v4210_v45  ;;  %v4212_v35 = vmul.f32 0.6931472, %v8029_v62  ;;  %v11108_v8 = vrot.slane %v4518_v53, %v8780_v25  ;;  %v4615_v55 = vcombine.high %v4607_v1, %v4607_v1  ;;  %v11110_v45 = vpop.permute.xlu0 %3849 }
 0x286   :  { %v4616_v31 = vcombine.high %v4614_v11, %v4614_v11  ;;  %v11117_v24 = vrot.slane %v4566_v44, %v8780_v25  ;;  %v11120_v29 = vsub.f32 %v3880_v50, %v10822_v16  ;;  %v11123_v53 = vrot.slane %v4558_v54, %v8780_v25  ;;  %v12553_v44 = vld [vmem:[#allocation79_spill] sm:$0xff] }
 0x287   :  { %v4649_v26 = vcombine.high %v4233_v9, %v4233_v9  ;;  %v12550_v14 = vmin.f32 %v10933_v59, 0.0  ;;  %v11129_v12 = vrot.slane %v4567_v21, %v8780_v25  ;;  %v4656_v13 = vrot.slane %v4233_v9, %v8780_v25 }
 0x288   :  { %12549 = vst [vmem:[#allocation76_spill] sm:$0xff] %v11120_v29  ;;  %7486 = vperm.xlu1 %7731, %v12551_v19   ;;  %8034 = vlog2.f32 %v4188_v7  ;;  %v3881_v39 = vmul.f32 %v3846_v49, %v12553_v44  ;;  %v11138_v59 = vrot.slane %v4615_v55, %v8780_v25  ;;  %v11141_v54 = vrot.slane %v4616_v31, %v8780_v25 }
 0x289   :  { %v4234_v10 = vsub.f32 %v12550_v14, %v4212_v35  ;;  %12552 = vst [vmem:[#allocation54_spill] sm:$0xff] %v11129_v12  ;;  %v11144_v19 = vrot.slane %v4565_v46, %v8780_v25  ;;  %v11149_v49 = vrot.slane %v4607_v1, %v8780_v25  ;;  %v4126_v35 = vand.u32 2147483647, %v11120_v29  ;;  %v3538_v46 = vpop.permute.xlu0 %3537  ;;  %v12563_v29 = vld [vmem:[#allocation28_spill] sm:$0xff] }
 0x28a   :  { %12554 = vst [vmem:[#allocation57_spill] sm:$0xff] %v11138_v59  ;;  %12555 = vst [vmem:[#allocation46_spill] sm:$0xff] %v11141_v54  ;;  %v11153_v7 = vrot.slane %v4614_v11, %v8780_v25  ;;  %v4663_v14 = vrot.slane %v4649_v26, %v8780_v25  ;;  %v12558_v31 = vmin.f32 %v10954_v38, 0.0  ;;  %v4664_v9 = vcombine.high %v4656_v13, %v4656_v13 }
 0x28b   :  { %v8031_v62 = vpop.eup %8030  ;;  %12556 = vst [vmem:[#allocation15_spill] sm:$0xff] %v11149_v49  ;;  %v4698_v55 = vcombine.high %v4234_v10, %v4234_v10  ;;  %v11164_v50 = vsub.f32 %v3881_v39, %v10851_v57  ;;  %v4142_v57 = vsub.f32 0.0, %v4126_v35  ;;  %v11178_v44 = vrot.slane %v4656_v13, %v8780_v25 }
 0x28c   :  { %v4214_v63 = vmul.f32 0.6931472, %v8031_v62  ;;  %v8033_v21 = vpop.eup %8032  ;;  %12557 = vst [vmem:[#allocation75_spill] sm:$0xff] %v11153_v7  ;;  %7489 = vperm.xlu1 %7731, %v10637_v60   ;;  %v4665_v39 = vcombine.high %v4663_v14, %v4663_v14  ;;  %v11183_v60 = vrot.slane %v4663_v14, %v8780_v25  ;;  %v12561_v14 = vcombine.low %v10997_v48, %v10988_v4 }
 0x28d   :  { %v4189_v1 = vadd.f32 1.0, %v8033_v21  ;;  %v4712_v11 = vrot.slane %v4698_v55, %v8780_v25  ;;  %v4127_v26 = vand.u32 2147483647, %v11164_v50  ;;  %v12560_v21 = vcombine.high %v10980_v0, %v10983_v34  ;;  %v11206_v54 = vpop.permute.xlu0 %3543 }
 0x28e   :  { %v4235_v62 = vsub.f32 %v12558_v31, %v4214_v63  ;;  %v4705_v31 = vrot.slane %v4234_v10, %v8780_v25  ;;  %v11186_v63 = vrot.slane %v4664_v9, %v8780_v25  ;;  %v12559_v10 = vcombine.low %v10980_v0, %v10983_v34 }
 0x28f   :  { %v5163_v9 = vrot.slane %v12561_v14, %v8780_v25  ;;  %v12562_v55 = vcombine.high %v10997_v48, %v10988_v4  ;;  %8036 = vlog2.f32 %v4189_v1  ;;  %v4171_v59 = vmul.f32 1.442695, %v4142_v57 }
 0x290   :  { %v4747_v38 = vcombine.high %v4235_v62, %v4235_v62  ;;  %7492 = vperm.xlu1 %7731, %v10651_v42   ;;  %v5149_v35 = vrot.slane %v12559_v10, %v8780_v25  ;;  %v4754_v13 = vrot.slane %v4235_v62, %v8780_v25  ;;  %v5156_v42 = vrot.slane %v12560_v21, %v8780_v25 }
 0x291   :  { %v5170_v16 = vrot.slane %v12562_v55, %v8780_v25  ;;  %v4713_v7 = vcombine.high %v4705_v31, %v4705_v31  ;;  %v4714_v0 = vcombine.high %v4712_v11, %v4712_v11  ;;  %v4143_v21 = vsub.f32 0.0, %v4127_v26 }
 0x292   :  { %v8035_v10 = vpop.eup %8034  ;;  %v4761_v34 = vrot.slane %v4747_v38, %v8780_v25  ;;  %v5171_v49 = vcombine.low %v5149_v35, %v5156_v42  ;;  %v11212_v14 = vrot.slane %v4665_v39, %v8780_v25  ;;  %v5433_v48 = vcombine.low %v11178_v44, %v11186_v63 }
 0x293   :  { %v7697_v4 = vcombine.high %v11178_v44, %v11186_v63  ;;  %v5172_v1 = vcombine.low %v5163_v9, %v5170_v16  ;;  %v4762_v55 = vcombine.high %v4754_v13, %v4754_v13  ;;  %v4216_v62 = vmul.f32 0.6931472, %v8035_v10 }
 0x294   :  { %7495 = vperm.xlu1 %7731, %v10689_v32   ;;  %v4173_v57 = vmul.f32 1.442695, %v4143_v21  ;;  %v3588_v12 = vrot.slane %v3538_v46, %v12563_v29  ;;  %v11220_v38 = vrot.slane %v4713_v7, %v8780_v25  ;;  %8038 = vpow2.f32 %v4171_v59  ;;  %v11232_v46 = vpop.permute.xlu0 %3549 }
 0x295   :  { %v5179_v32 = vrot.slane %v5171_v49, %v8780_v25  ;;  %v5186_v26 = vrot.slane %v5172_v1, %v8780_v25  ;;  %v11225_v39 = vrot.slane %v4714_v0, %v8780_v25  ;;  %v4763_v35 = vcombine.high %v4761_v34, %v4761_v34 }
 0x296   :  { %8040 = vpow2.f32 %v4173_v57  ;;  %v12564_v16 = vrot.slane %v12503_v28, %v9935_v47  ;;  %v11239_v7 = vrot.slane %v4705_v31, %v8780_v25  ;;  %v11242_v10 = vrot.slane %v4712_v11, %v8780_v25 }
 0x297   :  { %v5187_v9 = vcombine.low %v5179_v32, %v5186_v26  ;;  %v11245_v28 = vrot.slane %v4762_v55, %v8780_v25  ;;  %v4111_v0 = vmin.f32 %v11164_v50, 0.0  ;;  %v12566_v11 = vcombine.low %v11022_v18, %v11025_v36 }
 0x298   :  { %v3589_v42 = vsel %vm1934_vm1, %v3588_v12, %v12564_v16  ;;  %7498 = vperm.xlu1 %7731, %v10738_v56   ;;  %v12565_v56 = vmin.f32 %v10991_v51, 0.0  ;;  %v12567_v55 = vcombine.high %v11022_v18, %v11025_v36  ;;  %v11267_v32 = vrot.slane %v4754_v13, %v8780_v25  ;;  %v3556_v1 = vpop.permute.xlu0 %3555 }
 0x299   :  { %5832 = vperm.xlu0 %7730, %v5187_v9   ;;  %v5198_v31 = vrot.slane %v12566_v11, %v8780_v25  ;;  %v11270_v26 = vrot.slane %v4763_v35, %v8780_v25  ;;  %v8037_v16 = vpop.eup %8036  ;;  %v12568_v18 = vcombine.low %v11049_v61, %v11052_v43  ;;  %v12569_v9 = vcombine.high %v11049_v61, %v11052_v43 }
 0x29a   :  { %v4236_v12 = vsub.f32 %v12565_v56, %v4216_v62  ;;  %v5205_v51 = vrot.slane %v12567_v55, %v8780_v25  ;;  %v12570_v13 = vrot.slane %v10825_v3, %v12520_v33  ;;  %v11286_v55 = vrot.slane %v4761_v34, %v8780_v25  ;;  %v12571_v62 = vld [vmem:[#allocation88_spill] sm:$0xff] }
 0x29b   :  { %v5212_v36 = vrot.slane %v12568_v18, %v8780_v25  ;;  %v5219_v56 = vrot.slane %v12569_v9, %v8780_v25  ;;  %v3882_v18 = vmul.f32 %v11110_v45, %v12571_v62  ;;  %v12573_v34 = vcombine.low %v11069_v27, %v11060_v2 }
 0x29c   :  { %7501 = vperm.xlu1 %7731, %v10742_v52   ;;  %v5220_v11 = vcombine.low %v5198_v31, %v5205_v51  ;;  %v3594_v35 = vsel %vm1941_vm2, %v12570_v13, %v3589_v42  ;;  %v4796_v57 = vcombine.high %v4236_v12, %v4236_v12  ;;  %v12572_v31 = vld [vmem:[#allocation95_spill] sm:$0xff]  ;;  %v11303_v9 = vrot.slane %v4236_v12, %v8780_v25  ;;  %v12574_v13 = vld [vmem:[#allocation8_spill] sm:$0xff]  ;;  %v3562_v59 = vpop.permute.xlu0 %3561 }
 0x29d   :  { %v5221_v43 = vcombine.low %v5212_v36, %v5219_v56  ;;  %v3598_v3 = vrot.slane %v11206_v54, %v12572_v31  ;;  %v5247_v42 = vrot.slane %v12573_v34, %v8780_v25  ;;  %v4218_v45 = vmul.f32 0.6931472, %v8037_v16 }
 0x29e   :  { %v5228_v62 = vrot.slane %v5220_v11, %v8780_v25  ;;  %v8039_v36 = vpop.eup %8038  ;;  %v12575_v34 = vcombine.high %v11069_v27, %v11060_v2  ;;  %v12576_v12 = vcombine.low %v11078_v58, %v11074_v41  ;;  %v12577_v2 = vcombine.high %v11078_v58, %v11074_v41  ;;  %v12581_v58 = vld [vmem:[#allocation52_spill] sm:$0xff] }
 0x29f   :  { %v5235_v56 = vrot.slane %v5221_v43, %v8780_v25  ;;  %v3599_v54 = vsel %vm1948_vm3, %v3598_v3, %v3594_v35  ;;  %v11323_v43 = vsub.f32 %v3882_v18, %v10877_v6  ;;  %v12579_v11 = vmin.f32 %v11017_v23, 0.0  ;;  %v12580_v6 = vld [vmem:[#allocation97_spill] sm:$0xff] }
 0x2a0   :  { %7504 = vperm.xlu1 %7731, %v12574_v13   ;;  %v5254_v61 = vrot.slane %v12575_v34, %v8780_v25  ;;  %v5261_v51 = vrot.slane %v12576_v12, %v8780_v25  ;;  %v8041_v16 = vpop.eup %8040  ;;  %v11320_v13 = vrot.slane %v4796_v57, %v8780_v25  ;;  %v5268_v27 = vrot.slane %v12577_v2, %v8780_v25 }
 0x2a1   :  { %v4191_v35 = vadd.f32 1.0, %v8041_v16  ;;  %v5236_v3 = vcombine.low %v5228_v62, %v5235_v56  ;;  %v12578_v12 = vrot.slane %v10853_v15, %v12523_v5  ;;  %v4237_v57 = vsub.f32 %v12579_v11, %v4218_v45 }
 0x2a2   :  { %v5269_v34 = vcombine.low %v5247_v42, %v5254_v61  ;;  %v4190_v21 = vadd.f32 1.0, %v8039_v36  ;;  %v5270_v49 = vcombine.low %v5261_v51, %v5268_v27  ;;  %v3608_v18 = vrot.slane %v11232_v46, %v12580_v6 }
 0x2a3   :  { %v3604_v52 = vsel %vm1955_vm4, %v12578_v12, %v3599_v54  ;;  %8042 = vlog2.f32 %v4191_v35  ;;  %5835 = vperm.xlu0 %7730, %v5236_v3   ;;  %v3618_v61 = vrot.slane %v3556_v1, %v12581_v58  ;;  %v12582_v15 = vcombine.low %v11101_v40, %v11092_v37  ;;  %v12588_v54 = vld [vmem:[#allocation104_spill] sm:$0xff] }
 0x2a4   :  { %7507 = vperm.xlu1 %7731, %v10873_v30   ;;  %v5277_v41 = vrot.slane %v5269_v34, %v8780_v25  ;;  %v5284_v42 = vrot.slane %v5270_v49, %v8780_v25  ;;  %v3609_v51 = vsel %vm1962_vm5, %v3608_v18, %v3604_v52  ;;  %v12583_v46 = vcombine.high %v11101_v40, %v11092_v37  ;;  %v12591_v35 = vld [vmem:[#allocation64_spill] sm:$0xff] }
 0x2a5   :  { %v5296_v23 = vrot.slane %v12582_v15, %v8780_v25  ;;  %v12584_v45 = vcombine.low %v11105_v22, %v11108_v8  ;;  %v4128_v1 = vand.u32 2147483647, %v11323_v43  ;;  %v12585_v36 = vrot.slane %v10883_v20, %v12525_v17  ;;  %v12592_v34 = vld [vmem:[#allocation16_spill] sm:$0xff]  ;;  %v12598_v15 = vld [vmem:[#allocation54_spill] sm:$0xff] }
 0x2a6   :  { %v5303_v30 = vrot.slane %v12583_v46, %v8780_v25  ;;  %v12587_v49 = vcombine.high %v11105_v22, %v11108_v8  ;;  %v3628_v37 = vrot.slane %v3562_v59, %v12588_v54  ;;  %v5285_v40 = vcombine.low %v5277_v41, %v5284_v42  ;;  %v12593_v22 = vld [vmem:[#allocation106_spill] sm:$0xff] }
 0x2a7   :  { %v5310_v62 = vrot.slane %v12584_v45, %v8780_v25  ;;  %v3614_v56 = vsel %vm12586_vm13, %v12585_v36, %v3609_v51  ;;  %v12590_v2 = vcombine.low %v11123_v53, %v11117_v24  ;;  %v4811_v20 = vcombine.high %v11303_v9, %v11303_v9  ;;  %v12601_v36 = vld [vmem:[#allocation15_spill] sm:$0xff] }
 0x2a8   :  { %v5317_v52 = vrot.slane %v12587_v49, %v8780_v25  ;;  %v3619_v16 = vsel %vm12589_vm14, %v3618_v61, %v3614_v56  ;;  %v5318_v11 = vcombine.low %v5296_v23, %v5303_v30  ;;  %7510 = vperm.xlu1 %7731, %v12591_v35   ;;  %v12594_v8 = vrot.slane %v12592_v34, %v12593_v22  ;;  %v12602_v56 = vld [vmem:[#allocation57_spill] sm:$0xff]  ;;  %v12607_v34 = vld [vmem:[#allocation46_spill] sm:$0xff] }
 0x2a9   :  { %v5345_v27 = vrot.slane %v12590_v2, %v8780_v25  ;;  %v12596_v12 = vcombine.high %v11123_v53, %v11117_v24  ;;  %v4845_v41 = vcombine.high %v4237_v57, %v4237_v57  ;;  %5838 = vperm.xlu0 %7730, %v5285_v40   ;;  %vm12597_vm7 = vcmask 654912  }
 0x2aa   :  { %v5319_v3 = vcombine.low %v5310_v62, %v5317_v52  ;;  %v3624_v59 = vsel %vm12595_vm15, %v12594_v8, %v3619_v16  ;;  %v12599_v23 = vcombine.low %v11144_v19, %v12598_v15  ;;  %v12600_v51 = vcombine.high %v11144_v19, %v12598_v15  ;;  %v12605_v19 = vld [vmem:[#allocation80_spill] sm:$0xff] }
 0x2ab   :  { %v5352_v18 = vrot.slane %v12596_v12, %v8780_v25  ;;  %v11381_v61 = vsel %vm12597_vm7, %v3628_v37, %v3624_v59  ;;  %8044 = vlog2.f32 %v4190_v21  ;;  %v4144_v30 = vsub.f32 0.0, %v4128_v1 }
 0x2ac   :  { %v5359_v42 = vrot.slane %v12599_v23, %v8780_v25  ;;  %v5366_v46 = vrot.slane %v12600_v51, %v8780_v25  ;;  %v5326_v24 = vrot.slane %v5318_v11, %v8780_v25  ;;  %v5333_v53 = vrot.slane %v5319_v3, %v8780_v25  ;;  %7513 = vperm.xlu1 %7731, %v12605_v19   ;;  %v12606_v3 = vld [vmem:[#allocation75_spill] sm:$0xff] }
 0x2ad   :  { %v5367_v45 = vcombine.low %v5345_v27, %v5352_v18  ;;  %v12603_v49 = vcombine.low %v12601_v36, %v12602_v56  ;;  %v12604_v37 = vcombine.high %v12601_v36, %v12602_v56  ;;  %v4812_v21 = vcombine.high %v11320_v13, %v11320_v13  ;;  %v8043_v12 = vpop.eup %8042 }
 0x2ae   :  { %v5368_v62 = vcombine.low %v5359_v42, %v5366_v46  ;;  %v11406_v1 = vrot.slane %v11303_v9, %v8780_v25  ;;  %v11409_v16 = vrot.slane %v4811_v20, %v8780_v25  ;;  %v4852_v11 = vrot.slane %v4237_v57, %v8780_v25 }
 0x2af   :  { %v5394_v52 = vrot.slane %v12603_v49, %v8780_v25  ;;  %v5401_v40 = vrot.slane %v12604_v37, %v8780_v25  ;;  %v5334_v2 = vcombine.low %v5326_v24, %v5333_v53  ;;  %v5375_v27 = vrot.slane %v5367_v45, %v8780_v25 }
 0x2b0   :  { %v5382_v35 = vrot.slane %v5368_v62, %v8780_v25  ;;  %v12608_v8 = vcombine.low %v12606_v3, %v12607_v34  ;;  %v11420_v9 = vrot.slane %v11320_v13, %v8780_v25  ;;  %v4859_v20 = vrot.slane %v4845_v41, %v8780_v25 }
 0x2b1   :  { %v4175_v18 = vmul.f32 1.442695, %v4144_v30  ;;  %v12609_v57 = vcombine.high %v12606_v3, %v12607_v34  ;;  %v4222_v23 = vmul.f32 0.6931472, %v8043_v12  ;;  %5841 = vperm.xlu0 %7730, %v5334_v2   ;;  %v5416_v51 = vcombine.low %v5394_v52, %v5401_v40 }
 0x2b2   :  { %v5408_v59 = vrot.slane %v12608_v8, %v8780_v25  ;;  %v5383_v42 = vcombine.low %v5375_v27, %v5382_v35  ;;  %v5443_v46 = vrot.slane %v5433_v48, %v8780_v25  ;;  %v11432_v13 = vrot.slane %v4812_v21, %v8780_v25 }
 0x2b3   :  { %v5415_v15 = vrot.slane %v12609_v57, %v8780_v25  ;;  %v5580_v41 = vcombine.low %v11406_v1, %v11409_v16  ;;  %v7703_v30 = vcombine.high %v11406_v1, %v11409_v16  ;;  %v4860_v53 = vcombine.high %v4852_v11, %v4852_v11 }
 0x2b4   :  { %v4239_v45 = vsub.f32 %v4111_v0, %v4222_v23  ;;  %v5450_v62 = vrot.slane %v7697_v4, %v8780_v25  ;;  %v12610_v48 = vcombine.low %v11183_v60, %v11212_v14  ;;  %8046 = vpow2.f32 %v4175_v18 }
 0x2b5   :  { %v5417_v24 = vcombine.low %v5408_v59, %v5415_v15  ;;  %v5424_v56 = vrot.slane %v5416_v51, %v8780_v25  ;;  %v12611_v50 = vcombine.high %v11183_v60, %v11212_v14  ;;  %v4861_v52 = vcombine.high %v4859_v20, %v4859_v20  ;;  %5844 = vperm.xlu0 %7730, %v5383_v42   ;;  %v8045_v40 = vpop.eup %8044 }
 0x2b6   :  { %v5457_v36 = vrot.slane %v12610_v48, %v8780_v25  ;;  %v4943_v37 = vcombine.high %v4239_v45, %v4239_v45  ;;  %v5465_v44 = vcombine.low %v5443_v46, %v5450_v62  ;;  %v12612_v63 = vcombine.low %v11239_v7, %v11220_v38 }
 0x2b7   :  { %v5431_v49 = vrot.slane %v5417_v24, %v8780_v25  ;;  %v5464_v0 = vrot.slane %v12611_v50, %v8780_v25  ;;  %v12613_v1 = vcombine.high %v11239_v7, %v11220_v38  ;;  %v12614_v60 = vcombine.low %v11242_v10, %v11225_v39  ;;  %v12621_v50 = vld [vmem:[#allocation40_spill] sm:$0xff] }
 0x2b8   :  { %v5492_v4 = vrot.slane %v12612_v63, %v8780_v25  ;;  %v5582_v2 = vcombine.low %v11420_v9, %v11432_v13  ;;  %v4950_v27 = vrot.slane %v4239_v45, %v8780_v25  ;;  %v4957_v35 = vrot.slane %v4943_v37, %v8780_v25 }
 0x2b9   :  { %v5432_v19 = vcombine.low %v5424_v56, %v5431_v49  ;;  %v5466_v21 = vcombine.low %v5457_v36, %v5464_v0  ;;  %v5499_v16 = vrot.slane %v12613_v1, %v8780_v25  ;;  %v5506_v14 = vrot.slane %v12614_v60, %v8780_v25  ;;  %v12620_v49 = vld [vmem:[#allocation35_spill] sm:$0xff] }
 0x2ba   :  { %v5473_v3 = vrot.slane %v5465_v44, %v8780_v25  ;;  %v12615_v38 = vcombine.high %v11242_v10, %v11225_v39  ;;  %v12616_v59 = vcombine.low %v11267_v32, %v11245_v28  ;;  %v7704_v18 = vcombine.high %v11420_v9, %v11432_v13 }
 0x2bb   :  { %v5480_v34 = vrot.slane %v5466_v21, %v8780_v25  ;;  %v5514_v8 = vcombine.low %v5492_v4, %v5499_v16  ;;  %v11483_v57 = vrot.slane %v4852_v11, %v8780_v25  ;;  %v11486_v15 = vrot.slane %v4860_v53, %v8780_v25  ;;  %5847 = vperm.xlu0 %7730, %v5432_v19  }
 0x2bc   :  { %v5513_v7 = vrot.slane %v12615_v38, %v8780_v25  ;;  %v5541_v12 = vrot.slane %v12616_v59, %v8780_v25  ;;  %v11489_v23 = vrot.slane %v4861_v52, %v8780_v25  ;;  %v4220_v39 = vmul.f32 0.6931472, %v8045_v40 }
 0x2bd   :  { %v5481_v10 = vcombine.low %v5473_v3, %v5480_v34  ;;  %v12617_v51 = vcombine.high %v11267_v32, %v11245_v28  ;;  %v11496_v9 = vrot.slane %v4859_v20, %v8780_v25  ;;  %v4958_v11 = vcombine.high %v4950_v27, %v4950_v27 }
 0x2be   :  { %v5515_v42 = vcombine.low %v5506_v14, %v5513_v7  ;;  %v4959_v13 = vcombine.high %v4957_v35, %v4957_v35  ;;  %v5522_v24 = vrot.slane %v5514_v8, %v8780_v25  ;;  %v12618_v45 = vcombine.low %v11286_v55, %v11270_v26  ;;  %v8047_v52 = vpop.eup %8046  ;;  %v12624_v8 = vld [vmem:[#allocation36_spill] sm:$0xff] }
 0x2bf   :  { %v5548_v46 = vrot.slane %v12617_v51, %v8780_v25  ;;  %v12619_v48 = vcombine.high %v11286_v55, %v11270_v26  ;;  %v5629_v20 = vcombine.low %v11483_v57, %v11486_v15  ;;  %v7705_v36 = vcombine.high %v11483_v57, %v11486_v15  ;;  %5850 = vperm.xlu0 %7730, %v5481_v10   ;;  %v12622_v26 = vld [vmem:[#allocation76_spill] sm:$0xff]  ;;  %v12626_v10 = vld [vmem:[#allocation38_spill] sm:$0xff]  ;;  %v12640_v57 = vld [vmem:[#allocation49_spill] sm:$0xff] }
 0x2c0   :  { %v5529_v53 = vrot.slane %v5515_v42, %v8780_v25  ;;  %v5555_v62 = vrot.slane %v12618_v45, %v8780_v25  ;;  %v5631_v56 = vcombine.low %v11496_v9, %v11489_v23  ;;  %v6557_v0 = vrot.slane %v12621_v50, %v12620_v49 }
 0x2c1   :  { %v5562_v28 = vrot.slane %v12619_v48, %v8780_v25  ;;  %v5563_v32 = vcombine.low %v5541_v12, %v5548_v46  ;;  %v7706_v37 = vcombine.high %v11496_v9, %v11489_v23  ;;  %v12623_v55 = vmin.f32 %v12622_v26, 0.0 }
 0x2c2   :  { %v5530_v63 = vcombine.low %v5522_v24, %v5529_v53  ;;  %v11523_v40 = vrot.slane %v4958_v11, %v8780_v25  ;;  %v11526_v19 = vrot.slane %v4959_v13, %v8780_v25  ;;  %v5590_v1 = vrot.slane %v5580_v41, %v8780_v25  ;;  %v12627_v11 = vld [vmem:[#allocation32_spill] sm:$0xff]  ;;  %v12629_v24 = vld [vmem:[#allocation31_spill] sm:$0xff] }
 0x2c3   :  { %v11520_v44 = vsub.f32 %v12623_v55, %v4220_v39  ;;  %v5564_v4 = vcombine.low %v5555_v62, %v5562_v28  ;;  %v5571_v21 = vrot.slane %v5563_v32, %v8780_v25  ;;  %v5597_v60 = vrot.slane %v7703_v30, %v8780_v25  ;;  %v12625_v30 = vld [vmem:[#allocation37_spill] sm:$0xff]  ;;  %v12631_v62 = vld [vmem:[#allocation34_spill] sm:$0xff] }
 0x2c4   :  { %v5604_v14 = vrot.slane %v5582_v2, %v8780_v25  ;;  %v5611_v3 = vrot.slane %v7704_v18, %v8780_v25  ;;  %v11535_v34 = vrot.slane %v4950_v27, %v8780_v25  ;;  %v11538_v38 = vrot.slane %v4957_v35, %v8780_v25  ;;  %5853 = vperm.xlu0 %7730, %v5530_v63   ;;  %v12633_v28 = vld [vmem:[#allocation33_spill] sm:$0xff]  ;;  %v12635_v55 = vld [vmem:[#allocation6_spill] sm:$0xff] }
 0x2c5   :  { %v5578_v16 = vrot.slane %v5564_v4, %v8780_v25  ;;  %v11540_v7 = vadd.f32 1.0, %v8047_v52  ;;  %v6561_v41 = vrot.slane %v12621_v50, %v12624_v8  ;;  %v5612_v12 = vcombine.low %v5590_v1, %v5597_v60  ;;  %v12637_v4 = vld [vmem:[#allocation41_spill] sm:$0xff] }
 0x2c6   :  { %v5613_v39 = vcombine.low %v5604_v14, %v5611_v3  ;;  %v6565_v2 = vrot.slane %v12621_v50, %v12625_v30  ;;  %v5727_v18 = vcombine.low %v11535_v34, %v11523_v40  ;;  %v7709_v27 = vcombine.high %v11535_v34, %v11523_v40 }
 0x2c7   :  { %v5579_v59 = vcombine.low %v5571_v21, %v5578_v16  ;;  %v5729_v35 = vcombine.low %v11538_v38, %v11526_v19  ;;  %v6569_v42 = vrot.slane %v12621_v50, %v12626_v10  ;;  %v5620_v51 = vrot.slane %v5612_v12, %v8780_v25 }
 0x2c8   :  { %v5627_v46 = vrot.slane %v5613_v39, %v8780_v25  ;;  %v12628_v13 = vrot.slane %v12621_v50, %v12627_v11  ;;  %v12630_v53 = vrot.slane %v12621_v50, %v12629_v24  ;;  %v12632_v48 = vrot.slane %v12621_v50, %v12631_v62 }
 0x2c9   :  { %v12634_v32 = vrot.slane %v12621_v50, %v12633_v28  ;;  %v7710_v26 = vcombine.high %v11538_v38, %v11526_v19  ;;  %5856 = vperm.xlu0 %7730, %v5579_v59   ;;  %v12636_v63 = vrot.slane %v12635_v55, %v8780_v25  ;;  %v12638_v21 = vrot.slane %v12637_v4, %v8780_v25  ;;  %v12639_v50 = vld [vmem:[#allocation101_spill] sm:$0xff] }
 0x2ca   :  { %v7237_v45 = vcombine.low %v12630_v53, %v12628_v13  ;;  %v7239_v16 = vcombine.low %v6557_v0, %v6561_v41  ;;  %v7240_v60 = vcombine.low %v6565_v2, %v6569_v42  ;;  %v5628_v14 = vcombine.low %v5620_v51, %v5627_v46 }
 0x2cb   :  { %v7238_v52 = vcombine.low %v12634_v32, %v12632_v48  ;;  %v3336_v1 = vcombine.low %v12638_v21, %v12636_v63  ;;  %v2624_v39 = vrot.slane %v12639_v50, %v12629_v24  ;;  %v2628_v53 = vrot.slane %v12639_v50, %v12627_v11 }
 0x2cc   :  { %v7247_v3 = vrot.slane %v7237_v45, %v8780_v25  ;;  %v7261_v13 = vrot.slane %v7239_v16, %v8780_v25  ;;  %v7268_v59 = vrot.slane %v7240_v60, %v8780_v25  ;;  %v2632_v48 = vrot.slane %v12639_v50, %v12633_v28  ;;  %5859 = vperm.xlu1 %7731, %v5628_v14  }
 0x2cd   :  { %v7254_v12 = vrot.slane %v7238_v52, %v8780_v25  ;;  %v2636_v41 = vrot.slane %v12639_v50, %v12631_v62  ;;  %v2640_v2 = vrot.slane %v12639_v50, %v12620_v49  ;;  %v2644_v42 = vrot.slane %v12639_v50, %v12624_v8  ;;  %3567 = vperm.xlu0 %7730, %v3336_v1  }
 0x2ce   :  { %v7270_v51 = vcombine.low %v7261_v13, %v7268_v59  ;;  %v2648_v46 = vrot.slane %v12639_v50, %v12625_v30  ;;  %v2652_v45 = vrot.slane %v12639_v50, %v12626_v10  ;;  %v3337_v32 = vcombine.low %v2624_v39, %v2628_v53 }
 0x2cf   :  { %v7269_v0 = vcombine.low %v7247_v3, %v7254_v12  ;;  %v3338_v55 = vcombine.low %v2632_v48, %v2636_v41  ;;  %v3339_v63 = vcombine.low %v2640_v2, %v2644_v42  ;;  %v5639_v4 = vrot.slane %v5629_v20, %v8780_v25 }
 0x2d0   :  { %v7284_v21 = vrot.slane %v7270_v51, %v8780_v25  ;;  %v3340_v16 = vcombine.low %v2648_v46, %v2652_v45  ;;  %v3347_v60 = vrot.slane %v3337_v32, %v8780_v25  ;;  %v5646_v1 = vrot.slane %v7705_v36, %v8780_v25 }
 0x2d1   :  { %v7277_v52 = vrot.slane %v7269_v0, %v8780_v25  ;;  %v3354_v14 = vrot.slane %v3338_v55, %v8780_v25  ;;  %v3361_v3 = vrot.slane %v3339_v63, %v8780_v25  ;;  %v5653_v12 = vrot.slane %v5631_v56, %v8780_v25  ;;  %v12641_v63 = vld [vmem:[#allocation100_spill] sm:$0xff] }
 0x2d2   :  { %v5660_v20 = vrot.slane %v7706_v37, %v8780_v25  ;;  %v3368_v39 = vrot.slane %v3340_v16, %v8780_v25  ;;  %v5661_v13 = vcombine.low %v5639_v4, %v5646_v1  ;;  %v2656_v15 = vrot.slane %v12640_v57, %v12629_v24 }
 0x2d3   :  { %v7285_v50 = vcombine.low %v7277_v52, %v7284_v21  ;;  %v3369_v36 = vcombine.low %v3347_v60, %v3354_v14  ;;  %v2660_v53 = vrot.slane %v12640_v57, %v12627_v11  ;;  %v2664_v56 = vrot.slane %v12640_v57, %v12633_v28 }
 0x2d4   :  { %v5662_v59 = vcombine.low %v5653_v12, %v5660_v20  ;;  %v3370_v48 = vcombine.low %v3361_v3, %v3368_v39  ;;  %v5669_v23 = vrot.slane %v5661_v13, %v8780_v25  ;;  %v2668_v9 = vrot.slane %v12640_v57, %v12631_v62 }
 0x2d5   :  { %7516 = vperm.xlu0 %7730, %v7285_v50   ;;  %v2672_v37 = vrot.slane %v12640_v57, %v12620_v49  ;;  %v3377_v0 = vrot.slane %v3369_v36, %v8780_v25  ;;  %v2676_v2 = vrot.slane %v12640_v57, %v12624_v8  ;;  %v2680_v42 = vrot.slane %v12640_v57, %v12625_v30 }
 0x2d6   :  { %v5676_v41 = vrot.slane %v5662_v59, %v8780_v25  ;;  %v3384_v51 = vrot.slane %v3370_v48, %v8780_v25  ;;  %v2684_v46 = vrot.slane %v12640_v57, %v12626_v10  ;;  %v3386_v45 = vcombine.low %v2656_v15, %v2660_v53 }
 0x2d7   :  { %v3387_v32 = vcombine.low %v2664_v56, %v2668_v9  ;;  %v3388_v55 = vcombine.low %v2672_v37, %v2676_v2  ;;  %v6605_v4 = vrot.slane %v12641_v63, %v12629_v24  ;;  %v6609_v21 = vrot.slane %v12641_v63, %v12627_v11 }
 0x2d8   :  { %v5677_v52 = vcombine.low %v5669_v23, %v5676_v41  ;;  %v3385_v16 = vcombine.low %v3377_v0, %v3384_v51  ;;  %v3389_v60 = vcombine.low %v2680_v42, %v2684_v46  ;;  %v3396_v1 = vrot.slane %v3386_v45, %v8780_v25  ;;  %v12642_v45 = vld [vmem:[#allocation102_spill] sm:$0xff] }
 0x2d9   :  { %v3403_v14 = vrot.slane %v3387_v32, %v8780_v25  ;;  %v3410_v3 = vrot.slane %v3388_v55, %v8780_v25  ;;  %v6613_v12 = vrot.slane %v12641_v63, %v12633_v28  ;;  %v6617_v20 = vrot.slane %v12641_v63, %v12631_v62 }
 0x2da   :  { %5862 = vperm.xlu0 %7730, %v5677_v52   ;;  %v6621_v50 = vrot.slane %v12641_v63, %v12620_v49  ;;  %3570 = vperm.xlu1 %7731, %v3385_v16   ;;  %v3417_v39 = vrot.slane %v3389_v60, %v8780_v25  ;;  %v6625_v57 = vrot.slane %v12641_v63, %v12624_v8  ;;  %8048 = vlog2.f32 %v11540_v7 }
 0x2db   :  { %v3418_v13 = vcombine.low %v3396_v1, %v3403_v14  ;;  %v6629_v15 = vrot.slane %v12641_v63, %v12625_v30  ;;  %v6633_v36 = vrot.slane %v12641_v63, %v12626_v10  ;;  %v7335_v59 = vcombine.low %v6605_v4, %v6609_v21 }
 0x2dc   :  { %v7336_v53 = vcombine.low %v6613_v12, %v6617_v20  ;;  %v5737_v56 = vrot.slane %v5727_v18, %v8780_v25  ;;  %v3419_v48 = vcombine.low %v3410_v3, %v3417_v39  ;;  %v7337_v9 = vcombine.low %v6621_v50, %v6625_v57  ;;  %v12643_v39 = vld [vmem:[#allocation107_spill] sm:$0xff] }
 0x2dd   :  { %v3426_v23 = vrot.slane %v3418_v13, %v8780_v25  ;;  %v5744_v37 = vrot.slane %v7709_v27, %v8780_v25  ;;  %v7338_v0 = vcombine.low %v6629_v15, %v6633_v36  ;;  %v7345_v41 = vrot.slane %v7335_v59, %v8780_v25 }
 0x2de   :  { %v7352_v2 = vrot.slane %v7336_v53, %v8780_v25  ;;  %v5751_v42 = vrot.slane %v5729_v35, %v8780_v25  ;;  %v3433_v18 = vrot.slane %v3419_v48, %v8780_v25  ;;  %v7359_v51 = vrot.slane %v7337_v9, %v8780_v25 }
 0x2df   :  { %v5758_v40 = vrot.slane %v7710_v26, %v8780_v25  ;;  %v5759_v34 = vcombine.low %v5737_v56, %v5744_v37  ;;  %v7366_v27 = vrot.slane %v7338_v0, %v8780_v25  ;;  %v2720_v32 = vrot.slane %v12642_v45, %v12629_v24 }
 0x2e0   :  { %v7367_v46 = vcombine.low %v7345_v41, %v7352_v2  ;;  %v2724_v52 = vrot.slane %v12642_v45, %v12627_v11  ;;  %v3434_v35 = vcombine.low %v3426_v23, %v3433_v18  ;;  %v2728_v63 = vrot.slane %v12642_v45, %v12633_v28 }
 0x2e1   :  { %v5760_v55 = vcombine.low %v5751_v42, %v5758_v40  ;;  %v7368_v4 = vcombine.low %v7359_v51, %v7366_v27  ;;  %v2732_v38 = vrot.slane %v12642_v45, %v12631_v62  ;;  %v2736_v26 = vrot.slane %v12642_v45, %v12620_v49 }
 0x2e2   :  { %v7375_v19 = vrot.slane %v7367_v46, %v8780_v25  ;;  %3573 = vperm.xlu0 %7730, %v3434_v35   ;;  %v5767_v21 = vrot.slane %v5759_v34, %v8780_v25  ;;  %v2740_v7 = vrot.slane %v12642_v45, %v12624_v8  ;;  %v2744_v16 = vrot.slane %v12642_v45, %v12625_v30 }
 0x2e3   :  { %v2748_v60 = vrot.slane %v12642_v45, %v12626_v10  ;;  %v7382_v1 = vrot.slane %v7368_v4, %v8780_v25  ;;  %v5774_v14 = vrot.slane %v5760_v55, %v8780_v25  ;;  %v3484_v3 = vcombine.low %v2720_v32, %v2724_v52  ;;  %v12644_v32 = vld [vmem:[#allocation109_spill] sm:$0xff]  ;;  %v12645_v52 = vld [vmem:[#allocation78_spill] sm:$0xff] }
 0x2e4   :  { %v3485_v12 = vcombine.low %v2728_v63, %v2732_v38  ;;  %v3486_v20 = vcombine.low %v2736_v26, %v2740_v7  ;;  %v6669_v13 = vrot.slane %v12643_v39, %v12629_v24  ;;  %v6673_v57 = vrot.slane %v12643_v39, %v12627_v11  ;;  %v8049_v45 = vpop.eup %8048 }
 0x2e5   :  { %v3487_v50 = vcombine.low %v2744_v16, %v2748_v60  ;;  %v7383_v15 = vcombine.low %v7375_v19, %v7382_v1  ;;  %v3494_v36 = vrot.slane %v3484_v3, %v8780_v25  ;;  %v6677_v53 = vrot.slane %v12643_v39, %v12633_v28  ;;  %v12647_v16 = vld [vmem:[#allocation68_spill] sm:$0xff] }
 0x2e6   :  { %v3501_v59 = vrot.slane %v3485_v12, %v8780_v25  ;;  %v3508_v56 = vrot.slane %v3486_v20, %v8780_v25  ;;  %v6681_v23 = vrot.slane %v12643_v39, %v12631_v62  ;;  %v6685_v9 = vrot.slane %v12643_v39, %v12620_v49  ;;  %v12648_v12 = vld [vmem:[#allocation30_spill] sm:$0xff] }
 0x2e7   :  { %v3515_v48 = vrot.slane %v3487_v50, %v8780_v25  ;;  %7522 = vperm.xlu0 %7730, %v7383_v15   ;;  %v6689_v0 = vrot.slane %v12643_v39, %v12624_v8  ;;  %v6693_v41 = vrot.slane %v12643_v39, %v12625_v30  ;;  %v6697_v2 = vrot.slane %v12643_v39, %v12626_v10  ;;  %v12649_v50 = vld [vmem:[#allocation103_spill] sm:$0xff] }
 0x2e8   :  { %v3516_v37 = vcombine.low %v3494_v36, %v3501_v59  ;;  %vm2032_vm11 = vcmask 1048512   ;;  %v7433_v18 = vcombine.low %v6669_v13, %v6673_v57  ;;  %v7434_v51 = vcombine.low %v6677_v53, %v6681_v23 }
 0x2e9   :  { %v3517_v42 = vcombine.low %v3508_v56, %v3515_v48  ;;  %v5775_v40 = vcombine.low %v5767_v21, %v5774_v14  ;;  %v7435_v27 = vcombine.low %v6685_v9, %v6689_v0  ;;  %v7436_v46 = vcombine.low %v6693_v41, %v6697_v2  ;;  %v12646_v21 = vld [vmem:[#allocation25_spill] sm:$0xff] }
 0x2ea   :  { %v3524_v34 = vrot.slane %v3516_v37, %v8780_v25  ;;  %v2031_v35 = vrot.slane %v12645_v52, %v12644_v32  ;;  %v7443_v63 = vrot.slane %v7433_v18, %v8780_v25  ;;  %v7450_v4 = vrot.slane %v7434_v51, %v8780_v25 }
 0x2eb   :  { %v3531_v55 = vrot.slane %v3517_v42, %v8780_v25  ;;  %v4894_v19 = vcombine.high %v11520_v44, %v11520_v44  ;;  %5868 = vperm.xlu0 %7730, %v5775_v40   ;;  %v7457_v38 = vrot.slane %v7435_v27, %v8780_v25  ;;  %v7464_v26 = vrot.slane %v7436_v46, %v8780_v25  ;;  %v12651_v46 = vld [vmem:[#allocation92_spill] sm:$0xff] }
 0x2ec   :  { %v6147_v7 = vmul.f32 0.6931472, %v12646_v21  ;;  %v2033_v60 = vsel %vm2032_vm11, %v2031_v35, %v12647_v16  ;;  %v7465_v1 = vcombine.low %v7443_v63, %v7450_v4  ;;  %v6038_v20 = vmin.f32 %v12648_v12, 0.0  ;;  %v12653_v12 = vld [vmem:[#allocation108_spill] sm:$0xff] }
 0x2ed   :  { %v3532_v14 = vcombine.low %v3524_v34, %v3531_v55  ;;  %v7466_v3 = vcombine.low %v7457_v38, %v7464_v26  ;;  %8050 = vlog2.f32 %v12649_v50  ;;  %v4908_v13 = vrot.slane %v4894_v19, %v8780_v25  ;;  %v12650_v34 = vld [vmem:[#allocation105_spill] sm:$0xff]  ;;  %v3565_v55 = vpop.permute.xlu1 %3564 }
 0x2ee   :  { %v7473_v39 = vrot.slane %v7465_v1, %v8780_v25  ;;  %v4224_v57 = vmul.f32 0.6931472, %v8049_v45  ;;  %v2040_v36 = vrot.slane %v2033_v60, %v8780_v25  ;;  %v6166_v59 = vsub.f32 %v6038_v20, %v6147_v7  ;;  %v12652_v60 = vld [vmem:[#allocation11_spill] sm:$0xff] }
 0x2ef   :  { %3579 = vperm.xlu0 %7730, %v3532_v14   ;;  %v7480_v15 = vrot.slane %v7466_v3, %v8780_v25  ;;  %v4112_v53 = vmin.f32 %v11323_v43, 0.0  ;;  %v4901_v48 = vrot.slane %v11520_v44, %v8780_v25  ;;  %v4910_v23 = vcombine.high %v4908_v13, %v4908_v13  ;;  %v11748_v43 = vld [vmem:[%s11969_s8] sm:$0x1] }
 0x2f0   :  { %v2047_v37 = vrot.slane %v2040_v36, %v8780_v25  ;;  %v6573_v0 = vrot.slane %v6166_v59, %v12629_v24  ;;  %v6577_v41 = vrot.slane %v6166_v59, %v12627_v11  ;;  %v6581_v2 = vrot.slane %v6166_v59, %v12633_v28 }
 0x2f1   :  { %v7481_v56 = vcombine.low %v7473_v39, %v7480_v15  ;;  %v4240_v9 = vsub.f32 %v4112_v53, %v4224_v57  ;;  %v6585_v42 = vrot.slane %v6166_v59, %v12631_v62  ;;  %v6589_v44 = vrot.slane %v6166_v59, %v12620_v49 }
 0x2f2   :  { %v6593_v18 = vrot.slane %v6166_v59, %v12624_v8  ;;  %v6597_v51 = vrot.slane %v6166_v59, %v12625_v30  ;;  %v6601_v40 = vrot.slane %v6166_v59, %v12626_v10  ;;  %v2202_v27 = vmul.f32 0.6931472, %v12650_v34 }
 0x2f3   :  { %7528 = vperm.xlu0 %7730, %v7481_v56   ;;  %v2091_v45 = vmin.f32 %v12651_v46, 0.0  ;;  %v4909_v52 = vcombine.high %v4901_v48, %v4901_v48  ;;  %v4938_v63 = vrot.slane %v4910_v23, %v8780_v25  ;;  %v4992_v4 = vcombine.high %v4240_v9, %v4240_v9 }
 0x2f4   :  { %v2049_v19 = vmul.f32 %v2047_v37, %v11748_v43  ;;  %vm2050_vm9 = vcmask 1040384   ;;  %v7286_v38 = vcombine.low %v6573_v0, %v6577_v41  ;;  %v7287_v26 = vcombine.low %v6581_v2, %v6585_v42 }
 0x2f5   :  { %v7288_v21 = vcombine.low %v6589_v44, %v6593_v18  ;;  %v7289_v7 = vcombine.low %v6597_v51, %v6601_v40  ;;  %v2219_v16 = vsub.f32 %v2091_v45, %v2202_v27  ;;  %v6040_v1 = vmin.f32 %v12652_v60, 0.0 }
 0x2f6   :  { %v4924_v14 = vrot.slane %v4908_v13, %v8780_v25  ;;  %v3633_v20 = vrot.slane %v3565_v55, %v12653_v12  ;;  %v4917_v50 = vrot.slane %v4901_v48, %v8780_v25  ;;  %v4931_v39 = vrot.slane %v4909_v52, %v8780_v25 }
 0x2f7   :  { %v8051_v35 = vpop.eup %8050  ;;  %v5006_v36 = vrot.slane %v4992_v4, %v8780_v25  ;;  %v2051_v59 = vsel %vm2050_vm9, %v2049_v19, 0.0  ;;  %v7296_v53 = vrot.slane %v7286_v38, %v8780_v25  ;;  %v7303_v56 = vrot.slane %v7287_v26, %v8780_v25 }
 0x2f8   :  { %v6151_v3 = vmul.f32 0.6931472, %v8051_v35  ;;  %v5680_v57 = vcombine.low %v4924_v14, %v4938_v63  ;;  %v7708_v15 = vcombine.high %v4924_v14, %v4938_v63  ;;  %v7310_v23 = vrot.slane %v7288_v21, %v8780_v25 }
 0x2f9   :  { %v7317_v13 = vrot.slane %v7289_v7, %v8780_v25  ;;  %v2688_v37 = vrot.slane %v2219_v16, %v12629_v24  ;;  %v2692_v48 = vrot.slane %v2219_v16, %v12627_v11  ;;  %v2696_v0 = vrot.slane %v2219_v16, %v12633_v28 }
 0x2fa   :  { %v2700_v41 = vrot.slane %v2219_v16, %v12631_v62  ;;  %v2704_v2 = vrot.slane %v2219_v16, %v12620_v49  ;;  %v2708_v42 = vrot.slane %v2219_v16, %v12624_v8  ;;  %v2712_v44 = vrot.slane %v2219_v16, %v12625_v30 }
 0x2fb   :  { %v2716_v18 = vrot.slane %v2219_v16, %v12626_v10  ;;  %v6168_v51 = vsub.f32 %v6040_v1, %v6151_v3  ;;  %vm12654_vm6 = vcmask 720512   ;;  %v5678_v34 = vcombine.low %v4917_v50, %v4931_v39 }
 0x2fc   :  { %v11779_v40 = vsel %vm12654_vm6, %v3633_v20, %v11381_v61  ;;  %v7707_v27 = vcombine.high %v4917_v50, %v4931_v39  ;;  %v4999_v46 = vrot.slane %v4240_v9, %v8780_v25  ;;  %v5008_v45 = vcombine.high %v5006_v36, %v5006_v36 }
 0x2fd   :  { %v7318_v52 = vcombine.low %v7296_v53, %v7303_v56  ;;  %v7319_v35 = vcombine.low %v7310_v23, %v7317_v13  ;;  %v5702_v55 = vrot.slane %v5680_v57, %v8780_v25  ;;  %v5709_v63 = vrot.slane %v7708_v15, %v8780_v25 }
 0x2fe   :  { %2052 = vadd.xlane.f32.xlu1 %v2051_v59  ;;  %v3435_v4 = vcombine.low %v2688_v37, %v2692_v48  ;;  %v3436_v19 = vcombine.low %v2696_v0, %v2700_v41  ;;  %v3437_v38 = vcombine.low %v2704_v2, %v2708_v42  ;;  %v3438_v26 = vcombine.low %v2712_v44, %v2716_v18 }
 0x2ff   :  { %v6637_v21 = vrot.slane %v6168_v51, %v12629_v24  ;;  %v6641_v61 = vrot.slane %v6168_v51, %v12627_v11  ;;  %v6645_v7 = vrot.slane %v6168_v51, %v12633_v28  ;;  %v6649_v16 = vrot.slane %v6168_v51, %v12631_v62 }
 0x300   :  { %v6653_v9 = vrot.slane %v6168_v51, %v12620_v49  ;;  %v6657_v60 = vrot.slane %v6168_v51, %v12624_v8  ;;  %v6661_v1 = vrot.slane %v6168_v51, %v12625_v30  ;;  %v6665_v14 = vrot.slane %v6168_v51, %v12626_v10 }
 0x301   :  { %v5007_v3 = vcombine.high %v4999_v46, %v4999_v46  ;;  %v5022_v20 = vrot.slane %v5006_v36, %v8780_v25  ;;  %v5688_v50 = vrot.slane %v5678_v34, %v8780_v25  ;;  %v5695_v24 = vrot.slane %v7707_v27, %v8780_v25 }
 0x302   :  { %v5036_v11 = vrot.slane %v5008_v45, %v8780_v25  ;;  %v7326_v28 = vrot.slane %v7318_v52, %v8780_v25  ;;  %v7333_v62 = vrot.slane %v7319_v35, %v8780_v25  ;;  %v5711_v49 = vcombine.low %v5702_v55, %v5709_v63 }
 0x303   :  { %v3445_v8 = vrot.slane %v3435_v4, %v8780_v25  ;;  %v3452_v30 = vrot.slane %v3436_v19, %v8780_v25  ;;  %v3459_v10 = vrot.slane %v3437_v38, %v8780_v25  ;;  %v3466_v39 = vrot.slane %v3438_v26, %v8780_v25 }
 0x304   :  { %v7384_v57 = vcombine.low %v6637_v21, %v6641_v61  ;;  %v7385_v15 = vcombine.low %v6645_v7, %v6649_v16  ;;  %v7386_v36 = vcombine.low %v6653_v9, %v6657_v60  ;;  %v7387_v59 = vcombine.low %v6661_v1, %v6665_v14 }
 0x305   :  { %v5710_v53 = vcombine.low %v5688_v50, %v5695_v24  ;;  %v5015_v56 = vrot.slane %v4999_v46, %v8780_v25  ;;  %v5029_v23 = vrot.slane %v5007_v3, %v8780_v25  ;;  %v5778_v13 = vcombine.low %v5022_v20, %v5036_v11 }
 0x306   :  { %v7712_v37 = vcombine.high %v5022_v20, %v5036_v11  ;;  %v7334_v48 = vcombine.low %v7326_v28, %v7333_v62  ;;  %v5725_v0 = vrot.slane %v5711_v49, %v8780_v25  ;;  %v3467_v41 = vcombine.low %v3445_v8, %v3452_v30  ;;  %v5827_v20 = vpop.permute.xlu0 %5826  ;;  %v5830_v11 = vpop.permute.xlu1 %5829 }
 0x307   :  { %v3468_v2 = vcombine.low %v3459_v10, %v3466_v39  ;;  %v7394_v42 = vrot.slane %v7384_v57, %v8780_v25  ;;  %v7401_v44 = vrot.slane %v7385_v15, %v8780_v25  ;;  %v7408_v18 = vrot.slane %v7386_v36, %v8780_v25 }
 0x308   :  { %v7415_v51 = vrot.slane %v7387_v59, %v8780_v25  ;;  %v5718_v34 = vrot.slane %v5710_v53, %v8780_v25  ;;  %v5776_v27 = vcombine.low %v5015_v56, %v5029_v23  ;;  %v7711_v46 = vcombine.high %v5015_v56, %v5029_v23 }
 0x309   :  { %v3475_v52 = vrot.slane %v3467_v41, %v8780_v25  ;;  %v3482_v35 = vrot.slane %v3468_v2, %v8780_v25  ;;  %v7416_v55 = vcombine.low %v7394_v42, %v7401_v44  ;;  %v5800_v4 = vrot.slane %v5778_v13, %v8780_v25 }
 0x30a   :  { %v5726_v45 = vcombine.low %v5718_v34, %v5725_v0  ;;  %v7417_v63 = vcombine.low %v7408_v18, %v7415_v51  ;;  %v5807_v19 = vrot.slane %v7712_v37, %v8780_v25  ;;  %v5786_v38 = vrot.slane %v5776_v27, %v8780_v25  ;;  %v7484_v50 = vpop.permute.xlu0 %7483  ;;  %v7487_v62 = vpop.permute.xlu1 %7486 }
 0x30b   :  { %v5793_v26 = vrot.slane %v7711_v46, %v8780_v25  ;;  %v3483_v21 = vcombine.low %v3475_v52, %v3482_v35  ;;  %v7424_v61 = vrot.slane %v7416_v55, %v8780_v25  ;;  %v7537_v51 = vrot.slane %v7487_v62, %v12563_v29 }
 0x30c   :  { %v7431_v7 = vrot.slane %v7417_v63, %v8780_v25  ;;  %v5809_v16 = vcombine.low %v5800_v4, %v5807_v19 }
 0x30d   :  { %v5808_v9 = vcombine.low %v5786_v38, %v5793_v26 }
 0x30e   :  { %v7432_v60 = vcombine.low %v7424_v61, %v7431_v7  ;;  %v5823_v1 = vrot.slane %v5809_v16, %v8780_v25  ;;  %v7490_v30 = vpop.permute.xlu1 %7489 }
 0x30f   :  { %7519 = vperm.xlu1 %7731, %v7334_v48   ;;  %v5816_v14 = vrot.slane %v5808_v9, %v8780_v25  ;;  %v7542_v27 = vrot.slane %v7490_v30, %v12520_v33 }
 0x311   :  { %v5824_v3 = vcombine.low %v5816_v14, %v5823_v1 }
 0x312   :  { %v7493_v39 = vpop.permute.xlu1 %7492 }
 0x313   :  { %5865 = vperm.xlu1 %7731, %v5726_v45   ;;  %v7533_v45 = vrot.slane %v7484_v50, %v9935_v47  ;;  %v7547_v52 = vrot.slane %v7493_v39, %v12572_v31 }
 0x315   :  { %v7538_v55 = vsel %vm1934_vm1, %v7537_v51, %v7533_v45  ;;  %v12656_v51 = vld [vmem:[#allocation110_spill] sm:$0xff] }
 0x316   :  { %v7496_v15 = vpop.permute.xlu1 %7495  ;;  %v7543_v19 = vsel %vm1941_vm2, %v7542_v27, %v7538_v55 }
 0x317   :  { %3576 = vperm.xlu1 %7731, %v3483_v21   ;;  %v7552_v35 = vrot.slane %v7496_v15, %v12523_v5  ;;  %v5880_v21 = vrot.slane %v5830_v11, %v12563_v29  ;;  %v7548_v61 = vsel %vm1948_vm3, %v7547_v52, %v7543_v19 }
 0x318   :  { %v5833_v24 = vpop.permute.xlu0 %5832 }
 0x319   :  { %v5885_v16 = vrot.slane %v5833_v24, %v12520_v33  ;;  %v7553_v9 = vsel %vm1955_vm4, %v7552_v35, %v7548_v61 }
 0x31a   :  { %v7499_v59 = vpop.permute.xlu1 %7498 }
 0x31b   :  { %7525 = vperm.xlu1 %7731, %v7432_v60   ;;  %v7557_v63 = vrot.slane %v7499_v59, %v12580_v6 }
 0x31d   :  { %v7558_v62 = vsel %vm1962_vm5, %v7557_v63, %v7553_v9 }
 0x31e   :  { %v7502_v56 = vpop.permute.xlu1 %7501 }
 0x31f   :  { %5871 = vperm.xlu1 %7731, %v5824_v3   ;;  %v7562_v38 = vrot.slane %v7502_v56, %v12525_v17  ;;  %v5876_v3 = vrot.slane %v5827_v20, %v9935_v47 }
 0x321   :  { %v7563_v30 = vsel %vm12586_vm13, %v7562_v38, %v7558_v62  ;;  %v5881_v24 = vsel %vm1934_vm1, %v5880_v21, %v5876_v3  ;;  %vm12657_vm1 = vmmov %vm12597_vm7 }
 0x322   :  { %v5836_v28 = vpop.permute.xlu0 %5835  ;;  %v7505_v13 = vpop.permute.xlu1 %7504  ;;  %vm12664_vm7 = vmmov %vm12657_vm1 }
 0x323   :  { %v7567_v7 = vrot.slane %v7505_v13, %v12581_v58  ;;  %v5890_v50 = vrot.slane %v5836_v28, %v12572_v31  ;;  %v5886_v31 = vsel %vm1941_vm2, %v5885_v16, %v5881_v24  ;;  %v12655_v13 = vld [vmem:[#allocation23_spill] sm:$0xff]  ;;  %vm12659_vm2 = vmmov %vm12586_vm13 }
 0x325   :  { %v7568_v39 = vsel %vm12589_vm14, %v7567_v7, %v7563_v30 }
 0x326   :  { %v7508_v48 = vpop.permute.xlu1 %7507 }
 0x327   :  { %v7572_v60 = vrot.slane %v7508_v48, %v12593_v22 }
 0x328   :  { %v11820_v49 = vpop.permute.xlu0 %5838 }
 0x329   :  { %v5895_v11 = vrot.slane %v11820_v49, %v12523_v5  ;;  %v7573_v20 = vsel %vm12595_vm15, %v7572_v60, %v7568_v39  ;;  %v5891_v49 = vsel %vm1948_vm3, %v5890_v50, %v5886_v31  ;;  %vm12660_vm3 = vmmov %vm12589_vm14 }
 0x32a   :  { %v7511_v41 = vpop.permute.xlu1 %7510 }
 0x32b   :  { %v7577_v47 = vrot.slane %v7511_v41, %v12588_v54  ;;  %v5896_v48 = vsel %vm1955_vm4, %v5895_v11, %v5891_v49  ;;  %vm12661_vm4 = vmmov %vm12654_vm6 }
 0x32c   :  { %vm12665_vm6 = vmmov %vm12661_vm4 }
 0x32d   :  { %v7578_v52 = vsel %vm12657_vm1, %v7577_v47, %v7573_v20 }
 0x32e   :  { %v7514_v42 = vpop.permute.xlu1 %7513 }
 0x32f   :  { %v7582_v56 = vrot.slane %v7514_v42, %v12653_v12 }
 0x330   :  { %v11822_v8 = vpop.permute.xlu0 %5841 }
 0x331   :  { %v5900_v15 = vrot.slane %v11822_v8, %v12580_v6  ;;  %v7583_v55 = vsel %vm12661_vm4, %v7582_v56, %v7578_v52 }
 0x333   :  { %v5901_v45 = vsel %vm1962_vm5, %v5900_v15, %v5896_v48  ;;  %vm12662_vm5 = vmmov %vm12595_vm15 }
 0x334   :  { %v11824_v10 = vpop.permute.xlu0 %5844 }
 0x335   :  { %v5905_v28 = vrot.slane %v11824_v10, %v12525_v17 }
 0x337   :  { %v5906_v42 = vsel %vm12659_vm2, %v5905_v28, %v5901_v45  ;;  %v402_v28 = vld [vmem:[%s11970_s9] sm:$0x1] }
 0x33a   :  { %v11826_v57 = vpop.permute.xlu0 %5847 }
 0x33b   :  { %v5910_v59 = vrot.slane %v11826_v57, %v12581_v58  ;;  %v12658_v57 = vld [vmem:[#allocation89_spill] sm:$0xff] }
 0x33e   :  { %v11828_v36 = vpop.permute.xlu0 %5850 }
 0x33f   :  { %v5915_v41 = vrot.slane %v11828_v36, %v12593_v22 }
 0x343   :  { %v11830_v53 = vpop.permute.xlu0 %5853 }
 0x344   :  { %v5920_v35 = vrot.slane %v11830_v53, %v12588_v54  ;;  %v12663_v53 = vld [vmem:[#allocation82_spill] sm:$0xff] }
 0x348   :  { %v11832_v23 = vpop.permute.xlu0 %5856 }
 0x349   :  { %v5925_v63 = vrot.slane %v11832_v23, %v12653_v12 }
 0x34b   :  { %v11840_v44 = vpop.permute.xlu1 %5859 }
 0x34c   :  { %v11834_v37 = vpop.permute.xlu0 %3567  ;;  %v5930_v19 = vrot.slane %v11840_v44, %v12655_v13 }
 0x34d   :  { %v3638_v6 = vrot.slane %v11834_v37, %v12655_v13 }
 0x354   :  { %v11836_v0 = vpop.permute.xlu0 %7516 }
 0x355   :  { %v7587_v58 = vrot.slane %v11836_v0, %v12655_v13  ;;  %v3639_v0 = vsel %vm2004_vm12, %v3638_v6, %v11779_v40  ;;  %v4096_v13 = vsub.f32 %v402_v28, %v11748_v43 }
 0x359   :  { %v11838_v2 = vpop.permute.xlu0 %5862  ;;  %v3571_v34 = vpop.permute.xlu1 %3570 }
 0x35a   :  { %v3643_v27 = vrot.slane %v3571_v34, %v12656_v51  ;;  %v5911_v34 = vsel %vm12660_vm3, %v5910_v59, %v5906_v42  ;;  %v5935_v21 = vrot.slane %v11838_v2, %v12656_v51 }
 0x35c   :  { %v3644_v54 = vsel %vm2011_vm10, %v3643_v27, %v3639_v0 }
 0x361   :  { %v11842_v18 = vpop.permute.xlu0 %3573 }
 0x362   :  { %v3648_v37 = vrot.slane %v11842_v18, %v12658_v57  ;;  %v5916_v18 = vsel %vm12662_vm5, %v5915_v41, %v5911_v34 }
 0x363   :  { %v5921_v23 = vsel %vm12664_vm7, %v5920_v35, %v5916_v18 }
 0x364   :  { %v3649_v12 = vsel %vm2018_vm8, %v3648_v37, %v3644_v54  ;;  %v5926_v9 = vsel %vm12665_vm6, %v5925_v63, %v5921_v23 }
 0x365   :  { %v5931_v3 = vsel %vm2004_vm12, %v5930_v19, %v5926_v9 }
 0x366   :  { %v11846_v46 = vpop.permute.xlu0 %7522 }
 0x367   :  { %v7597_v60 = vrot.slane %v11846_v46, %v12658_v57 }
 0x36a   :  { %v11861_v1 = vpop.permute.xlu0 %5868 }
 0x36b   :  { %v5945_v39 = vrot.slane %v11861_v1, %v12663_v53 }
 0x36e   :  { %v3580_v17 = vpop.permute.xlu0 %3579 }
 0x36f   :  { %v3658_v40 = vrot.slane %v3580_v17, %v12644_v32 }
 0x372   :  { %v7529_v61 = vpop.permute.xlu0 %7528 }
 0x373   :  { %v7607_v11 = vrot.slane %v7529_v61, %v12644_v32 }
 0x38b   :  { %v2053_v4 = vpop.xlane.xlu1 %2052 }
 0x38c   :  { %v2054_v26 = vrot.slane %v2053_v4, 4 }
 0x38e   :  { %v2055_v14 = vadd.f32 %v2054_v26, %v2053_v4  ;;  %v7588_v26 = vsel %vm2004_vm12, %v7587_v58, %v7583_v55 }
 0x38f   :  { %v7520_v29 = vpop.permute.xlu1 %7519 }
 0x390   :  { %v2056_v33 = vrot.slane %v2055_v14, 2  ;;  %v7592_v22 = vrot.slane %v7520_v29, %v12656_v51  ;;  %v5936_v29 = vsel %vm2011_vm10, %v5935_v21, %v5931_v3 }
 0x392   :  { %v2057_v5 = vadd.f32 %v2056_v33, %v2055_v14  ;;  %v7593_v7 = vsel %vm2011_vm10, %v7592_v22, %v7588_v26 }
 0x393   :  { %v5866_v8 = vpop.permute.xlu1 %5865  ;;  %v7598_v30 = vsel %vm2018_vm8, %v7597_v60, %v7593_v7 }
 0x394   :  { %v2058_v10 = vrot.slane %v2057_v5, 1  ;;  %v5940_v44 = vrot.slane %v5866_v8, %v12658_v57 }
 0x396   :  { %v2059_v36 = vadd.f32 %v2058_v10, %v2057_v5  ;;  %v5941_v33 = vsel %vm2018_vm8, %v5940_v44, %v5936_v29 }
 0x397   :  { %v3577_v4 = vpop.permute.xlu1 %3576  ;;  %v5946_v5 = vsel %vm2025_vm0, %v5945_v39, %v5941_v33 }
 0x398   :  { %v3653_v38 = vrot.slane %v3577_v4, %v12663_v53  ;;  %7719 = vpush %v2059_v36 }
 0x39a   :  { %v3654_v16 = vsel %vm2025_vm0, %v3653_v38, %v3649_v12 }
 0x39b   :  { %v3659_v2 = vsel %vm2032_vm11, %v3658_v40, %v3654_v16  ;;  %v7526_v14 = vpop.permute.xlu1 %7525 }
 0x39c   :  { %v7602_v50 = vrot.slane %v7526_v14, %v12663_v53  ;;  %v3666_v62 = vrot.slane %v3659_v2, %v8780_v25 }
 0x39e   :  { %v7603_v24 = vsel %vm2025_vm0, %v7602_v50, %v7598_v30  ;;  %v3673_v46 = vrot.slane %v3666_v62, %v8780_v25 }
 0x39f   :  { %v7608_v15 = vsel %vm2032_vm11, %v7607_v11, %v7603_v24  ;;  %v5872_v47 = vpop.permute.xlu1 %5871 }
 0x3a0   :  { %v5950_v31 = vrot.slane %v5872_v47, %v12644_v32  ;;  %v3675_v20 = vmul.f32 %v3673_v46, %v11748_v43  ;;  %v7615_v49 = vrot.slane %v7608_v15, %v8780_v25 }
 0x3a2   :  { %v5951_v59 = vsel %vm2032_vm11, %v5950_v31, %v5946_v5  ;;  %v3676_v56 = vsel %vm2050_vm9, %v3675_v20, 0.0  ;;  %v7622_v6 = vrot.slane %v7615_v49, %v8780_v25 }
 0x3a3   :  { %v5958_v1 = vrot.slane %v5951_v59, %v8780_v25  ;;  %3677 = vadd.xlane.f32.xlu1 %v3676_v56 }
 0x3a4   :  { %v7624_v41 = vmul.f32 %v7622_v6, %v402_v28 }
 0x3a5   :  { %v5965_v32 = vrot.slane %v5958_v1, %v8780_v25 }
 0x3a6   :  { %v7625_v51 = vsel %vm2050_vm9, %v7624_v41, 0.0 }
 0x3a7   :  { %v5967_v8 = vmul.f32 %v5965_v32, %v4096_v13 }
 0x3a9   :  { %v5968_v48 = vsel %vm2050_vm9, %v5967_v8, 0.0 }
 0x3aa   :  { %5969 = vadd.xlane.f32.xlu0 %v5968_v48 }
 0x3ae   :  { %7626 = vadd.xlane.f32.xlu0 %v7625_v51 }
 0x3c9   :  { %s7720_s9 = spop %7719 }
 0x3ca   :  { %7656 = sst [smem:[#allocation3]] %s7720_s9 }
 0x430   :  { %v3678_v27 = vpop.xlane.xlu1 %3677 }
 0x431   :  { %v3679_v17 = vrot.slane %v3678_v27, 4 }
 0x433   :  { %v3680_v10 = vadd.f32 %v3679_v17, %v3678_v27 }
 0x435   :  { %v3681_v45 = vrot.slane %v3680_v10, 2 }
 0x437   :  { %v3682_v52 = vadd.f32 %v3681_v45, %v3680_v10  ;;  %v5970_v43 = vpop.xlane.xlu0 %5969 }
 0x438   :  { %v5971_v58 = vrot.slane %v5970_v43, 4 }
 0x439   :  { %v3683_v57 = vrot.slane %v3682_v52, 1 }
 0x43a   :  { %v5972_v37 = vadd.f32 %v5971_v58, %v5970_v43 }
 0x43b   :  { %v7627_v25 = vpop.xlane.xlu0 %7626  ;;  %v3684_v42 = vadd.f32 %v3683_v57, %v3682_v52 }
 0x43c   :  { %v5973_v35 = vrot.slane %v5972_v37, 2  ;;  %v7628_v22 = vrot.slane %v7627_v25, 4 }
 0x43d   :  { %7721 = vpush %v3684_v42 }
 0x43e   :  { %v7629_v36 = vadd.f32 %v7628_v22, %v7627_v25  ;;  %v5974_v34 = vadd.f32 %v5973_v35, %v5972_v37 }
 0x440   :  { %v7630_v55 = vrot.slane %v7629_v36, 2  ;;  %v5975_v63 = vrot.slane %v5974_v34, 1 }
 0x442   :  { %v7631_v0 = vadd.f32 %v7630_v55, %v7629_v36  ;;  %v5976_v4 = vadd.f32 %v5975_v63, %v5974_v34 }
 0x444   :  { %7723 = vpush %v5976_v4  ;;  %v7632_v18 = vrot.slane %v7631_v0, 1 }
 0x446   :  { %v7633_v19 = vadd.f32 %v7632_v18, %v7631_v0 }
 0x448   :  { %7725 = vpush %v7633_v19 }
 0x46e   :  { %s7722_s30 = spop %7721 }
 0x46f   :  { %7659 = sst [smem:[#allocation3 + $0x1]] %s7722_s30 }
 0x475   :  { %s7724_s11 = spop %7723 }
 0x476   :  { %7662 = sst [smem:[#allocation3 + $0x2]] %s7724_s11 }
 0x479   :  { %s7726_s12 = spop %7725 }
 0x47a   :  { %7665 = sst [smem:[#allocation3 + $0x3]] %s7726_s12 }
 0x47b   :  { %8062 = shalt.err (!%p8059_p2)
}
 0x47c   :  { %s8067_s19 = smov [#allocation3]  }
 0x47d   :  { %7673 = dma.smem_to_hbm %s8067_s19, 16, %s11971_s10, [#allocation4]  }
 0x47e   :  { %8063 = dma.done.wait [#allocation4], 16  }
 0x47f   :  { %8064 = vsyncadd [#allocation4], 4294967280 }
 0x480   :  { %7677 = sfence }
 0x481   :  { %7678 = vsyncpa [#allocation4], 1 }

</bundles_post_ra>
